<compile_context>
chip_gen: v6e
topology: v6e:2x2x1
jax: 0.10.0
libtpu: 0.0.40
codegen_flags: <defaults>
</compile_context>

<pallas_src>
import math

import jax
import jax.numpy as jnp
import numpy as np
from jax import lax
from jax.experimental import pallas as pl
from jax.experimental.pallas import tpu as pltpu

CONV_CHANNELS = 20
FC1_HIDDEN = 100
LANE = 128


def hu_kernel(x_ref, w_band_ref, b_band_ref, w1_ref, b1_ref, w2_ref, b2_ref,
              out_ref):
    """Fused Conv1d + MaxPool1d + tanh + FC1 + tanh + FC2 on one batch tile.

    x_ref      : (BT, C)       spectra (batch on sublanes, bands on lanes)
    w_band_ref : (p, C, F)     banded conv weights, one band per in-window offset
    b_band_ref : (1, F)        conv bias broadcast over pooled positions
    w1_ref     : (F, 128)      fc1 weight (hidden padded 100 -> 128)
    b1_ref     : (1, 128)
    w2_ref     : (128, NCP)    fc2 weight (classes zero-padded to lane multiple)
    b2_ref     : (1, NCP)
    out_ref    : (BT, NCP)
    """
    x = x_ref[...]                                           # (BT, C)
    p = w_band_ref.shape[0]

    # Conv1d + MaxPool1d fused: elementwise max over the p in-window offsets of
    # banded matmuls (bias is per-channel, identical across the window, so it
    # commutes with the max and is added once afterwards).
    m = jnp.dot(x, w_band_ref[0], preferred_element_type=jnp.float32)
    for j in range(1, p):                                    # p is small & static
        m = jnp.maximum(
            m, jnp.dot(x, w_band_ref[j], preferred_element_type=jnp.float32))

    feats = jnp.tanh(m + b_band_ref[...])                    # (BT, F) torch order
    h1 = jnp.tanh(jnp.dot(feats, w1_ref[...],
                          preferred_element_type=jnp.float32) + b1_ref[...])
    out_ref[...] = (jnp.dot(h1, w2_ref[...],
                            preferred_element_type=jnp.float32) + b2_ref[...])


def hu_forward(x, kp, n_classes, *, batch_tile=128):
    """x: (B, C, 1, 1) float32; kp: dict from to_kernel_layout."""
    B = x.shape[0]
    C = x.shape[1]
    p, _, F = kp["w_band"].shape
    h1p = kp["w1"].shape[1]
    ncp = kp["w2"].shape[1]

    x2 = x.reshape(B, C).astype(jnp.float32)                 # == squeeze path
    b_pad = ((B + batch_tile - 1) // batch_tile) * batch_tile
    if b_pad != B:                                           # pad instead of assert
        x2 = jnp.pad(x2, ((0, b_pad - B), (0, 0)))
    grid = (b_pad // batch_tile,)

    out = pl.pallas_call(
        hu_kernel,
        out_shape=jax.ShapeDtypeStruct((b_pad, ncp), jnp.float32),
        grid=grid,
        in_specs=[
            pl.BlockSpec((batch_tile, C), lambda i: (i, 0)),     # x
            pl.BlockSpec((p, C, F), lambda i: (0, 0, 0)),        # banded conv w
            pl.BlockSpec((1, F), lambda i: (0, 0)),              # conv bias
            pl.BlockSpec((F, h1p), lambda i: (0, 0)),            # fc1 w (padded)
            pl.BlockSpec((1, h1p), lambda i: (0, 0)),            # fc1 b
            pl.BlockSpec((h1p, ncp), lambda i: (0, 0)),          # fc2 w (padded)
            pl.BlockSpec((1, ncp), lambda i: (0, 0)),            # fc2 b
        ],
        out_specs=pl.BlockSpec((batch_tile, ncp), lambda i: (i, 0)),
        compiler_params=pltpu.CompilerParams(
            dimension_semantics=("parallel",)),
    )(x2, kp["w_band"], kp["b_band"], kp["w1"], kp["b1"], kp["w2"], kp["b2"])

    return out[:B, :n_classes]


# ----------------------------------------------------------------------------
# Parameter construction (mirrors HuEtAl.__init__ / weight_init shapes) and a
# plain-JAX reference that follows the PyTorch code path exactly.
# ----------------------------------------------------------------------------
def make_torch_layout_params(key, C, n_classes, k, F):
    ks = jax.random.split(key, 6)
    u = lambda kk, s: jax.random.uniform(kk, s, jnp.float32, -0.05, 0.05)
    return {
        "conv_w": u(ks[0], (CONV_CHANNELS, 1, k)),   # Conv1d(1, 20, k) weight
        "conv_b": u(ks[1], (CONV_CHANNELS,)),
        "fc1_w": u(ks[2], (FC1_HIDDEN, F)),          # Linear(F, 100)
        "fc1_b": u(ks[3], (FC1_HIDDEN,)),
        "fc2_w": u(ks[4], (n_classes, FC1_HIDDEN)),  # Linear(100, n_classes)
        "fc2_b": u(ks[5], (n_classes,)),
    }


def to_kernel_layout(tp, C, k, p, L_pool, n_classes):
    OC = CONV_CHANNELS
    F = OC * L_pool

    # Banded conv weights:
    #   band[j, c, o*L_pool + t] = conv_w[o, 0, c - (t*p + j)]  (0 if tap OOB)
    # so  (x @ band[j])[b, o*L_pool + t] = conv1d(x)[b, o, t*p + j]  already in
    # the torch flatten order; maxpool = elementwise max over j.
    w = np.asarray(tp["conv_w"], np.float32)[:, 0, :]            # (OC, k)
    j_idx = np.arange(p)[:, None, None, None]
    c_idx = np.arange(C)[None, :, None, None]
    o_idx = np.arange(OC)[None, None, :, None]
    t_idx = np.arange(L_pool)[None, None, None, :]
    tap = c_idx - (t_idx * p + j_idx)                            # (p, C, 1, Lp)
    valid = (tap >= 0) & (tap < k)
    band = np.where(valid, w[o_idx, np.clip(tap, 0, k - 1)], 0.0)
    band = band.reshape(p, C, F).astype(np.float32)
    b_band = np.repeat(np.asarray(tp["conv_b"], np.float32), L_pool)[None, :]

    # Lane-dense padding: hidden 100 -> 128, n_classes -> multiple of 128.
    h1p = LANE
    ncp = LANE * (-(-n_classes // LANE))
    w1 = np.zeros((F, h1p), np.float32)
    w1[:, :FC1_HIDDEN] = np.asarray(tp["fc1_w"], np.float32).T
    b1 = np.zeros((1, h1p), np.float32)
    b1[0, :FC1_HIDDEN] = np.asarray(tp["fc1_b"], np.float32)
    w2 = np.zeros((h1p, ncp), np.float32)
    w2[:FC1_HIDDEN, :n_classes] = np.asarray(tp["fc2_w"], np.float32).T
    b2 = np.zeros((1, ncp), np.float32)
    b2[0, :n_classes] = np.asarray(tp["fc2_b"], np.float32)

    return {
        "w_band": jnp.asarray(band), "b_band": jnp.asarray(b_band),
        "w1": jnp.asarray(w1), "b1": jnp.asarray(b1),
        "w2": jnp.asarray(w2), "b2": jnp.asarray(b2),
    }


def torch_reference(x4d, tp, pool_size):
    """Plain-JAX mirror of HuEtAl.forward."""
    B, C = x4d.shape[0], x4d.shape[1]
    hp = lax.Precision.HIGHEST
    xs = x4d.reshape(B, C)                                   # squeeze(-1).squeeze(-1)
    xc = xs[:, None, :]                                      # unsqueeze(1): (B, 1, C)
    conv = lax.conv_general_dilated(
        xc, tp["conv_w"], window_strides=(1,), padding="VALID",
        dimension_numbers=("NCH", "OIH", "NCH"), precision=hp)
    conv = conv + tp["conv_b"][None, :, None]                # (B, 20, L_conv)
    L_conv = conv.shape[2]
    L_pool = L_conv // pool_size
    pooled = conv[:, :, :L_pool * pool_size].reshape(
        B, CONV_CHANNELS, L_pool, pool_size).max(axis=-1)    # MaxPool1d(p)
    act = jnp.tanh(pooled)                                   # (B, 20, L_pool)
    flat = act.reshape(B, -1)                                # torch .view order
    h1 = jnp.tanh(jnp.dot(flat, tp["fc1_w"].T, precision=hp) + tp["fc1_b"])
    return jnp.dot(h1, tp["fc2_w"].T, precision=hp) + tp["fc2_b"]


if __name__ == "__main__":
    # Small, forward-consistent shapes: 90 spectral bands -> kernel_size=10,
    # pool_size=2, L_pool=40, features_size=800 (matches _get_final_flattened_size).
    B, C, N_CLASSES = 200, 90, 10
    k = math.floor(C / 9)
    p = math.ceil(k / 5)
    L_conv = C - k + 1
    L_pool = L_conv // p
    F = CONV_CHANNELS * L_pool

    key = jax.random.PRNGKey(0)
    k_param, k_x = jax.random.split(key)
    tp = make_torch_layout_params(k_param, C, N_CLASSES, k, F)
    kp = to_kernel_layout(tp, C, k, p, L_pool, N_CLASSES)

    # DeepHyperX feeds (B, C, 1, 1) for patch_size=1.
    x = jax.random.uniform(k_x, (B, C, 1, 1), jnp.float32)

    out = hu_forward(x, kp, N_CLASSES, batch_tile=128)
    out = jax.block_until_ready(out)

    ref = torch_reference(x, tp, p)
    assert out.shape == (B, N_CLASSES)
    err = float(jnp.max(jnp.abs(out - ref)))
    assert jnp.allclose(out, ref, atol=1e-3, rtol=1e-3), f"max abs err {err}"
    print("KERNEL_OK")
</pallas_src>

<mosaic_0001>
module attributes {stable_mosaic.version = 11 : i64} {
  func.func @hu_kernel(%arg0: i32, %arg1: memref<128x90xf32, #tpu.memory_space<vmem>>, %arg2: memref<2x90x800xf32, #tpu.memory_space<vmem>>, %arg3: memref<1x800xf32, #tpu.memory_space<vmem>>, %arg4: memref<800x128xf32, #tpu.memory_space<vmem>>, %arg5: memref<1x128xf32, #tpu.memory_space<vmem>>, %arg6: memref<128x128xf32, #tpu.memory_space<vmem>>, %arg7: memref<1x128xf32, #tpu.memory_space<vmem>>, %arg8: memref<128x128xf32, #tpu.memory_space<vmem>>) attributes {dimension_semantics = [#tpu.dimension_semantics<parallel>], iteration_bounds = array<i64: 2>, scalar_prefetch = 0 : i64, scratch_operands = 0 : i64, tpu.core_type = #tpu.core_type<tc>, window_params = [{transform_indices = @transform_0, window_bounds = array<i64: 128, 90>}, {pipeline_mode = #tpu.pipeline_mode<synchronous>, transform_indices = @transform_1, window_bounds = array<i64: 2, 90, 800>}, {pipeline_mode = #tpu.pipeline_mode<synchronous>, transform_indices = @transform_2, window_bounds = array<i64: 1, 800>}, {pipeline_mode = #tpu.pipeline_mode<synchronous>, transform_indices = @transform_3, window_bounds = array<i64: 800, 128>}, {pipeline_mode = #tpu.pipeline_mode<synchronous>, transform_indices = @transform_4, window_bounds = array<i64: 1, 128>}, {pipeline_mode = #tpu.pipeline_mode<synchronous>, transform_indices = @transform_5, window_bounds = array<i64: 128, 128>}, {pipeline_mode = #tpu.pipeline_mode<synchronous>, transform_indices = @transform_6, window_bounds = array<i64: 1, 128>}, {transform_indices = @transform_7, window_bounds = array<i64: 128, 128>}]} {
    %c0 = arith.constant 0 : index
    %c0_0 = arith.constant 0 : index
    %0 = vector.load %arg1[%c0, %c0_0] : memref<128x90xf32, #tpu.memory_space<vmem>>, vector<128x90xf32>
    %c0_1 = arith.constant 0 : index
    %c0_2 = arith.constant 0 : index
    %c0_3 = arith.constant 0 : index
    %1 = vector.load %arg2[%c0_1, %c0_2, %c0_3] : memref<2x90x800xf32, #tpu.memory_space<vmem>>, vector<1x90x800xf32>
    %2 = vector.shape_cast %1 : vector<1x90x800xf32> to vector<90x800xf32>
    %cst = arith.constant dense<0.000000e+00> : vector<128x800xf32>
    %3 = tpu.matmul %0, %2, %cst {dimension_numbers = #tpu.dot_dimension_numbers<[1], [0], [0], [1], [0, 0, 1, 1], [], []>} : vector<128x90xf32>, vector<90x800xf32>, vector<128x800xf32> -> vector<128x800xf32>
    %c1 = arith.constant 1 : index
    %c0_4 = arith.constant 0 : index
    %c0_5 = arith.constant 0 : index
    %4 = vector.load %arg2[%c1, %c0_4, %c0_5] : memref<2x90x800xf32, #tpu.memory_space<vmem>>, vector<1x90x800xf32>
    %5 = vector.shape_cast %4 : vector<1x90x800xf32> to vector<90x800xf32>
    %cst_6 = arith.constant dense<0.000000e+00> : vector<128x800xf32>
    %6 = tpu.matmul %0, %5, %cst_6 {dimension_numbers = #tpu.dot_dimension_numbers<[1], [0], [0], [1], [0, 0, 1, 1], [], []>} : vector<128x90xf32>, vector<90x800xf32>, vector<128x800xf32> -> vector<128x800xf32>
    %7 = arith.maximumf %3, %6 : vector<128x800xf32>
    %c0_7 = arith.constant 0 : index
    %c0_8 = arith.constant 0 : index
    %8 = vector.load %arg3[%c0_7, %c0_8] : memref<1x800xf32, #tpu.memory_space<vmem>>, vector<1x800xf32>
    %9 = vector.broadcast %8 : vector<1x800xf32> to vector<128x800xf32>
    %10 = arith.addf %7, %9 : vector<128x800xf32>
    %11 = math.tanh %10 : vector<128x800xf32>
    %c0_9 = arith.constant 0 : index
    %c0_10 = arith.constant 0 : index
    %12 = vector.load %arg4[%c0_9, %c0_10] : memref<800x128xf32, #tpu.memory_space<vmem>>, vector<800x128xf32>
    %cst_11 = arith.constant dense<0.000000e+00> : vector<128x128xf32>
    %13 = tpu.matmul %11, %12, %cst_11 {dimension_numbers = #tpu.dot_dimension_numbers<[1], [0], [0], [1], [0, 0, 1, 1], [], []>} : vector<128x800xf32>, vector<800x128xf32>, vector<128x128xf32> -> vector<128x128xf32>
    %c0_12 = arith.constant 0 : index
    %c0_13 = arith.constant 0 : index
    %14 = vector.load %arg5[%c0_12, %c0_13] : memref<1x128xf32, #tpu.memory_space<vmem>>, vector<1x128xf32>
    %15 = vector.broadcast %14 : vector<1x128xf32> to vector<128x128xf32>
    %16 = arith.addf %13, %15 : vector<128x128xf32>
    %17 = math.tanh %16 : vector<128x128xf32>
    %c0_14 = arith.constant 0 : index
    %c0_15 = arith.constant 0 : index
    %18 = vector.load %arg6[%c0_14, %c0_15] : memref<128x128xf32, #tpu.memory_space<vmem>>, vector<128x128xf32>
    %cst_16 = arith.constant dense<0.000000e+00> : vector<128x128xf32>
    %19 = tpu.matmul %17, %18, %cst_16 {dimension_numbers = #tpu.dot_dimension_numbers<[1], [0], [0], [1], [0, 0, 1, 1], [], []>} : vector<128x128xf32>, vector<128x128xf32>, vector<128x128xf32> -> vector<128x128xf32>
    %c0_17 = arith.constant 0 : index
    %c0_18 = arith.constant 0 : index
    %20 = vector.load %arg7[%c0_17, %c0_18] : memref<1x128xf32, #tpu.memory_space<vmem>>, vector<1x128xf32>
    %21 = vector.broadcast %20 : vector<1x128xf32> to vector<128x128xf32>
    %22 = arith.addf %19, %21 : vector<128x128xf32>
    %c0_19 = arith.constant 0 : index
    %c0_20 = arith.constant 0 : index
    %23 = vector.load %arg8[%c0_19, %c0_20] : memref<128x128xf32, #tpu.memory_space<vmem>>, vector<128x128xf32>
    tpu.vector_store %arg8[%c0_19, %c0_20], %22 {strides = array<i32>} : memref<128x128xf32, #tpu.memory_space<vmem>>, vector<128x128xf32>,
    return
  }
  func.func @transform_0(%arg0: i32) -> (i32, i32) {
    %c0_i32 = arith.constant 0 : i32
    %c0_i32_0 = arith.constant 0 : i32
    return %arg0, %c0_i32 : i32, i32
  }
  func.func @transform_1(%arg0: i32) -> (i32, i32, i32) {
    %c0_i32 = arith.constant 0 : i32
    %c0_i32_0 = arith.constant 0 : i32
    %c0_i32_1 = arith.constant 0 : i32
    %c0_i32_2 = arith.constant 0 : i32
    return %c0_i32, %c0_i32_0, %c0_i32_1 : i32, i32, i32
  }
  func.func @transform_2(%arg0: i32) -> (i32, i32) {
    %c0_i32 = arith.constant 0 : i32
    %c0_i32_0 = arith.constant 0 : i32
    %c0_i32_1 = arith.constant 0 : i32
    return %c0_i32, %c0_i32_0 : i32, i32
  }
  func.func @transform_3(%arg0: i32) -> (i32, i32) {
    %c0_i32 = arith.constant 0 : i32
    %c0_i32_0 = arith.constant 0 : i32
    %c0_i32_1 = arith.constant 0 : i32
    return %c0_i32, %c0_i32_0 : i32, i32
  }
  func.func @transform_4(%arg0: i32) -> (i32, i32) {
    %c0_i32 = arith.constant 0 : i32
    %c0_i32_0 = arith.constant 0 : i32
    %c0_i32_1 = arith.constant 0 : i32
    return %c0_i32, %c0_i32_0 : i32, i32
  }
  func.func @transform_5(%arg0: i32) -> (i32, i32) {
    %c0_i32 = arith.constant 0 : i32
    %c0_i32_0 = arith.constant 0 : i32
    %c0_i32_1 = arith.constant 0 : i32
    return %c0_i32, %c0_i32_0 : i32, i32
  }
  func.func @transform_6(%arg0: i32) -> (i32, i32) {
    %c0_i32 = arith.constant 0 : i32
    %c0_i32_0 = arith.constant 0 : i32
    %c0_i32_1 = arith.constant 0 : i32
    return %c0_i32, %c0_i32_0 : i32, i32
  }
  func.func @transform_7(%arg0: i32) -> (i32, i32) {
    %c0_i32 = arith.constant 0 : i32
    %c0_i32_0 = arith.constant 0 : i32
    return %arg0, %c0_i32 : i32, i32
  }
}

</mosaic_0001>

<bundles_post_ra>
// kernel: tpu_custom_call.1
= control target key start
LH: loop header
LB: loop body
LE: loop exit
PB: predicated region body
PF: predicated region fallthrough
CT: control target
= control target key end

     0   :  { %12 = vsyncpa [#allocation3], 0  ;;  %s6466_s0 = inlined_call_operand.vmem [shape: f32[256,90], index: 0, kind: input, shape index: {}]   ;;  %s6467_s1 = inlined_call_operand.vmem [shape: f32[2,90,800], index: 1, kind: input, shape index: {}]   ;;  %s6468_s2 = inlined_call_operand.vmem [shape: f32[1,800], index: 2, kind: input, shape index: {}]   ;;  %s6469_s3 = inlined_call_operand.vmem [shape: f32[800,128], index: 3, kind: input, shape index: {}]   ;;  %s6470_s4 = inlined_call_operand.vmem [shape: f32[1,128], index: 4, kind: input, shape index: {}]   ;;  %s6471_s5 = inlined_call_operand.vmem [shape: f32[128,128], index: 5, kind: input, shape index: {}]   ;;  %s6472_s6 = inlined_call_operand.vmem [shape: f32[1,128], index: 6, kind: input, shape index: {}]   ;;  %s6473_s7 = inlined_call_operand.hbm [shape: f32[256,128], index: 7, kind: output, shape index: {}]  }
   0x1   :  { %14 = vsyncpa [#allocation3 + $0x1], 0  ;;  %s4392_s24 = smov 0   ;;  %s4394_s25 = smov 0  }
   0x2   :  { %s4396_s26 = smov 0   ;;  %s4398_s27 = smov 0  }
   0x3 LB: > { %s4413_s28 = sadd.s32 4294967295, %s4346_s27   ;;  %s3198_s29 = sadd.s32 4294967294, %s4346_s27   ;;  %s4346_s27 = sphi %s4398_s27, %s6614_s27   ;;  %s4342_s26 = sphi %s4396_s26, %s6613_s26   ;;  %s4338_s25 = sphi %s4394_s25, %s6612_s25   ;;  %s4334_s24 = sphi %s4392_s24, %s6611_s24  }
   0x4   : > { %s4417_s30 = sadd.s32 1, %s4346_s27   ;;  %s179_s8 = sadd.s32 1, %s4342_s26 }
   0x5   : > { %s176_s9 = ssub.s32 %s4346_s27, %s4417_s30  ;;  %p189_p0 = scmp.ne.s32.totalorder %s4342_s26, %s4338_s25 }
   0x6   : > { %p177_p1 = scmp.eq.s32.totalorder %s176_s9, 0  ;;  %p190_p2 = scmp.eq.s32.totalorder %s4413_s28, 1 }
   0x7   : > { %p195_p3 = scmp.ne.s32.totalorder %s4338_s25, %s4334_s24  ;;  %p196_p4 = scmp.eq.s32.totalorder %s3198_s29, 1 }
   0x8   : > { %s4428_s10 = scalar_select %p177_p1, %s4342_s26, %s179_s8  }
   0x9   : > { %p4430_p5 = por %p190_p2, %p189_p0  ;;  %p4434_p6 = por %p196_p4, %p195_p3 }
   0xa   : > { %p3201_p7 = scmp.ge.s32.totalorder %s4346_s27, 1  ;;  %p241_p8 = scmp.lt.s32.totalorder %s4346_s27, 3 }
   0xc   : > { %p242_p9 = pnand %p3201_p7, %p241_p8 }
   0xe   : > { %245 = sbr.rel (%p242_p9) target bundleno = 908 (0x38c), region = 48 }
  0x13   : > { %v374_v0 = vld [vmem:[%s6467_s1 + $0x270] sm:$0x3]  ;;  %vm429_vm0 = vcmask 1041408   ;;  %v376_v1 = vld [vmem:[%s6467_s1 + $0x280] sm:$0x3]  ;;  %v367_v2 = vld [vmem:[%s6467_s1 + $0x238] sm:$0xff] }
  0x14   : > { %3205 = vmatprep.subr.msk.mxu0 %vm429_vm0, %v374_v0  ;;  %3223 = vmatprep.subr.msk.mxu1 %vm429_vm0, %v376_v1  ;;  %v373_v3 = vld [vmem:[%s6467_s1 + $0x268] sm:$0x3]  ;;  %v375_v4 = vld [vmem:[%s6467_s1 + $0x278] sm:$0x3]  ;;  %v366_v6 = vld [vmem:[%s6467_s1 + $0x230] sm:$0xff]  ;;  %s3203_s21 = sshll.u32 %s4413_s28, 4 }
  0x15   : > { %v369_v5 = vld [vmem:[%s6467_s1 + $0x248] sm:$0xff]  ;;  %3206 = vmatpush1.msk.msra.mxu0 %vm429_vm0, %v373_v3  ;;  %3224 = vmatpush1.msk.msra.mxu1 %vm429_vm0, %v375_v4  ;;  %v368_v7 = vld [vmem:[%s6467_s1 + $0x240] sm:$0xff]  ;;  %v362_v9 = vld [vmem:[%s6467_s1 + $0x210] sm:$0xff]  ;;  %p4519_p10 = scmp.lt.s32.totalorder %s3203_s21, 31  ;;  %vm380_vm1 = vcmask 736256   ;;  %v4348_v49 = vmov 0.0  }
  0x16   : > { %v360_v8 = vld [vmem:[%s6467_s1 + $0x200] sm:$0xff]  ;;  %461 = vmatprep.subr.mxu0 %v367_v2  ;;  %622 = vmatprep.subr.mxu1 %v369_v5  ;;  %v359_v10 = vld [vmem:[%s6467_s1 + $0x1f8] sm:$0xff]  ;;  %v361_v11 = vld [vmem:[%s6467_s1 + $0x208] sm:$0xff]  ;;  %vm2293_vm2 = vcmask 261120   ;;  %s270_s14 = sand.u32 1, %s4338_s25   ;;  %s3454_s22 = sshll.u32 %s4413_s28, 11 }
  0x17   : > { %462 = vmatpush1.msra.mxu0 %v366_v6  ;;  %623 = vmatpush1.msra.mxu1 %v368_v7  ;;  %v353_v12 = vld [vmem:[%s6467_s1 + $0x1c8] sm:$0xff]  ;;  %v355_v13 = vld [vmem:[%s6467_s1 + $0x1d8] sm:$0xff]  ;;  %v352_v14 = vld [vmem:[%s6467_s1 + $0x1c0] sm:$0xff]  ;;  %s6616_s21 = smov (!%p4519_p10, %s3203_s21), 31  ;;  %s3202_s16 = sshll.u32 %s270_s14, 7 }
  0x18   : > { %463 = vmatprep.subr.mxu0 %v360_v8  ;;  %624 = vmatprep.subr.mxu1 %v362_v9  ;;  %v354_v15 = vld [vmem:[%s6467_s1 + $0x1d0] sm:$0xff]  ;;  %v348_v17 = vld [vmem:[%s6467_s1 + $0x1a0] sm:$0xff]  ;;  %v345_v18 = vld [vmem:[%s6467_s1 + $0x188] sm:$0xff]  ;;  %s3204_s15 = sshll.u32 %s6616_s21, 3  ;;  %s6397_s19 = scalar_lea.vmem [#allocation2], %s3202_s16 }
  0x19   : > { %464 = vmatpush1.msra.mxu0 %v359_v10  ;;  %625 = vmatpush1.msra.mxu1 %v361_v11  ;;  %v346_v16 = vld [vmem:[%s6467_s1 + $0x190] sm:$0xff]  ;;  %v347_v19 = vld [vmem:[%s6467_s1 + $0x198] sm:$0xff]  ;;  %v341_v21 = vld [vmem:[%s6467_s1 + $0x168] sm:$0xff]  ;;  %s4599_s17 = scalar_lea.vmem %s6466_s0, %s3204_s15  ;;  %s3136_s15 = sshll.u32 %s6397_s19, 4  ;;  %s6420_s15 = int_to_ptr.vmem [resolvable:$true] %s3136_s15 }
  0x1a   : > { %465 = vmatprep.subr.mxu0 %v353_v12  ;;  %626 = vmatprep.subr.mxu1 %v355_v13  ;;  %v339_v20 = vld [vmem:[%s6467_s1 + $0x158] sm:$0xff]  ;;  %v338_v22 = vld [vmem:[%s6467_s1 + $0x150] sm:$0xff]  ;;  %v340_v23 = vld [vmem:[%s6467_s1 + $0x160] sm:$0xff]  ;;  %s6418_s29 = scalar_lea.hbm %s6473_s7, %s3454_s22  ;;  %s6426_s21 = scalar_lea.sflag [#allocation3], %s270_s14 }
  0x1b   : > { %466 = vmatpush1.msra.mxu0 %v352_v14  ;;  %627 = vmatpush1.msra.mxu1 %v354_v15  ;;  %v332_v24 = vld [vmem:[%s6467_s1 + $0x120] sm:$0xff]  ;;  %v334_v25 = vld [vmem:[%s6467_s1 + $0x130] sm:$0xff]  ;;  %v331_v26 = vld [vmem:[%s6467_s1 + $0x118] sm:$0xff]  ;;  %s4286_s28 = scalar_lea.vmem %s6420_s15, 2048  ;;  %s4349_s8 = smov [#allocation2]  }
  0x1c   : > { %467 = vmatprep.subr.mxu0 %v346_v16  ;;  %628 = vmatprep.subr.mxu1 %v348_v17  ;;  %v333_v27 = vld [vmem:[%s6467_s1 + $0x128] sm:$0xff]  ;;  %v327_v29 = vld [vmem:[%s6467_s1 + $0xf8] sm:$0xff]  ;;  %v324_v30 = vld [vmem:[%s6467_s1 + $0xe0] sm:$0xff]  ;;  %p4287_p11 = scmp.ne.s32.totalorder %s6420_s15, %s4286_s28  ;;  %s4290_s9 = sshll.u32 %s4349_s8, 4  ;;  %s4291_s9 = int_to_ptr.vmem [resolvable:$false] %s4290_s9 }
  0x1d   : > { %468 = vmatpush1.msra.mxu0 %v345_v18  ;;  %629 = vmatpush1.msra.mxu1 %v347_v19  ;;  %v325_v28 = vld [vmem:[%s6467_s1 + $0xe8] sm:$0xff]  ;;  %v326_v31 = vld [vmem:[%s6467_s1 + $0xf0] sm:$0xff]  ;;  %v320_v33 = vld [vmem:[%s6467_s1 + $0xc0] sm:$0xff]  ;;  %s4292_s13 = scalar_lea.vmem %s4291_s9, 4096  ;;  %p4293_p0 = scmp.lt.s32.totalorder %s6420_s15, %s4291_s9 }
  0x1e   : > { %469 = vmatprep.subr.mxu0 %v339_v20  ;;  %630 = vmatprep.subr.mxu1 %v341_v21  ;;  %v318_v32 = vld [vmem:[%s6467_s1 + $0xb0] sm:$0xff]  ;;  %v317_v34 = vld [vmem:[%s6467_s1 + $0xa8] sm:$0xff]  ;;  %v319_v35 = vld [vmem:[%s6467_s1 + $0xb8] sm:$0xff]  ;;  %p4288_p12 = pnand %p4287_p11, %p4430_p5  ;;  %p4294_p1 = scmp.lt.s32.totalorder %s4292_s13, %s4286_s28 }
  0x1f   : > { %470 = vmatpush1.msra.mxu0 %v338_v22  ;;  %631 = vmatpush1.msra.mxu1 %v340_v23  ;;  %v311_v36 = vld [vmem:[%s6467_s1 + $0x78] sm:$0xff]  ;;  %v313_v37 = vld [vmem:[%s6467_s1 + $0x88] sm:$0xff]  ;;  %v310_v38 = vld [vmem:[%s6467_s1 + $0x70] sm:$0xff] }
  0x20   : > { %471 = vmatprep.subr.mxu0 %v332_v24  ;;  %632 = vmatprep.subr.mxu1 %v334_v25  ;;  %v312_v39 = vld [vmem:[%s6467_s1 + $0x80] sm:$0xff]  ;;  %v306_v41 = vld [vmem:[%s6467_s1 + $0x50] sm:$0xff]  ;;  %v303_v42 = vld [vmem:[%s6467_s1 + $0x38] sm:$0xff]  ;;  %p4289_p13 = pneg %p4288_p12  ;;  %p4295_p2 = por %p4294_p1, %p4293_p0 }
  0x21   : > { %472 = vmatpush1.msra.mxu0 %v331_v26  ;;  %633 = vmatpush1.msra.mxu1 %v333_v27  ;;  %v304_v40 = vld [vmem:[%s6467_s1 + $0x40] sm:$0xff]  ;;  %v305_v43 = vld [vmem:[%s6467_s1 + $0x48] sm:$0xff]  ;;  %v299_v45 = vld [vmem:[%s6467_s1 + $0x18] sm:$0xff] }
  0x22   : > { %473 = vmatprep.subr.mxu0 %v325_v28  ;;  %634 = vmatprep.subr.mxu1 %v327_v29  ;;  %v297_v44 = vld [vmem:[%s6467_s1 + $0x8] sm:$0xff]  ;;  %v296_v46 = vld [vmem:[%s6467_s1] sm:$0xff]  ;;  %v298_v47 = vld [vmem:[%s6467_s1 + $0x10] sm:$0xff]  ;;  %p4296_p3 = pnand %p4295_p2, %p4289_p13 }
  0x23   : > { %474 = vmatpush1.msra.mxu0 %v324_v30  ;;  %635 = vmatpush1.msra.mxu1 %v326_v31  ;;  %v4608_v48 = vld [vmem:[%s4599_s17] sm:$0xff]  ;;  %v379_v50 = vld [vmem:[%s6467_s1 + $0x298] sm:$0x3]  ;;  %v378_v51 = vld [vmem:[%s6467_s1 + $0x290] sm:$0x3] }
  0x24   : > { %475 = vmatprep.subr.mxu0 %v318_v32  ;;  %636 = vmatprep.subr.mxu1 %v320_v33  ;;  %v372_v52 = vld [vmem:[%s6467_s1 + $0x260] sm:$0xff]  ;;  %v4628_v53 = vld [vmem:[%s4599_s17 + $0x8] sm:$0xff]  ;;  %v371_v55 = vld [vmem:[%s6467_s1 + $0x258] sm:$0xff] }
  0x25   : > { %476 = vmatpush1.msra.mxu0 %v317_v34  ;;  %637 = vmatpush1.msra.mxu1 %v319_v35  ;;  %v377_v54 = vld [vmem:[%s6467_s1 + $0x288] sm:$0x3]  ;;  %v4649_v57 = vld [vmem:[%s4599_s17 + $0x10] sm:$0xff]  ;;  %v364_v59 = vld [vmem:[%s6467_s1 + $0x220] sm:$0xff] }
  0x26   : > { %477 = vmatprep.subr.mxu0 %v311_v36  ;;  %638 = vmatprep.subr.mxu1 %v313_v37  ;;  %v365_v56 = vld [vmem:[%s6467_s1 + $0x228] sm:$0xff]  ;;  %v370_v58 = vld [vmem:[%s6467_s1 + $0x250] sm:$0xff]  ;;  %v4667_v61 = vld [vmem:[%s4599_s17 + $0x18] sm:$0xff] }
  0x27   : > { %478 = vmatpush1.msra.mxu0 %v310_v38  ;;  %639 = vmatpush1.msra.mxu1 %v312_v39  ;;  %v358_v60 = vld [vmem:[%s6467_s1 + $0x1f0] sm:$0xff]  ;;  %v363_v62 = vld [vmem:[%s6467_s1 + $0x218] sm:$0xff]  ;;  %v357_v63 = vld [vmem:[%s6467_s1 + $0x1e8] sm:$0xff] }
  0x28   : > { %479 = vmatprep.subr.mxu0 %v304_v40  ;;  %640 = vmatprep.subr.mxu1 %v306_v41  ;;  %v351_v0 = vld [vmem:[%s6467_s1 + $0x1b8] sm:$0xff]  ;;  %v4686_v1 = vld [vmem:[%s4599_s17 + $0x20] sm:$0xff]  ;;  %v350_v3 = vld [vmem:[%s6467_s1 + $0x1b0] sm:$0xff] }
  0x29   : > { %480 = vmatpush1.msra.mxu0 %v303_v42  ;;  %641 = vmatpush1.msra.mxu1 %v305_v43  ;;  %v356_v2 = vld [vmem:[%s6467_s1 + $0x1e0] sm:$0xff]  ;;  %v4704_v5 = vld [vmem:[%s4599_s17 + $0x28] sm:$0xff]  ;;  %v343_v7 = vld [vmem:[%s6467_s1 + $0x178] sm:$0xff] }
  0x2a   : > { %481 = vmatprep.subr.mxu0 %v297_v44  ;;  %642 = vmatprep.subr.mxu1 %v299_v45  ;;  %v344_v4 = vld [vmem:[%s6467_s1 + $0x180] sm:$0xff]  ;;  %v349_v6 = vld [vmem:[%s6467_s1 + $0x1a8] sm:$0xff]  ;;  %v4722_v9 = vld [vmem:[%s4599_s17 + $0x30] sm:$0xff] }
  0x2b   : > { %482 = vmatpush1.msra.mxu0 %v296_v46  ;;  %515 = vmatprep.mubr.f32.mxu0 %v4348_v49  ;;  %v337_v8 = vld [vmem:[%s6467_s1 + $0x148] sm:$0xff]  ;;  %v342_v10 = vld [vmem:[%s6467_s1 + $0x170] sm:$0xff]  ;;  %v336_v11 = vld [vmem:[%s6467_s1 + $0x140] sm:$0xff] }
  0x2c   : > { %643 = vmatpush1.msra.mxu1 %v298_v47  ;;  %676 = vmatprep.mubr.f32.mxu1 %v4348_v49  ;;  %v330_v12 = vld [vmem:[%s6467_s1 + $0x110] sm:$0xff]  ;;  %v4740_v13 = vld [vmem:[%s4599_s17 + $0x38] sm:$0xff]  ;;  %v329_v15 = vld [vmem:[%s6467_s1 + $0x108] sm:$0xff] }
  0x2d   : > { %3207 = vmatmul.mubr.msk.f32.vlgmr.msra.gmra.mxu0 %vm380_vm1, %v4608_v48  ;;  %3225 = vmatmul.mubr.msk.f32.vlgmr.msra.gmra.mxu1 %vm380_vm1, %v4608_v48  ;;  %v335_v14 = vld [vmem:[%s6467_s1 + $0x138] sm:$0xff]  ;;  %v4758_v17 = vld [vmem:[%s4599_s17 + $0x40] sm:$0xff]  ;;  %v322_v19 = vld [vmem:[%s6467_s1 + $0xd0] sm:$0xff] }
  0x2e   : > { %3803 = vmatprep.subr.msk.mxu1 %vm429_vm0, %v379_v50  ;;  %521 = vmatprep.mubr.f32.mxu0 %v4348_v49  ;;  %v323_v16 = vld [vmem:[%s6467_s1 + $0xd8] sm:$0xff]  ;;  %v328_v18 = vld [vmem:[%s6467_s1 + $0x100] sm:$0xff]  ;;  %v4776_v21 = vld [vmem:[%s4599_s17 + $0x48] sm:$0xff] }
  0x2f   : > { %3804 = vmatpush3.msk.msra.mxu1 %vm429_vm0, %v379_v50  ;;  %682 = vmatprep.mubr.f32.mxu1 %v4348_v49  ;;  %v316_v20 = vld [vmem:[%s6467_s1 + $0xa0] sm:$0xff]  ;;  %v321_v22 = vld [vmem:[%s6467_s1 + $0xc8] sm:$0xff]  ;;  %v315_v23 = vld [vmem:[%s6467_s1 + $0x98] sm:$0xff] }
  0x30   : > { %3241 = vmatprep.subr.msk.mxu0 %vm429_vm0, %v378_v51  ;;  %3805 = vmatprep.subr.mxu1 %v372_v52  ;;  %v309_v24 = vld [vmem:[%s6467_s1 + $0x68] sm:$0xff]  ;;  %v4794_v25 = vld [vmem:[%s4599_s17 + $0x50] sm:$0xff]  ;;  %v308_v27 = vld [vmem:[%s6467_s1 + $0x60] sm:$0xff] }
  0x31   : > { %3208 = vmatmul.mubr.msk.f32.gmra.mxu0 %vm380_vm1, %v4628_v53  ;;  %3226 = vmatmul.mubr.msk.f32.gmra.mxu1 %vm380_vm1, %v4628_v53  ;;  %v314_v26 = vld [vmem:[%s6467_s1 + $0x90] sm:$0xff]  ;;  %v4812_v29 = vld [vmem:[%s4599_s17 + $0x58] sm:$0xff]  ;;  %v301_v31 = vld [vmem:[%s6467_s1 + $0x28] sm:$0xff] }
  0x32   : > { %3242 = vmatpush1.msk.msra.mxu0 %vm429_vm0, %v377_v54  ;;  %527 = vmatprep.mubr.f32.mxu0 %v4348_v49  ;;  %v302_v28 = vld [vmem:[%s6467_s1 + $0x30] sm:$0xff]  ;;  %v307_v30 = vld [vmem:[%s6467_s1 + $0x58] sm:$0xff]  ;;  %v4830_v33 = vld [vmem:[%s4599_s17 + $0x60] sm:$0xff] }
  0x33   : > { %688 = vmatprep.mubr.f32.mxu1 %v4348_v49  ;;  %3806 = vmatpush3.msra.mxu1 %v372_v52  ;;  %v3354_v32 = vld [vmem:[%s6467_s1 + $0x510] sm:$0x3]  ;;  %v300_v34 = vld [vmem:[%s6467_s1 + $0x20] sm:$0xff]  ;;  %v4846_v36 = vld [vmem:[%s4599_s17 + $0x68] sm:$0xff] }
  0x34   : > { %783 = vmatprep.subr.mxu0 %v371_v55  ;;  %3807 = vmatprep.subr.mxu1 %v365_v56  ;;  %v3356_v35 = vld [vmem:[%s6467_s1 + $0x520] sm:$0x3]  ;;  %v4856_v37 = vld [vmem:[%s4599_s17 + $0x70] sm:$0xff]  ;;  %v4865_v38 = vld [vmem:[%s4599_s17 + $0x78] sm:$0xff] }
  0x35   : > { %3209 = vmatmul.mubr.msk.f32.gmra.mxu0 %vm380_vm1, %v4649_v57  ;;  %3227 = vmatmul.mubr.msk.f32.gmra.mxu1 %vm380_vm1, %v4649_v57  ;;  %v3353_v39 = vld [vmem:[%s6467_s1 + $0x508] sm:$0x3]  ;;  %v3347_v40 = vld [vmem:[%s6467_s1 + $0x4d8] sm:$0xff]  ;;  %v3346_v41 = vld [vmem:[%s6467_s1 + $0x4d0] sm:$0xff] }
  0x36   : > { %784 = vmatpush1.msra.mxu0 %v370_v58  ;;  %533 = vmatprep.mubr.f32.mxu0 %v4348_v49  ;;  %v3355_v42 = vld [vmem:[%s6467_s1 + $0x518] sm:$0x3]  ;;  %v3340_v43 = vld [vmem:[%s6467_s1 + $0x4a0] sm:$0xff]  ;;  %v3333_v45 = vld [vmem:[%s6467_s1 + $0x468] sm:$0xff] }
  0x37   : > { %694 = vmatprep.mubr.f32.mxu1 %v4348_v49  ;;  %3808 = vmatpush3.msra.mxu1 %v365_v56  ;;  %v3339_v44 = vld [vmem:[%s6467_s1 + $0x498] sm:$0xff]  ;;  %v3349_v46 = vld [vmem:[%s6467_s1 + $0x4e8] sm:$0xff]  ;;  %v3332_v47 = vld [vmem:[%s6467_s1 + $0x460] sm:$0xff] }
  0x38   : > { %785 = vmatprep.subr.mxu0 %v364_v59  ;;  %3809 = vmatprep.subr.mxu1 %v358_v60  ;;  %v3348_v50 = vld [vmem:[%s6467_s1 + $0x4e0] sm:$0xff]  ;;  %v3326_v51 = vld [vmem:[%s6467_s1 + $0x430] sm:$0xff]  ;;  %v3325_v54 = vld [vmem:[%s6467_s1 + $0x428] sm:$0xff] }
  0x39   : > { %3210 = vmatmul.mubr.msk.f32.gmra.mxu0 %vm380_vm1, %v4667_v61  ;;  %3228 = vmatmul.mubr.msk.f32.gmra.mxu1 %vm380_vm1, %v4667_v61  ;;  %v3342_v52 = vld [vmem:[%s6467_s1 + $0x4b0] sm:$0xff]  ;;  %v3319_v55 = vld [vmem:[%s6467_s1 + $0x3f8] sm:$0xff]  ;;  %v3341_v58 = vld [vmem:[%s6467_s1 + $0x4a8] sm:$0xff] }
  0x3a   : > { %539 = vmatprep.mubr.f32.mxu0 %v4348_v49  ;;  %700 = vmatprep.mubr.f32.mxu1 %v4348_v49  ;;  %v3318_v56 = vld [vmem:[%s6467_s1 + $0x3f0] sm:$0xff]  ;;  %v3312_v59 = vld [vmem:[%s6467_s1 + $0x3c0] sm:$0xff] }
  0x3b   : > { %786 = vmatpush1.msra.mxu0 %v363_v62  ;;  %3810 = vmatpush3.msra.mxu1 %v358_v60  ;;  %v3311_v60 = vld [vmem:[%s6467_s1 + $0x3b8] sm:$0xff]  ;;  %v3305_v62 = vld [vmem:[%s6467_s1 + $0x388] sm:$0xff] }
  0x3c   : > { %787 = vmatprep.subr.mxu0 %v357_v63  ;;  %3811 = vmatprep.subr.mxu1 %v351_v0  ;;  %v3335_v63 = vld [vmem:[%s6467_s1 + $0x478] sm:$0xff] }
  0x3d   : > { %3211 = vmatmul.mubr.msk.f32.gmra.mxu0 %vm380_vm1, %v4686_v1  ;;  %3229 = vmatmul.mubr.msk.f32.gmra.mxu1 %vm380_vm1, %v4686_v1 }
  0x3e   : > { %545 = vmatprep.mubr.f32.mxu0 %v4348_v49  ;;  %706 = vmatprep.mubr.f32.mxu1 %v4348_v49 }
  0x3f   : > { %788 = vmatpush1.msra.mxu0 %v356_v2  ;;  %3812 = vmatpush3.msra.mxu1 %v351_v0  ;;  %v3304_v0 = vld [vmem:[%s6467_s1 + $0x380] sm:$0xff]  ;;  %v3334_v2 = vld [vmem:[%s6467_s1 + $0x470] sm:$0xff] }
  0x40   : > { %789 = vmatprep.subr.mxu0 %v350_v3  ;;  %3813 = vmatprep.subr.mxu1 %v344_v4  ;;  %v3298_v3 = vld [vmem:[%s6467_s1 + $0x350] sm:$0xff] }
  0x41   : > { %3212 = vmatmul.mubr.msk.f32.gmra.mxu0 %vm380_vm1, %v4704_v5  ;;  %3230 = vmatmul.mubr.msk.f32.gmra.mxu1 %vm380_vm1, %v4704_v5 }
  0x42   : > { %551 = vmatprep.mubr.f32.mxu0 %v4348_v49  ;;  %712 = vmatprep.mubr.f32.mxu1 %v4348_v49 }
  0x43   : > { %790 = vmatpush1.msra.mxu0 %v349_v6  ;;  %3814 = vmatpush3.msra.mxu1 %v344_v4  ;;  %v3297_v4 = vld [vmem:[%s6467_s1 + $0x348] sm:$0xff]  ;;  %v3291_v6 = vld [vmem:[%s6467_s1 + $0x318] sm:$0xff] }
  0x44   : > { %791 = vmatprep.subr.mxu0 %v343_v7  ;;  %3815 = vmatprep.subr.mxu1 %v337_v8  ;;  %v3328_v7 = vld [vmem:[%s6467_s1 + $0x440] sm:$0xff] }
  0x45   : > { %3213 = vmatmul.mubr.msk.f32.gmra.mxu0 %vm380_vm1, %v4722_v9  ;;  %3231 = vmatmul.mubr.msk.f32.gmra.mxu1 %vm380_vm1, %v4722_v9 }
  0x46   : > { %557 = vmatprep.mubr.f32.mxu0 %v4348_v49  ;;  %718 = vmatprep.mubr.f32.mxu1 %v4348_v49 }
  0x47   : > { %792 = vmatpush1.msra.mxu0 %v342_v10  ;;  %3816 = vmatpush3.msra.mxu1 %v337_v8  ;;  %v3290_v8 = vld [vmem:[%s6467_s1 + $0x310] sm:$0xff]  ;;  %v3327_v10 = vld [vmem:[%s6467_s1 + $0x438] sm:$0xff] }
  0x48   : > { %793 = vmatprep.subr.mxu0 %v336_v11  ;;  %3817 = vmatprep.subr.mxu1 %v330_v12  ;;  %v3284_v11 = vld [vmem:[%s6467_s1 + $0x2e0] sm:$0xff] }
  0x49   : > { %3214 = vmatmul.mubr.msk.f32.gmra.mxu0 %vm380_vm1, %v4740_v13  ;;  %3232 = vmatmul.mubr.msk.f32.gmra.mxu1 %vm380_vm1, %v4740_v13 }
  0x4a   : > { %563 = vmatprep.mubr.f32.mxu0 %v4348_v49  ;;  %724 = vmatprep.mubr.f32.mxu1 %v4348_v49 }
  0x4b   : > { %794 = vmatpush1.msra.mxu0 %v335_v14  ;;  %3818 = vmatpush3.msra.mxu1 %v330_v12  ;;  %v3321_v12 = vld [vmem:[%s6467_s1 + $0x408] sm:$0xff]  ;;  %v3283_v14 = vld [vmem:[%s6467_s1 + $0x2d8] sm:$0xff] }
  0x4c   : > { %795 = vmatprep.subr.mxu0 %v329_v15  ;;  %3819 = vmatprep.subr.mxu1 %v323_v16  ;;  %v3277_v15 = vld [vmem:[%s6467_s1 + $0x2a8] sm:$0xff] }
  0x4d   : > { %3215 = vmatmul.mubr.msk.f32.gmra.mxu0 %vm380_vm1, %v4758_v17  ;;  %3233 = vmatmul.mubr.msk.f32.gmra.mxu1 %vm380_vm1, %v4758_v17 }
  0x4e   : > { %569 = vmatprep.mubr.f32.mxu0 %v4348_v49  ;;  %730 = vmatprep.mubr.f32.mxu1 %v4348_v49 }
  0x4f   : > { %796 = vmatpush1.msra.mxu0 %v328_v18  ;;  %3820 = vmatpush3.msra.mxu1 %v323_v16  ;;  %v3276_v16 = vld [vmem:[%s6467_s1 + $0x2a0] sm:$0xff] }
  0x50   : > { %797 = vmatprep.subr.mxu0 %v322_v19  ;;  %3821 = vmatprep.subr.mxu1 %v316_v20  ;;  %v3320_v18 = vld [vmem:[%s6467_s1 + $0x400] sm:$0xff]  ;;  %v3358_v19 = vld [vmem:[%s6467_s1 + $0x530] sm:$0x3] }
  0x51   : > { %3216 = vmatmul.mubr.msk.f32.gmra.mxu0 %vm380_vm1, %v4776_v21  ;;  %3234 = vmatmul.mubr.msk.f32.gmra.mxu1 %vm380_vm1, %v4776_v21 }
  0x52   : > { %575 = vmatprep.mubr.f32.mxu0 %v4348_v49  ;;  %736 = vmatprep.mubr.f32.mxu1 %v4348_v49 }
  0x53   : > { %798 = vmatpush1.msra.mxu0 %v321_v22  ;;  %3822 = vmatpush3.msra.mxu1 %v316_v20  ;;  %v3357_v20 = vld [vmem:[%s6467_s1 + $0x528] sm:$0x3]  ;;  %v3314_v22 = vld [vmem:[%s6467_s1 + $0x3d0] sm:$0xff] }
  0x54   : > { %799 = vmatprep.subr.mxu0 %v315_v23  ;;  %3823 = vmatprep.subr.mxu1 %v309_v24  ;;  %v3351_v23 = vld [vmem:[%s6467_s1 + $0x4f8] sm:$0xff] }
  0x55   : > { %3217 = vmatmul.mubr.msk.f32.gmra.mxu0 %vm380_vm1, %v4794_v25  ;;  %3235 = vmatmul.mubr.msk.f32.gmra.mxu1 %vm380_vm1, %v4794_v25 }
  0x56   : > { %581 = vmatprep.mubr.f32.mxu0 %v4348_v49  ;;  %742 = vmatprep.mubr.f32.mxu1 %v4348_v49 }
  0x57   : > { %800 = vmatpush1.msra.mxu0 %v314_v26  ;;  %3824 = vmatpush3.msra.mxu1 %v309_v24  ;;  %v3313_v24 = vld [vmem:[%s6467_s1 + $0x3c8] sm:$0xff]  ;;  %v3350_v26 = vld [vmem:[%s6467_s1 + $0x4f0] sm:$0xff] }
  0x58   : > { %801 = vmatprep.subr.mxu0 %v308_v27  ;;  %3825 = vmatprep.subr.mxu1 %v302_v28  ;;  %v3307_v27 = vld [vmem:[%s6467_s1 + $0x398] sm:$0xff] }
  0x59   : > { %3218 = vmatmul.mubr.msk.f32.gmra.mxu0 %vm380_vm1, %v4812_v29  ;;  %3236 = vmatmul.mubr.msk.f32.gmra.mxu1 %vm380_vm1, %v4812_v29 }
  0x5a   : > { %587 = vmatprep.mubr.f32.mxu0 %v4348_v49  ;;  %748 = vmatprep.mubr.f32.mxu1 %v4348_v49 }
  0x5b   : > { %802 = vmatpush1.msra.mxu0 %v307_v30  ;;  %3826 = vmatpush3.msra.mxu1 %v302_v28  ;;  %v3344_v28 = vld [vmem:[%s6467_s1 + $0x4c0] sm:$0xff]  ;;  %v3306_v30 = vld [vmem:[%s6467_s1 + $0x390] sm:$0xff] }
  0x5c   : > { %803 = vmatprep.subr.mxu0 %v301_v31  ;;  %3360 = vmatprep.subr.msk.mxu1 %vm429_vm0, %v3354_v32  ;;  %v3343_v31 = vld [vmem:[%s6467_s1 + $0x4b8] sm:$0xff]  ;;  %v3300_v32 = vld [vmem:[%s6467_s1 + $0x360] sm:$0xff] }
  0x5d   : > { %3219 = vmatmul.mubr.msk.f32.gmra.mxu0 %vm380_vm1, %v4830_v33  ;;  %3237 = vmatmul.mubr.msk.f32.gmra.mxu1 %vm380_vm1, %v4830_v33 }
  0x5e   : > { %593 = vmatprep.mubr.f32.mxu0 %v4348_v49  ;;  %754 = vmatprep.mubr.f32.mxu1 %v4348_v49 }
  0x5f   : > { %804 = vmatpush1.msra.mxu0 %v300_v34  ;;  %v3337_v34 = vld [vmem:[%s6467_s1 + $0x488] sm:$0xff] }
  0x60   : > { %3378 = vmatprep.subr.msk.mxu0 %vm429_vm0, %v3356_v35  ;;  %v3299_v35 = vld [vmem:[%s6467_s1 + $0x358] sm:$0xff] }
  0x61   : > { %3220 = vmatmul.mubr.msk.f32.gmra.mxu0 %vm380_vm1, %v4846_v36  ;;  %3238 = vmatmul.mubr.msk.f32.gmra.mxu1 %vm380_vm1, %v4846_v36 }
  0x62   : > { %599 = vmatprep.mubr.f32.mxu0 %v4348_v49  ;;  %760 = vmatprep.mubr.f32.mxu1 %v4348_v49 }
  0x65   : > { %3221 = vmatmul.mubr.msk.f32.gmra.mxu0 %vm380_vm1, %v4856_v37  ;;  %3239 = vmatmul.mubr.msk.f32.gmra.mxu1 %vm380_vm1, %v4856_v37 }
  0x66   : > { %605 = vmatprep.mubr.f32.mxu0 %v4348_v49  ;;  %766 = vmatprep.mubr.f32.mxu1 %v4348_v49 }
  0x69   : > { %3222 = vmatmul.mubr.msk.f32.gmra.mxu0 %vm380_vm1, %v4865_v38  ;;  %3240 = vmatmul.mubr.msk.f32.gmra.mxu1 %vm380_vm1, %v4865_v38 }
  0x6a   : > { %837 = vmatprep.mubr.f32.mxu0 %v4348_v49  ;;  %3827 = vmatprep.mubr.msk.f32.mxu1 %vm380_vm1, %v4608_v48 }
  0x6d   : > { %3243 = vmatmul.mubr.msk.f32.vlgmr.msra.gmra.mxu0 %vm380_vm1, %v4608_v48  ;;  %3828 = vmatmul.mubr.msk.f32.vlgmr.msra.gmra.mxu1 %vm380_vm1, %v4628_v53 }
  0x6e   : > { %3361 = vmatpush1.msk.msra.mxu1 %vm429_vm0, %v3353_v39  ;;  %843 = vmatprep.mubr.f32.mxu0 %v4348_v49  ;;  %v3336_v39 = vld [vmem:[%s6467_s1 + $0x480] sm:$0xff] }
  0x6f   : > { %3830 = vmatprep.mubr.msk.f32.mxu1 %vm380_vm1, %v4649_v57  ;;  %1195 = vmatprep.subr.mxu1 %v3347_v40  ;;  %v3293_v40 = vld [vmem:[%s6467_s1 + $0x328] sm:$0xff] }
  0x70   : > { %1196 = vmatpush1.msra.mxu1 %v3346_v41  ;;  %3379 = vmatpush1.msk.msra.mxu0 %vm429_vm0, %v3355_v42  ;;  %v3330_v41 = vld [vmem:[%s6467_s1 + $0x450] sm:$0xff]  ;;  %v3292_v42 = vld [vmem:[%s6467_s1 + $0x320] sm:$0xff] }
  0x71   : > { %3244 = vmatmul.mubr.msk.f32.gmra.mxu0 %vm380_vm1, %v4628_v53  ;;  %3831 = vmatmul.mubr.msk.f32.gmra.mxu1 %vm380_vm1, %v4667_v61 }
  0x72   : > { %1197 = vmatprep.subr.mxu1 %v3340_v43  ;;  %849 = vmatprep.mubr.f32.mxu0 %v4348_v49  ;;  %v3329_v43 = vld [vmem:[%s6467_s1 + $0x448] sm:$0xff] }
  0x73   : > { %3833 = vmatprep.mubr.msk.f32.mxu1 %vm380_vm1, %v4686_v1  ;;  %1198 = vmatpush1.msra.mxu1 %v3339_v44  ;;  %v3286_v44 = vld [vmem:[%s6467_s1 + $0x2f0] sm:$0xff] }
  0x74   : > { %1199 = vmatprep.subr.mxu1 %v3333_v45  ;;  %1356 = vmatprep.subr.mxu0 %v3349_v46  ;;  %v3323_v45 = vld [vmem:[%s6467_s1 + $0x418] sm:$0xff]  ;;  %v3285_v46 = vld [vmem:[%s6467_s1 + $0x2e8] sm:$0xff] }
  0x75   : > { %3245 = vmatmul.mubr.msk.f32.gmra.mxu0 %vm380_vm1, %v4649_v57  ;;  %3834 = vmatmul.mubr.msk.f32.gmra.mxu1 %vm380_vm1, %v4704_v5 }
  0x76   : > { %1200 = vmatpush1.msra.mxu1 %v3332_v47  ;;  %1357 = vmatpush1.msra.mxu0 %v3348_v50  ;;  %v3322_v47 = vld [vmem:[%s6467_s1 + $0x410] sm:$0xff]  ;;  %v3279_v50 = vld [vmem:[%s6467_s1 + $0x2b8] sm:$0xff] }
  0x77   : > { %855 = vmatprep.mubr.f32.mxu0 %v4348_v49  ;;  %3836 = vmatprep.mubr.msk.f32.mxu1 %vm380_vm1, %v4722_v9 }
  0x78   : > { %1201 = vmatprep.subr.mxu1 %v3326_v51  ;;  %1358 = vmatprep.subr.mxu0 %v3342_v52  ;;  %v3316_v51 = vld [vmem:[%s6467_s1 + $0x3e0] sm:$0xff]  ;;  %v3278_v52 = vld [vmem:[%s6467_s1 + $0x2b0] sm:$0xff] }
  0x79   : > { %3246 = vmatmul.mubr.msk.f32.gmra.mxu0 %vm380_vm1, %v4667_v61  ;;  %3837 = vmatmul.mubr.msk.f32.gmra.mxu1 %vm380_vm1, %v4740_v13 }
  0x7a   : > { %1202 = vmatpush1.msra.mxu1 %v3325_v54  ;;  %861 = vmatprep.mubr.f32.mxu0 %v4348_v49  ;;  %v3315_v54 = vld [vmem:[%s6467_s1 + $0x3d8] sm:$0xff] }
  0x7b   : > { %1203 = vmatprep.subr.mxu1 %v3319_v55  ;;  %3839 = vmatprep.mubr.msk.f32.mxu1 %vm380_vm1, %v4758_v17  ;;  %v3359_v55 = vld [vmem:[%s6467_s1 + $0x538] sm:$0x3] }
  0x7c   : > { %1204 = vmatpush1.msra.mxu1 %v3318_v56  ;;  %1359 = vmatpush1.msra.mxu0 %v3341_v58  ;;  %v3309_v56 = vld [vmem:[%s6467_s1 + $0x3a8] sm:$0xff]  ;;  %v3308_v58 = vld [vmem:[%s6467_s1 + $0x3a0] sm:$0xff] }
  0x7d   : > { %3247 = vmatmul.mubr.msk.f32.gmra.mxu0 %vm380_vm1, %v4686_v1  ;;  %3840 = vmatmul.mubr.msk.f32.gmra.mxu1 %vm380_vm1, %v4776_v21 }
  0x7e   : > { %1205 = vmatprep.subr.mxu1 %v3312_v59  ;;  %867 = vmatprep.mubr.f32.mxu0 %v4348_v49  ;;  %v3302_v59 = vld [vmem:[%s6467_s1 + $0x370] sm:$0xff] }
  0x7f   : > { %1206 = vmatpush1.msra.mxu1 %v3311_v60  ;;  %3842 = vmatprep.mubr.msk.f32.mxu1 %vm380_vm1, %v4794_v25  ;;  %v3301_v60 = vld [vmem:[%s6467_s1 + $0x368] sm:$0xff] }
  0x80   : > { %1207 = vmatprep.subr.mxu1 %v3305_v62  ;;  %1360 = vmatprep.subr.mxu0 %v3335_v63  ;;  %v3352_v62 = vld [vmem:[%s6467_s1 + $0x500] sm:$0xff]  ;;  %v3295_v63 = vld [vmem:[%s6467_s1 + $0x338] sm:$0xff] }
  0x81   : > { %3248 = vmatmul.mubr.msk.f32.gmra.mxu0 %vm380_vm1, %v4704_v5  ;;  %3843 = vmatmul.mubr.msk.f32.gmra.mxu1 %vm380_vm1, %v4812_v29 }
  0x82   : > { %1208 = vmatpush1.msra.mxu1 %v3304_v0  ;;  %1361 = vmatpush1.msra.mxu0 %v3334_v2  ;;  %v3294_v0 = vld [vmem:[%s6467_s1 + $0x330] sm:$0xff]  ;;  %v3345_v2 = vld [vmem:[%s6467_s1 + $0x4c8] sm:$0xff] }
  0x83   : > { %1209 = vmatprep.subr.mxu1 %v3298_v3  ;;  %873 = vmatprep.mubr.f32.mxu0 %v4348_v49  ;;  %v3288_v3 = vld [vmem:[%s6467_s1 + $0x300] sm:$0xff] }
  0x84   : > { %3845 = vmatprep.mubr.msk.f32.mxu1 %vm380_vm1, %v4830_v33  ;;  %1210 = vmatpush1.msra.mxu1 %v3297_v4  ;;  %v3287_v4 = vld [vmem:[%s6467_s1 + $0x2f8] sm:$0xff] }
  0x85   : > { %3249 = vmatmul.mubr.msk.f32.gmra.mxu0 %vm380_vm1, %v4722_v9  ;;  %3846 = vmatmul.mubr.msk.f32.gmra.mxu1 %vm380_vm1, %v4846_v36 }
  0x86   : > { %1211 = vmatprep.subr.mxu1 %v3291_v6  ;;  %1362 = vmatprep.subr.mxu0 %v3328_v7  ;;  %v3338_v6 = vld [vmem:[%s6467_s1 + $0x490] sm:$0xff]  ;;  %v3281_v7 = vld [vmem:[%s6467_s1 + $0x2c8] sm:$0xff] }
  0x87   : > { %1212 = vmatpush1.msra.mxu1 %v3290_v8  ;;  %1363 = vmatpush1.msra.mxu0 %v3327_v10  ;;  %v3280_v8 = vld [vmem:[%s6467_s1 + $0x2c0] sm:$0xff]  ;;  %v3331_v10 = vld [vmem:[%s6467_s1 + $0x458] sm:$0xff] }
  0x88   : > { %879 = vmatprep.mubr.f32.mxu0 %v4348_v49  ;;  %3848 = vmatprep.mubr.msk.f32.mxu1 %vm380_vm1, %v4856_v37 }
  0x89   : > { %1213 = vmatprep.subr.mxu1 %v3284_v11  ;;  %3250 = vmatmul.mubr.msk.f32.gmra.mxu0 %vm380_vm1, %v4740_v13  ;;  %v3324_v11 = vld [vmem:[%s6467_s1 + $0x420] sm:$0xff] }
  0x8a   : > { %3849 = vmatmul.mubr.msk.f32.gmra.mxu1 %vm380_vm1, %v4865_v38  ;;  %1364 = vmatprep.subr.mxu0 %v3321_v12  ;;  %v3317_v12 = vld [vmem:[%s6467_s1 + $0x3e8] sm:$0xff] }
  0x8b   : > { %1214 = vmatpush1.msra.mxu1 %v3283_v14  ;;  %885 = vmatprep.mubr.f32.mxu0 %v4348_v49  ;;  %v2249_v14 = vld [vmem:[%s6469_s3 + $0x1f8] sm:$0xff] }
  0x8c   : > { %1215 = vmatprep.subr.mxu1 %v3277_v15  ;;  %1249 = vmatprep.mubr.f32.mxu1 %v4348_v49  ;;  %v3310_v15 = vld [vmem:[%s6467_s1 + $0x3b0] sm:$0xff] }
  0x8d   : > { %1216 = vmatpush1.msra.mxu1 %v3276_v16  ;;  %1365 = vmatpush1.msra.mxu0 %v3320_v18  ;;  %v3303_v16 = vld [vmem:[%s6467_s1 + $0x378] sm:$0xff] }
  0x8e   : > { %3251 = vmatmul.mubr.msk.f32.gmra.mxu0 %vm380_vm1, %v4758_v17  ;;  %3362 = vmatmul.mubr.msk.f32.vlgmr.msra.gmra.mxu1 %vm380_vm1, %v4608_v48  ;;  %v2233_v18 = vld [vmem:[%s6469_s3 + $0x178] sm:$0xff] }
  0x8f   : > { %3396 = vmatprep.subr.msk.mxu1 %vm429_vm0, %v3358_v19  ;;  %891 = vmatprep.mubr.f32.mxu0 %v4348_v49  ;;  %v3296_v19 = vld [vmem:[%s6467_s1 + $0x340] sm:$0xff] }
  0x90   : > { %3397 = vmatpush1.msk.msra.mxu1 %vm429_vm0, %v3357_v20  ;;  %1255 = vmatprep.mubr.f32.mxu1 %v4348_v49  ;;  %v2248_v20 = vld [vmem:[%s6469_s3 + $0x1f0] sm:$0xff] }
  0x91   : > { %1366 = vmatprep.subr.mxu0 %v3314_v22  ;;  %1517 = vmatprep.subr.mxu1 %v3351_v23  ;;  %v2232_v22 = vld [vmem:[%s6469_s3 + $0x170] sm:$0xff]  ;;  %v3289_v23 = vld [vmem:[%s6467_s1 + $0x308] sm:$0xff] }
  0x92   : > { %3252 = vmatmul.mubr.msk.f32.gmra.mxu0 %vm380_vm1, %v4776_v21  ;;  %3363 = vmatmul.mubr.msk.f32.gmra.mxu1 %vm380_vm1, %v4628_v53 }
  0x93   : > { %1367 = vmatpush1.msra.mxu0 %v3313_v24  ;;  %897 = vmatprep.mubr.f32.mxu0 %v4348_v49  ;;  %v2247_v24 = vld [vmem:[%s6469_s3 + $0x1e8] sm:$0xff] }
  0x94   : > { %1261 = vmatprep.mubr.f32.mxu1 %v4348_v49  ;;  %1518 = vmatpush1.msra.mxu1 %v3350_v26  ;;  %v2231_v26 = vld [vmem:[%s6469_s3 + $0x168] sm:$0xff] }
  0x95   : > { %1368 = vmatprep.subr.mxu0 %v3307_v27  ;;  %1519 = vmatprep.subr.mxu1 %v3344_v28  ;;  %v3282_v27 = vld [vmem:[%s6467_s1 + $0x2d0] sm:$0xff]  ;;  %v2246_v28 = vld [vmem:[%s6469_s3 + $0x1e0] sm:$0xff] }
  0x96   : > { %3253 = vmatmul.mubr.msk.f32.gmra.mxu0 %vm380_vm1, %v4794_v25  ;;  %3364 = vmatmul.mubr.msk.f32.gmra.mxu1 %vm380_vm1, %v4649_v57 }
  0x97   : > { %1369 = vmatpush1.msra.mxu0 %v3306_v30  ;;  %903 = vmatprep.mubr.f32.mxu0 %v4348_v49  ;;  %v2230_v30 = vld [vmem:[%s6469_s3 + $0x160] sm:$0xff] }
  0x98   : > { %1267 = vmatprep.mubr.f32.mxu1 %v4348_v49  ;;  %1520 = vmatpush1.msra.mxu1 %v3343_v31  ;;  %v2217_v31 = vld [vmem:[%s6469_s3 + $0xf8] sm:$0xff] }
  0x99   : > { %1370 = vmatprep.subr.mxu0 %v3300_v32  ;;  %1521 = vmatprep.subr.mxu1 %v3337_v34  ;;  %v2245_v32 = vld [vmem:[%s6469_s3 + $0x1d8] sm:$0xff] }
  0x9a   : > { %3254 = vmatmul.mubr.msk.f32.gmra.mxu0 %vm380_vm1, %v4812_v29  ;;  %3365 = vmatmul.mubr.msk.f32.gmra.mxu1 %vm380_vm1, %v4667_v61  ;;  %v2229_v34 = vld [vmem:[%s6469_s3 + $0x158] sm:$0xff] }
  0x9b   : > { %909 = vmatprep.mubr.f32.mxu0 %v4348_v49  ;;  %1273 = vmatprep.mubr.f32.mxu1 %v4348_v49 }
  0x9c   : > { %1371 = vmatpush1.msra.mxu0 %v3299_v35  ;;  %1522 = vmatpush1.msra.mxu1 %v3336_v39  ;;  %v2244_v35 = vld [vmem:[%s6469_s3 + $0x1d0] sm:$0xff] }
  0x9d   : > { %1372 = vmatprep.subr.mxu0 %v3293_v40  ;;  %1523 = vmatprep.subr.mxu1 %v3330_v41  ;;  %v2228_v39 = vld [vmem:[%s6469_s3 + $0x150] sm:$0xff]  ;;  %v2243_v40 = vld [vmem:[%s6469_s3 + $0x1c8] sm:$0xff] }
  0x9e   : > { %3255 = vmatmul.mubr.msk.f32.gmra.mxu0 %vm380_vm1, %v4830_v33  ;;  %3366 = vmatmul.mubr.msk.f32.gmra.mxu1 %vm380_vm1, %v4686_v1  ;;  %v2227_v41 = vld [vmem:[%s6469_s3 + $0x148] sm:$0xff] }
  0x9f   : > { %915 = vmatprep.mubr.f32.mxu0 %v4348_v49  ;;  %1279 = vmatprep.mubr.f32.mxu1 %v4348_v49 }
  0xa0   : > { %1373 = vmatpush1.msra.mxu0 %v3292_v42  ;;  %1524 = vmatpush1.msra.mxu1 %v3329_v43  ;;  %v2242_v42 = vld [vmem:[%s6469_s3 + $0x1c0] sm:$0xff] }
  0xa1   : > { %1374 = vmatprep.subr.mxu0 %v3286_v44  ;;  %1525 = vmatprep.subr.mxu1 %v3323_v45  ;;  %v2226_v43 = vld [vmem:[%s6469_s3 + $0x140] sm:$0xff]  ;;  %v2241_v44 = vld [vmem:[%s6469_s3 + $0x1b8] sm:$0xff] }
  0xa2   : > { %3256 = vmatmul.mubr.msk.f32.gmra.mxu0 %vm380_vm1, %v4846_v36  ;;  %3367 = vmatmul.mubr.msk.f32.gmra.mxu1 %vm380_vm1, %v4704_v5 }
  0xa3   : > { %921 = vmatprep.mubr.f32.mxu0 %v4348_v49  ;;  %1285 = vmatprep.mubr.f32.mxu1 %v4348_v49 }
  0xa4   : > { %1375 = vmatpush1.msra.mxu0 %v3285_v46  ;;  %1526 = vmatpush1.msra.mxu1 %v3322_v47  ;;  %v2201_v47 = vld [vmem:[%s6469_s3 + $0x78] sm:$0xff] }
  0xa5   : > { %1376 = vmatprep.subr.mxu0 %v3279_v50  ;;  %1527 = vmatprep.subr.mxu1 %v3316_v51  ;;  %v2225_v50 = vld [vmem:[%s6469_s3 + $0x138] sm:$0xff] }
  0xa6   : > { %3257 = vmatmul.mubr.msk.f32.gmra.mxu0 %vm380_vm1, %v4856_v37  ;;  %3368 = vmatmul.mubr.msk.f32.gmra.mxu1 %vm380_vm1, %v4722_v9 }
  0xa7   : > { %927 = vmatprep.mubr.f32.mxu0 %v4348_v49  ;;  %1291 = vmatprep.mubr.f32.mxu1 %v4348_v49 }
  0xa8   : > { %1377 = vmatpush1.msra.mxu0 %v3278_v52  ;;  %1528 = vmatpush1.msra.mxu1 %v3315_v54  ;;  %v2240_v54 = vld [vmem:[%s6469_s3 + $0x1b0] sm:$0xff] }
  0xa9   : > { %3851 = vmatprep.subr.msk.mxu0 %vm429_vm0, %v3359_v55  ;;  %1529 = vmatprep.subr.mxu1 %v3309_v56  ;;  %v2200_v56 = vld [vmem:[%s6469_s3 + $0x70] sm:$0xff] }
  0xaa   : > { %3258 = vmatmul.mubr.msk.f32.gmra.mxu0 %vm380_vm1, %v4865_v38  ;;  %3369 = vmatmul.mubr.msk.f32.gmra.mxu1 %vm380_vm1, %v4740_v13 }
  0xab   : > { %1297 = vmatprep.mubr.f32.mxu1 %v4348_v49  ;;  %1410 = vmatprep.mubr.f32.mxu0 %v4348_v49 }
  0xac   : > { %1530 = vmatpush1.msra.mxu1 %v3308_v58  ;;  %v2215_v58 = vld [vmem:[%s6469_s3 + $0xe8] sm:$0xff] }
  0xad   : > { %1531 = vmatprep.subr.mxu1 %v3302_v59 }
  0xae   : > { %3370 = vmatmul.mubr.msk.f32.gmra.mxu1 %vm380_vm1, %v4758_v17  ;;  %3380 = vmatmul.mubr.msk.f32.vlgmr.msra.gmra.mxu0 %vm380_vm1, %v4608_v48 }
  0xaf   : > { %1303 = vmatprep.mubr.f32.mxu1 %v4348_v49  ;;  %1416 = vmatprep.mubr.f32.mxu0 %v4348_v49 }
  0xb0   : > { %3852 = vmatpush3.msk.msra.mxu0 %vm429_vm0, %v3359_v55  ;;  %1532 = vmatpush1.msra.mxu1 %v3301_v60 }
  0xb1   : > { %3853 = vmatprep.subr.mxu0 %v3352_v62  ;;  %1533 = vmatprep.subr.mxu1 %v3295_v63 }
  0xb2   : > { %3371 = vmatmul.mubr.msk.f32.gmra.mxu1 %vm380_vm1, %v4776_v21  ;;  %3381 = vmatmul.mubr.msk.f32.gmra.mxu0 %vm380_vm1, %v4628_v53 }
  0xb3   : > { %1309 = vmatprep.mubr.f32.mxu1 %v4348_v49  ;;  %1422 = vmatprep.mubr.f32.mxu0 %v4348_v49 }
  0xb4   : > { %3854 = vmatpush3.msra.mxu0 %v3352_v62  ;;  %1534 = vmatpush1.msra.mxu1 %v3294_v0  ;;  %v2239_v62 = vld [vmem:[%s6469_s3 + $0x1a8] sm:$0xff] }
  0xb5   : > { %3855 = vmatprep.subr.mxu0 %v3345_v2  ;;  %1535 = vmatprep.subr.mxu1 %v3288_v3  ;;  %v2199_v0 = vld [vmem:[%s6469_s3 + $0x68] sm:$0xff] }
  0xb6   : > { %3372 = vmatmul.mubr.msk.f32.gmra.mxu1 %vm380_vm1, %v4794_v25  ;;  %3382 = vmatmul.mubr.msk.f32.gmra.mxu0 %vm380_vm1, %v4649_v57 }
  0xb7   : > { %1315 = vmatprep.mubr.f32.mxu1 %v4348_v49  ;;  %1428 = vmatprep.mubr.f32.mxu0 %v4348_v49 }
  0xb8   : > { %3856 = vmatpush3.msra.mxu0 %v3345_v2  ;;  %1536 = vmatpush1.msra.mxu1 %v3287_v4  ;;  %v2223_v2 = vld [vmem:[%s6469_s3 + $0x128] sm:$0xff] }
  0xb9   : > { %3857 = vmatprep.subr.mxu0 %v3338_v6  ;;  %1537 = vmatprep.subr.mxu1 %v3281_v7 }
  0xba   : > { %3373 = vmatmul.mubr.msk.f32.gmra.mxu1 %vm380_vm1, %v4812_v29  ;;  %3383 = vmatmul.mubr.msk.f32.gmra.mxu0 %vm380_vm1, %v4667_v61 }
  0xbb   : > { %1321 = vmatprep.mubr.f32.mxu1 %v4348_v49  ;;  %1434 = vmatprep.mubr.f32.mxu0 %v4348_v49 }
  0xbc   : > { %3858 = vmatpush3.msra.mxu0 %v3338_v6  ;;  %1538 = vmatpush1.msra.mxu1 %v3280_v8  ;;  %v2198_v8 = vld [vmem:[%s6469_s3 + $0x60] sm:$0xff] }
  0xbd   : > { %3859 = vmatprep.subr.mxu0 %v3331_v10  ;;  %3591 = vmatprep.subr.mxu1 %v2249_v14 }
  0xbe   : > { %3374 = vmatmul.mubr.msk.f32.gmra.mxu1 %vm380_vm1, %v4830_v33  ;;  %3384 = vmatmul.mubr.msk.f32.gmra.mxu0 %vm380_vm1, %v4686_v1 }
  0xbf   : > { %1327 = vmatprep.mubr.f32.mxu1 %v4348_v49  ;;  %1440 = vmatprep.mubr.f32.mxu0 %v4348_v49 }
  0xc0   : > { %3860 = vmatpush3.msra.mxu0 %v3331_v10  ;;  %v2222_v10 = vld [vmem:[%s6469_s3 + $0x120] sm:$0xff] }
  0xc1   : > { %3861 = vmatprep.subr.mxu0 %v3324_v11 }
  0xc2   : > { %3375 = vmatmul.mubr.msk.f32.gmra.mxu1 %vm380_vm1, %v4846_v36  ;;  %3385 = vmatmul.mubr.msk.f32.gmra.mxu0 %vm380_vm1, %v4704_v5 }
  0xc3   : > { %1333 = vmatprep.mubr.f32.mxu1 %v4348_v49  ;;  %1446 = vmatprep.mubr.f32.mxu0 %v4348_v49 }
  0xc4   : > { %3862 = vmatpush3.msra.mxu0 %v3324_v11 }
  0xc5   : > { %3863 = vmatprep.subr.mxu0 %v3317_v12 }
  0xc6   : > { %3376 = vmatmul.mubr.msk.f32.gmra.mxu1 %vm380_vm1, %v4856_v37  ;;  %3386 = vmatmul.mubr.msk.f32.gmra.mxu0 %vm380_vm1, %v4722_v9 }
  0xc7   : > { %1339 = vmatprep.mubr.f32.mxu1 %v4348_v49  ;;  %1452 = vmatprep.mubr.f32.mxu0 %v4348_v49 }
  0xc8   : > { %3864 = vmatpush3.msra.mxu0 %v3317_v12 }
  0xc9   : > { %3865 = vmatprep.subr.mxu0 %v3310_v15 }
  0xca   : > { %3377 = vmatmul.mubr.msk.f32.gmra.mxu1 %vm380_vm1, %v4865_v38  ;;  %3387 = vmatmul.mubr.msk.f32.gmra.mxu0 %vm380_vm1, %v4740_v13 }
  0xcb   : > { %1458 = vmatprep.mubr.f32.mxu0 %v4348_v49  ;;  %1571 = vmatprep.mubr.f32.mxu1 %v4348_v49 }
  0xcc   : > { %3866 = vmatpush3.msra.mxu0 %v3310_v15 }
  0xcd   : > { %3867 = vmatprep.subr.mxu0 %v3303_v16 }
  0xce   : > { %3388 = vmatmul.mubr.msk.f32.gmra.mxu0 %vm380_vm1, %v4758_v17  ;;  %3398 = vmatmul.mubr.msk.f32.vlgmr.msra.gmra.mxu1 %vm380_vm1, %v4608_v48 }
  0xcf   : > { %1464 = vmatprep.mubr.f32.mxu0 %v4348_v49  ;;  %1577 = vmatprep.mubr.f32.mxu1 %v4348_v49 }
  0xd0   : > { %3868 = vmatpush3.msra.mxu0 %v3303_v16  ;;  %3592 = vmatpush3.msra.mxu1 %v2233_v18  ;;  %v2197_v16 = vld [vmem:[%s6469_s3 + $0x58] sm:$0xff]  ;;  %v2212_v18 = vld [vmem:[%s6469_s3 + $0xd0] sm:$0xff] }
  0xd1   : > { %3869 = vmatprep.subr.mxu0 %v3296_v19  ;;  %3593 = vmatprep.subr.mxu1 %v2248_v20 }
  0xd2   : > { %3389 = vmatmul.mubr.msk.f32.gmra.mxu0 %vm380_vm1, %v4776_v21  ;;  %3399 = vmatmul.mubr.msk.f32.gmra.mxu1 %vm380_vm1, %v4628_v53 }
  0xd3   : > { %1470 = vmatprep.mubr.f32.mxu0 %v4348_v49  ;;  %1583 = vmatprep.mubr.f32.mxu1 %v4348_v49 }
  0xd4   : > { %3870 = vmatpush3.msra.mxu0 %v3296_v19  ;;  %3594 = vmatpush3.msra.mxu1 %v2232_v22  ;;  %v2236_v19 = vld [vmem:[%s6469_s3 + $0x190] sm:$0xff] }
  0xd5   : > { %3871 = vmatprep.subr.mxu0 %v3289_v23  ;;  %3595 = vmatprep.subr.mxu1 %v2247_v24  ;;  %v2196_v24 = vld [vmem:[%s6469_s3 + $0x50] sm:$0xff] }
  0xd6   : > { %3390 = vmatmul.mubr.msk.f32.gmra.mxu0 %vm380_vm1, %v4794_v25  ;;  %3400 = vmatmul.mubr.msk.f32.gmra.mxu1 %vm380_vm1, %v4649_v57 }
  0xd7   : > { %1476 = vmatprep.mubr.f32.mxu0 %v4348_v49  ;;  %1589 = vmatprep.mubr.f32.mxu1 %v4348_v49 }
  0xd8   : > { %3872 = vmatpush3.msra.mxu0 %v3289_v23  ;;  %3596 = vmatpush3.msra.mxu1 %v2231_v26  ;;  %v2220_v26 = vld [vmem:[%s6469_s3 + $0x110] sm:$0xff] }
  0xd9   : > { %3873 = vmatprep.subr.mxu0 %v3282_v27  ;;  %3597 = vmatprep.subr.mxu1 %v2246_v28 }
  0xda   : > { %3391 = vmatmul.mubr.msk.f32.gmra.mxu0 %vm380_vm1, %v4812_v29  ;;  %3401 = vmatmul.mubr.msk.f32.gmra.mxu1 %vm380_vm1, %v4667_v61 }
  0xdb   : > { %1482 = vmatprep.mubr.f32.mxu0 %v4348_v49  ;;  %1595 = vmatprep.mubr.f32.mxu1 %v4348_v49 }
  0xdc   : > { %3874 = vmatpush3.msra.mxu0 %v3282_v27  ;;  %3598 = vmatpush3.msra.mxu1 %v2230_v30  ;;  %v2235_v27 = vld [vmem:[%s6469_s3 + $0x188] sm:$0xff] }
  0xdd   : > { %3511 = vmatprep.subr.mxu0 %v2217_v31  ;;  %3599 = vmatprep.subr.mxu1 %v2245_v32  ;;  %v2195_v32 = vld [vmem:[%s6469_s3 + $0x48] sm:$0xff] }
  0xde   : > { %3392 = vmatmul.mubr.msk.f32.gmra.mxu0 %vm380_vm1, %v4830_v33  ;;  %3402 = vmatmul.mubr.msk.f32.gmra.mxu1 %vm380_vm1, %v4686_v1 }
  0xdf   : > { %1488 = vmatprep.mubr.f32.mxu0 %v4348_v49  ;;  %1601 = vmatprep.mubr.f32.mxu1 %v4348_v49 }
  0xe0   : > { %3600 = vmatpush3.msra.mxu1 %v2229_v34  ;;  %v2219_v34 = vld [vmem:[%s6469_s3 + $0x108] sm:$0xff] }
  0xe1   : > { %3601 = vmatprep.subr.mxu1 %v2244_v35  ;;  %v2234_v35 = vld [vmem:[%s6469_s3 + $0x180] sm:$0xff] }
  0xe2   : > { %3393 = vmatmul.mubr.msk.f32.gmra.mxu0 %vm380_vm1, %v4846_v36  ;;  %3403 = vmatmul.mubr.msk.f32.gmra.mxu1 %vm380_vm1, %v4704_v5 }
  0xe3   : > { %1494 = vmatprep.mubr.f32.mxu0 %v4348_v49  ;;  %1607 = vmatprep.mubr.f32.mxu1 %v4348_v49 }
  0xe4   : > { %3602 = vmatpush3.msra.mxu1 %v2228_v39 }
  0xe5   : > { %3603 = vmatprep.subr.mxu1 %v2243_v40 }
  0xe6   : > { %3394 = vmatmul.mubr.msk.f32.gmra.mxu0 %vm380_vm1, %v4856_v37  ;;  %3404 = vmatmul.mubr.msk.f32.gmra.mxu1 %vm380_vm1, %v4722_v9 }
  0xe7   : > { %1500 = vmatprep.mubr.f32.mxu0 %v4348_v49  ;;  %1613 = vmatprep.mubr.f32.mxu1 %v4348_v49 }
  0xe8   : > { %3604 = vmatpush3.msra.mxu1 %v2227_v41  ;;  %v2218_v41 = vld [vmem:[%s6469_s3 + $0x100] sm:$0xff] }
  0xe9   : > { %3605 = vmatprep.subr.mxu1 %v2242_v42 }
  0xea   : > { %3395 = vmatmul.mubr.msk.f32.gmra.mxu0 %vm380_vm1, %v4865_v38  ;;  %3405 = vmatmul.mubr.msk.f32.gmra.mxu1 %vm380_vm1, %v4740_v13 }
  0xeb   : > { %1619 = vmatprep.mubr.f32.mxu1 %v4348_v49  ;;  %3875 = vmatprep.mubr.msk.f32.mxu0 %vm380_vm1, %v4608_v48  ;;  %v2216_v48 = vld [vmem:[%s6469_s3 + $0xf0] sm:$0xff] }
  0xec   : > { %3606 = vmatpush3.msra.mxu1 %v2226_v43 }
  0xed   : > { %v5380_v45 = vpop.f32.mrf.mxu0  ;;  %v5382_v46 = vpop.f32.mrf.mxu1  ;;  %3607 = vmatprep.subr.mxu1 %v2241_v44 }
  0xee   : > { %3406 = vmatmul.mubr.msk.f32.gmra.mxu1 %vm380_vm1, %v4758_v17  ;;  %3876 = vmatmul.mubr.msk.f32.vlgmr.msra.gmra.mxu0 %vm380_vm1, %v4628_v53 }
  0xef   : > { %v5397_v51 = vpop.f32.mrf.mxu0  ;;  %v5399_v52 = vpop.f32.mrf.mxu1  ;;  %1625 = vmatprep.mubr.f32.mxu1 %v4348_v49  ;;  %3878 = vmatprep.mubr.msk.f32.mxu0 %vm380_vm1, %v4649_v57  ;;  %v2224_v57 = vld [vmem:[%s6469_s3 + $0x130] sm:$0xff] }
  0xf0   : > { %3512 = vmatpush3.msra.mxu0 %v2201_v47  ;;  %3608 = vmatpush3.msra.mxu1 %v2225_v50  ;;  %v2208_v50 = vld [vmem:[%s6469_s3 + $0xb0] sm:$0xff] }
  0xf1   : > { %v5407_v53 = vpop.f32.mrf.mxu0  ;;  %v5409_v55 = vpop.f32.mrf.mxu1  ;;  %3513 = vmatprep.subr.mxu0 %v2216_v48  ;;  %3609 = vmatprep.subr.mxu1 %v2240_v54  ;;  %v2192_v48 = vld [vmem:[%s6469_s3 + $0x30] sm:$0xff] }
  0xf2   : > { %3407 = vmatmul.mubr.msk.f32.gmra.mxu1 %vm380_vm1, %v4776_v21  ;;  %3879 = vmatmul.mubr.msk.f32.gmra.mxu0 %vm380_vm1, %v4667_v61 }
  0xf3   : > { %v5424_v59 = vpop.f32.mrf.mxu0  ;;  %v5426_v60 = vpop.f32.mrf.mxu1  ;;  %1631 = vmatprep.mubr.f32.mxu1 %v4348_v49  ;;  %3881 = vmatprep.mubr.msk.f32.mxu0 %vm380_vm1, %v4686_v1  ;;  %v2214_v1 = vld [vmem:[%s6469_s3 + $0xe0] sm:$0xff] }
  0xf4   : > { %3514 = vmatpush3.msra.mxu0 %v2200_v56  ;;  %3610 = vmatpush3.msra.mxu1 %v2224_v57  ;;  %v2207_v57 = vld [vmem:[%s6469_s3 + $0xa8] sm:$0xff] }
  0xf5   : > { %v5434_v61 = vpop.f32.mrf.mxu0  ;;  %v5436_v63 = vpop.f32.mrf.mxu1  ;;  %3515 = vmatprep.subr.mxu0 %v2215_v58  ;;  %3611 = vmatprep.subr.mxu1 %v2239_v62  ;;  %v2191_v58 = vld [vmem:[%s6469_s3 + $0x28] sm:$0xff] }
  0xf6   : > { %3408 = vmatmul.mubr.msk.f32.gmra.mxu1 %vm380_vm1, %v4794_v25  ;;  %3882 = vmatmul.mubr.msk.f32.gmra.mxu0 %vm380_vm1, %v4704_v5  ;;  %v2238_v5 = vld [vmem:[%s6469_s3 + $0x1a0] sm:$0xff] }
  0xf7   : > { %v5451_v3 = vpop.f32.mrf.mxu0  ;;  %v5453_v4 = vpop.f32.mrf.mxu1  ;;  %1637 = vmatprep.mubr.f32.mxu1 %v4348_v49  ;;  %3884 = vmatprep.mubr.msk.f32.mxu0 %vm380_vm1, %v4722_v9  ;;  %v2213_v9 = vld [vmem:[%s6469_s3 + $0xd8] sm:$0xff] }
  0xf8   : > { %3516 = vmatpush3.msra.mxu0 %v2199_v0  ;;  %3612 = vmatpush3.msra.mxu1 %v2223_v2  ;;  %v2190_v2 = vld [vmem:[%s6469_s3 + $0x20] sm:$0xff] }
  0xf9   : > { %v5461_v6 = vpop.f32.mrf.mxu0  ;;  %v5463_v7 = vpop.f32.mrf.mxu1  ;;  %3517 = vmatprep.subr.mxu0 %v2214_v1  ;;  %3613 = vmatprep.subr.mxu1 %v2238_v5  ;;  %v2206_v1 = vld [vmem:[%s6469_s3 + $0xa0] sm:$0xff] }
  0xfa   : > { %3409 = vmatmul.mubr.msk.f32.gmra.mxu1 %vm380_vm1, %v4812_v29  ;;  %3885 = vmatmul.mubr.msk.f32.gmra.mxu0 %vm380_vm1, %v4740_v13  ;;  %v2237_v13 = vld [vmem:[%s6469_s3 + $0x198] sm:$0xff] }
  0xfb   : > { %v5478_v11 = vpop.f32.mrf.mxu0  ;;  %v5480_v12 = vpop.f32.mrf.mxu1  ;;  %1643 = vmatprep.mubr.f32.mxu1 %v4348_v49  ;;  %3887 = vmatprep.mubr.msk.f32.mxu0 %vm380_vm1, %v4758_v17  ;;  %v2221_v17 = vld [vmem:[%s6469_s3 + $0x118] sm:$0xff] }
  0xfc   : > { %3518 = vmatpush3.msra.mxu0 %v2198_v8  ;;  %3614 = vmatpush3.msra.mxu1 %v2222_v10  ;;  %v2189_v10 = vld [vmem:[%s6469_s3 + $0x18] sm:$0xff] }
  0xfd   : > { %v5488_v14 = vpop.f32.mrf.mxu0  ;;  %v5490_v15 = vpop.f32.mrf.mxu1  ;;  %3519 = vmatprep.subr.mxu0 %v2213_v9  ;;  %3615 = vmatprep.subr.mxu1 %v2237_v13  ;;  %v2205_v9 = vld [vmem:[%s6469_s3 + $0x98] sm:$0xff] }
  0xfe   : > { %3410 = vmatmul.mubr.msk.f32.gmra.mxu1 %vm380_vm1, %v4830_v33  ;;  %3888 = vmatmul.mubr.msk.f32.gmra.mxu0 %vm380_vm1, %v4776_v21 }
  0xff   : > { %v5508_v20 = vpop.f32.mrf.mxu0  ;;  %v5510_v22 = vpop.f32.mrf.mxu1  ;;  %1649 = vmatprep.mubr.f32.mxu1 %v4348_v49  ;;  %3890 = vmatprep.mubr.msk.f32.mxu0 %vm380_vm1, %v4794_v25  ;;  %v2211_v25 = vld [vmem:[%s6469_s3 + $0xc8] sm:$0xff] }
 0x100   : > { %3520 = vmatpush3.msra.mxu0 %v2197_v16  ;;  %3616 = vmatpush3.msra.mxu1 %v2221_v17  ;;  %v2204_v17 = vld [vmem:[%s6469_s3 + $0x90] sm:$0xff] }
 0x101   : > { %v5515_v21 = vpop.f32.mrf.mxu0  ;;  %v5517_v23 = vpop.f32.mrf.mxu1  ;;  %3521 = vmatprep.subr.mxu0 %v2212_v18  ;;  %3617 = vmatprep.subr.mxu1 %v2236_v19  ;;  %v2188_v18 = vld [vmem:[%s6469_s3 + $0x10] sm:$0xff] }
 0x102   : > { %3411 = vmatmul.mubr.msk.f32.gmra.mxu1 %vm380_vm1, %v4846_v36  ;;  %3891 = vmatmul.mubr.msk.f32.gmra.mxu0 %vm380_vm1, %v4812_v29 }
 0x103   : > { %v5535_v28 = vpop.f32.mrf.mxu0  ;;  %v5537_v30 = vpop.f32.mrf.mxu1  ;;  %1655 = vmatprep.mubr.f32.mxu1 %v4348_v49  ;;  %3893 = vmatprep.mubr.msk.f32.mxu0 %vm380_vm1, %v4830_v33  ;;  %v2210_v33 = vld [vmem:[%s6469_s3 + $0xc0] sm:$0xff] }
 0x104   : > { %3522 = vmatpush3.msra.mxu0 %v2196_v24  ;;  %3618 = vmatpush3.msra.mxu1 %v2220_v26  ;;  %v2203_v26 = vld [vmem:[%s6469_s3 + $0x88] sm:$0xff] }
 0x105   : > { %v5542_v29 = vpop.f32.mrf.mxu0  ;;  %v5544_v31 = vpop.f32.mrf.mxu1  ;;  %3523 = vmatprep.subr.mxu0 %v2211_v25  ;;  %3619 = vmatprep.subr.mxu1 %v2235_v27  ;;  %v2187_v25 = vld [vmem:[%s6469_s3 + $0x8] sm:$0xff] }
 0x106   : > { %3412 = vmatmul.mubr.msk.f32.gmra.mxu1 %vm380_vm1, %v4856_v37  ;;  %3894 = vmatmul.mubr.msk.f32.gmra.mxu0 %vm380_vm1, %v4846_v36  ;;  %v2194_v36 = vld [vmem:[%s6469_s3 + $0x40] sm:$0xff] }
 0x107   : > { %v5562_v39 = vpop.f32.mrf.mxu0  ;;  %v5564_v40 = vpop.f32.mrf.mxu1  ;;  %1661 = vmatprep.mubr.f32.mxu1 %v4348_v49  ;;  %3896 = vmatprep.mubr.msk.f32.mxu0 %vm380_vm1, %v4856_v37  ;;  %v2209_v49 = vld [vmem:[%s6469_s3 + $0xb8] sm:$0xff] }
 0x108   : > { %3524 = vmatpush3.msra.mxu0 %v2195_v32  ;;  %3620 = vmatpush3.msra.mxu1 %v2219_v34  ;;  %v2193_v37 = vld [vmem:[%s6469_s3 + $0x38] sm:$0xff]  ;;  %v2202_v34 = vld [vmem:[%s6469_s3 + $0x80] sm:$0xff] }
 0x109   : > { %v5575_v42 = vpop.f32.mrf.mxu0  ;;  %v5577_v43 = vpop.f32.mrf.mxu1  ;;  %3525 = vmatprep.subr.mxu0 %v2210_v33  ;;  %3621 = vmatprep.subr.mxu1 %v2234_v35  ;;  %v2186_v33 = vld [vmem:[%s6469_s3] sm:$0xff] }
 0x10a   : > { %3413 = vmatmul.mubr.msk.f32.gmra.mxu1 %vm380_vm1, %v4865_v38  ;;  %3897 = vmatmul.mubr.msk.f32.gmra.mxu0 %vm380_vm1, %v4865_v38  ;;  %v5602_v38 = vld [vmem:[%s6469_s3 + $0x318] sm:$0xff] }
 0x10b   : > { %v5589_v44 = vpop.f32.mrf.mxu0  ;;  %v5591_v47 = vpop.f32.mrf.mxu1  ;;  %3526 = vmatpush3.msra.mxu0 %v2194_v36  ;;  %3622 = vmatpush3.msra.mxu1 %v2218_v41  ;;  %v2281_v41 = vld [vmem:[%s6469_s3 + $0x2f8] sm:$0xff] }
 0x10c   : > { %6477 = vst [vmem:[#allocation5_spill] sm:$0xff] %v5591_v47  ;;  %3527 = vmatprep.subr.mxu0 %v2209_v49  ;;  %3899 = vmatprep.subr.mxu1 %v5602_v38 }
 0x10d   : > { %v5604_v54 = vpop.f32.mrf.mxu0  ;;  %v5606_v56 = vpop.f32.mrf.mxu1  ;;  %3528 = vmatpush3.msra.mxu0 %v2193_v37 }
 0x10e   : > { %6478 = vst [vmem:[#allocation6_spill] sm:$0xff] %v5606_v56  ;;  %3529 = vmatprep.subr.mxu0 %v2208_v50 }
 0x10f   : > { %v5615_v62 = vpop.f32.mrf.mxu0  ;;  %v5617_v0 = vpop.f32.mrf.mxu1  ;;  %3530 = vmatpush3.msra.mxu0 %v2192_v48 }
 0x110   : > { %6479 = vst [vmem:[#allocation7_spill] sm:$0xff] %v5617_v0  ;;  %3531 = vmatprep.subr.mxu0 %v2207_v57 }
 0x111   : > { %v5625_v5 = vpop.f32.mrf.mxu0  ;;  %v5627_v8 = vpop.f32.mrf.mxu1  ;;  %3532 = vmatpush3.msra.mxu0 %v2191_v58 }
 0x112   : > { %6480 = vst [vmem:[#allocation8_spill] sm:$0xff] %v5627_v8  ;;  %3533 = vmatprep.subr.mxu0 %v2206_v1 }
 0x113   : > { %v5635_v13 = vpop.f32.mrf.mxu0  ;;  %v5637_v16 = vpop.f32.mrf.mxu1  ;;  %3534 = vmatpush3.msra.mxu0 %v2190_v2 }
 0x114   : > { %6481 = vst [vmem:[#allocation9_spill] sm:$0xff] %v5637_v16  ;;  %3535 = vmatprep.subr.mxu0 %v2205_v9 }
 0x115   : > { %v5645_v19 = vpop.f32.mrf.mxu0  ;;  %v5647_v24 = vpop.f32.mrf.mxu1  ;;  %3536 = vmatpush3.msra.mxu0 %v2189_v10 }
 0x116   : > { %6482 = vst [vmem:[#allocation10_spill] sm:$0xff] %v5647_v24  ;;  %3537 = vmatprep.subr.mxu0 %v2204_v17 }
 0x117   : > { %v5655_v27 = vpop.f32.mrf.mxu0  ;;  %v5657_v32 = vpop.f32.mrf.mxu1  ;;  %3538 = vmatpush3.msra.mxu0 %v2188_v18 }
 0x118   : > { %6483 = vst [vmem:[#allocation11_spill] sm:$0xff] %v5657_v32  ;;  %3539 = vmatprep.subr.mxu0 %v2203_v26 }
 0x119   : > { %v5665_v35 = vpop.f32.mrf.mxu0  ;;  %v5667_v36 = vpop.f32.mrf.mxu1  ;;  %3540 = vmatpush3.msra.mxu0 %v2187_v25 }
 0x11a   : > { %6484 = vst [vmem:[#allocation12_spill] sm:$0xff] %v5667_v36  ;;  %3541 = vmatprep.subr.mxu0 %v2202_v34 }
 0x11b   : > { %v5672_v49 = vpop.f32.mrf.mxu0  ;;  %v5674_v37 = vpop.f32.mrf.mxu1  ;;  %3542 = vmatpush3.msra.mxu0 %v2186_v33 }
 0x11c   : > { %6485 = vst [vmem:[#allocation13_spill] sm:$0xff] %v5674_v37  ;;  %3671 = vmatprep.subr.mxu0 %v2281_v41 }
 0x11d   : > { %v5676_v50 = vpop.f32.mrf.mxu0  ;;  %v5678_v48 = vpop.f32.mrf.mxu1 }
 0x11e   : > { %6486 = vst [vmem:[#allocation14_spill] sm:$0xff] %v5678_v48 }
 0x11f   : > { %v5680_v57 = vpop.f32.mrf.mxu0  ;;  %v5682_v58 = vpop.f32.mrf.mxu1 }
 0x120   : > { %6487 = vst [vmem:[#allocation15_spill] sm:$0xff] %v5682_v58 }
 0x121   : > { %v5684_v1 = vpop.f32.mrf.mxu0  ;;  %v5686_v2 = vpop.f32.mrf.mxu1 }
 0x122   : > { %6488 = vst [vmem:[#allocation16_spill] sm:$0xff] %v5686_v2 }
 0x123   : > { %v5688_v9 = vpop.f32.mrf.mxu0  ;;  %v5690_v10 = vpop.f32.mrf.mxu1 }
 0x124   : > { %6489 = vst [vmem:[#allocation17_spill] sm:$0xff] %v5690_v10 }
 0x125   : > { %v5692_v17 = vpop.f32.mrf.mxu0  ;;  %v5694_v18 = vpop.f32.mrf.mxu1 }
 0x126   : > { %6490 = vst [vmem:[#allocation18_spill] sm:$0xff] %v5694_v18 }
 0x127   : > { %v5696_v26 = vpop.f32.mrf.mxu0  ;;  %v5698_v25 = vpop.f32.mrf.mxu1 }
 0x128   : > { %6491 = vst [vmem:[#allocation19_spill] sm:$0xff] %v5698_v25 }
 0x129   : > { %v5700_v34 = vpop.f32.mrf.mxu0  ;;  %v5702_v33 = vpop.f32.mrf.mxu1 }
 0x12a   : > { %6492 = vst [vmem:[#allocation20_spill] sm:$0xff] %v5702_v33 }
 0x12b   : > { %v5704_v41 = vpop.f32.mrf.mxu0  ;;  %v5706_v58 = vpop.f32.mrf.mxu1 }
 0x12c   : > { %6493 = vst [vmem:[#allocation21_spill] sm:$0xff] %v5706_v58 }
 0x12d   : > { %v5708_v2 = vpop.f32.mrf.mxu0  ;;  %v5710_v48 = vpop.f32.mrf.mxu1 }
 0x12e   : > { %6494 = vst [vmem:[#allocation22_spill] sm:$0xff] %v5708_v2  ;;  %6495 = vst [vmem:[#allocation23_spill] sm:$0xff] %v5710_v48 }
 0x12f   : > { %v5712_v10 = vpop.f32.mrf.mxu0  ;;  %v5714_v37 = vpop.f32.mrf.mxu1 }
 0x130   : > { %6496 = vst [vmem:[#allocation24_spill] sm:$0xff] %v5712_v10  ;;  %6497 = vst [vmem:[#allocation25_spill] sm:$0xff] %v5714_v37 }
 0x131   : > { %v5716_v18 = vpop.f32.mrf.mxu0  ;;  %v5718_v36 = vpop.f32.mrf.mxu1 }
 0x132   : > { %6498 = vst [vmem:[#allocation26_spill] sm:$0xff] %v5716_v18  ;;  %6499 = vst [vmem:[#allocation27_spill] sm:$0xff] %v5718_v36 }
 0x133   : > { %v5720_v25 = vpop.f32.mrf.mxu0  ;;  %v5722_v32 = vpop.f32.mrf.mxu1 }
 0x134   : > { %6500 = vst [vmem:[#allocation28_spill] sm:$0xff] %v5720_v25  ;;  %6501 = vst [vmem:[#allocation29_spill] sm:$0xff] %v5722_v32 }
 0x135   : > { %v5724_v33 = vpop.f32.mrf.mxu0  ;;  %v5726_v24 = vpop.f32.mrf.mxu1 }
 0x136   : > { %6502 = vst [vmem:[#allocation30_spill] sm:$0xff] %v5724_v33  ;;  %6503 = vst [vmem:[#allocation31_spill] sm:$0xff] %v5726_v24 }
 0x137   : > { %v5728_v58 = vpop.f32.mrf.mxu0  ;;  %v5730_v16 = vpop.f32.mrf.mxu1 }
 0x138   : > { %6504 = vst [vmem:[#allocation32_spill] sm:$0xff] %v5728_v58  ;;  %6505 = vst [vmem:[#allocation33_spill] sm:$0xff] %v5730_v16  ;;  %v1927_v16 = vlaneseq }
 0x139   : > { %v5732_v48 = vpop.f32.mrf.mxu0  ;;  %v5734_v8 = vpop.f32.mrf.mxu1 }
 0x13a   : > { %6506 = vst [vmem:[#allocation34_spill] sm:$0xff] %v5732_v48  ;;  %6507 = vst [vmem:[#allocation35_spill] sm:$0xff] %v5734_v8 }
 0x13b   : > { %v5736_v37 = vpop.f32.mrf.mxu0  ;;  %v5738_v18 = vpop.f32.mrf.mxu1 }
 0x13c   : > { %6508 = vst [vmem:[#allocation36_spill] sm:$0xff] %v5736_v37  ;;  %6509 = vst [vmem:[#allocation37_spill] sm:$0xff] %v5738_v18 }
 0x13d   : > { %v5740_v36 = vpop.f32.mrf.mxu0  ;;  %v5742_v25 = vpop.f32.mrf.mxu1 }
 0x13e   : > { %6510 = vst [vmem:[#allocation38_spill] sm:$0xff] %v5740_v36  ;;  %6511 = vst [vmem:[#allocation39_spill] sm:$0xff] %v5742_v25  ;;  %v5760_v36 = vshrl.u32 %v1927_v16, 7 }
 0x13f   : > { %v5744_v32 = vpop.f32.mrf.mxu0  ;;  %v5746_v33 = vpop.f32.mrf.mxu1 }
 0x140   : > { %6512 = vst [vmem:[#allocation40_spill] sm:$0xff] %v5744_v32  ;;  %6513 = vst [vmem:[#allocation41_spill] sm:$0xff] %v5746_v33  ;;  %v1933_v16 = vsub.s32 1, %v5760_v36 }
 0x141   : > { %v5748_v24 = vpop.f32.mrf.mxu0  ;;  %v5750_v58 = vpop.f32.mrf.mxu1 }
 0x142   : > { %6514 = vst [vmem:[#allocation42_spill] sm:$0xff] %v5748_v24  ;;  %6515 = vst [vmem:[#allocation43_spill] sm:$0xff] %v5750_v58  ;;  %v1929_v58 = vsub.s32 0, %v5760_v36 }
 0x143   : > { %v5752_v48 = vpop.f32.mrf.mxu0  ;;  %v5754_v8 = vpop.f32.mrf.mxu1 }
 0x144   : > { %6516 = vst [vmem:[#allocation44_spill] sm:$0xff] %v5752_v48  ;;  %6517 = vst [vmem:[#allocation45_spill] sm:$0xff] %v5754_v8  ;;  %v5776_v8 = vld [vmem:[%s6468_s2] sm:$0x7f] }
 0x145   : > { %v5756_v37 = vpop.f32.mrf.mxu0  ;;  %v5758_v18 = vpop.f32.mrf.mxu1 }
 0x146   : > { %6518 = vst [vmem:[#allocation46_spill] sm:$0xff] %v5756_v37  ;;  %6519 = vst [vmem:[#allocation47_spill] sm:$0xff] %v5758_v18  ;;  %v5788_v37 = vrot.slane %v5776_v8, %v1933_v16 }
 0x147   : > { %v5762_v25 = vpop.f32.mrf.mxu0  ;;  %v5764_v32 = vpop.f32.mrf.mxu1 }
 0x148   : > { %6520 = vst [vmem:[#allocation48_spill] sm:$0xff] %v5762_v25  ;;  %6521 = vst [vmem:[#allocation49_spill] sm:$0xff] %v5764_v32 }
 0x149   : > { %v5766_v33 = vpop.f32.mrf.mxu0 }
 0x14a   : > { %6522 = vst [vmem:[#allocation50_spill] sm:$0xff] %v5766_v33  ;;  %v5768_v24 = vpop.f32.mrf.mxu1  ;;  %v5784_v33 = vrot.slane %v5776_v8, %v1929_v58 }
 0x14b   : > { %6523 = vst [vmem:[#allocation51_spill] sm:$0xff] %v5768_v24  ;;  %v5771_v10 = vpop.f32.mrf.mxu0 }
 0x14c   : > { %6524 = vst [vmem:[#allocation52_spill] sm:$0xff] %v5771_v10  ;;  %v5779_v18 = vpop.f32.mrf.mxu1 }
 0x14d   : > { %6525 = vst [vmem:[#allocation53_spill] sm:$0xff] %v5779_v18 }
 0x14e   : > { %v5781_v25 = vpop.f32.mrf.mxu0  ;;  %v1251_v32 = vpop.f32.mrf.mxu1 }
 0x14f   : > { %6526 = vst [vmem:[#allocation54_spill] sm:$0xff] %v5781_v25  ;;  %v1813_v24 = vmax.f32 %v5380_v45, %v1251_v32 }
 0x150   : > { %v5790_v10 = vpop.f32.mrf.mxu0  ;;  %v1253_v48 = vpop.f32.mrf.mxu1 }
 0x151   : > { %6527 = vst [vmem:[#allocation55_spill] sm:$0xff] %v5790_v10  ;;  %v1814_v0 = vmax.f32 %v5397_v51, %v1253_v48  ;;  %v1962_v2 = vadd.f32 %v5784_v33, %v1813_v24 }
 0x152   : > { %v5794_v56 = vpop.f32.mrf.mxu0  ;;  %v1257_v18 = vpop.f32.mrf.mxu1 }
 0x153   : > { %6528 = vst [vmem:[#allocation56_spill] sm:$0xff] %v5794_v56  ;;  %v1963_v25 = vadd.f32 %v5788_v37, %v1814_v0  ;;  %v1820_v58 = vmax.f32 %v5407_v53, %v1257_v18 }
 0x154   : > { %v5798_v47 = vpop.f32.mrf.mxu0  ;;  %v1259_v45 = vpop.f32.mrf.mxu1 }
 0x155   : > { %4029 = vtanh.f32 %v1963_v25  ;;  %v1821_v32 = vmax.f32 %v5424_v59, %v1259_v45  ;;  %v1969_v16 = vadd.f32 %v5784_v33, %v1820_v58 }
 0x156   : > { %4031 = vtanh.f32 %v1962_v2  ;;  %v5802_v10 = vpop.f32.mrf.mxu0  ;;  %v1263_v51 = vpop.f32.mrf.mxu1 }
 0x157   : > { %v1970_v24 = vadd.f32 %v5788_v37, %v1821_v32  ;;  %v1827_v48 = vmax.f32 %v5434_v61, %v1263_v51 }
 0x158   : > { %v5806_v56 = vpop.f32.mrf.mxu0  ;;  %v1265_v0 = vpop.f32.mrf.mxu1 }
 0x159   : > { %4033 = vtanh.f32 %v1970_v24  ;;  %v1828_v53 = vmax.f32 %v5451_v3, %v1265_v0  ;;  %v1976_v18 = vadd.f32 %v5784_v33, %v1827_v48 }
 0x15a   : > { %4035 = vtanh.f32 %v1969_v16  ;;  %v5810_v59 = vpop.f32.mrf.mxu0  ;;  %v1269_v2 = vpop.f32.mrf.mxu1 }
 0x15b   : > { %v1977_v25 = vadd.f32 %v5788_v37, %v1828_v53  ;;  %v1834_v58 = vmax.f32 %v5461_v6, %v1269_v2 }
 0x15c   : > { %v5814_v45 = vpop.f32.mrf.mxu0  ;;  %v1271_v32 = vpop.f32.mrf.mxu1 }
 0x15d   : > { %4037 = vtanh.f32 %v1977_v25  ;;  %v1835_v61 = vmax.f32 %v5478_v11, %v1271_v32  ;;  %v1983_v51 = vadd.f32 %v5784_v33, %v1834_v58  ;;  %v2265_v58 = vld [vmem:[%s6469_s3 + $0x278] sm:$0xff] }
 0x15e   : > { %4039 = vtanh.f32 %v1976_v18  ;;  %v5818_v3 = vpop.f32.mrf.mxu0  ;;  %v1275_v16 = vpop.f32.mrf.mxu1 }
 0x15f   : > { %v1984_v24 = vadd.f32 %v5788_v37, %v1835_v61  ;;  %v1841_v48 = vmax.f32 %v5488_v14, %v1275_v16 }
 0x160   : > { %v5822_v0 = vpop.f32.mrf.mxu0  ;;  %v1277_v53 = vpop.f32.mrf.mxu1 }
 0x161   : > { %4041 = vtanh.f32 %v1984_v24  ;;  %v1842_v6 = vmax.f32 %v5508_v20, %v1277_v53  ;;  %v1990_v11 = vadd.f32 %v5784_v33, %v1841_v48  ;;  %v2280_v20 = vld [vmem:[%s6469_s3 + $0x2f0] sm:$0xff] }
 0x162   : > { %v4030_v2 = vpop.eup %4029  ;;  %4043 = vtanh.f32 %v1983_v51  ;;  %v5826_v18 = vpop.f32.mrf.mxu0  ;;  %v2264_v24 = vld [vmem:[%s6469_s3 + $0x270] sm:$0xff] }
 0x163   : > { %v1281_v25 = vpop.f32.mrf.mxu1  ;;  %v4032_v32 = vpop.eup %4031  ;;  %v1991_v14 = vadd.f32 %v5788_v37, %v1842_v6  ;;  %2406 = vmatprep.mubr.f32.mxu0 %v4030_v2 }
 0x164   : > { %v1848_v61 = vmax.f32 %v5515_v21, %v1281_v25  ;;  %v5836_v51 = vpop.f32.mrf.mxu0  ;;  %2407 = vmatmul.mubr.f32.vlgmr.msra.gmra.mxu0 %v4032_v32  ;;  %v2279_v21 = vld [vmem:[%s6469_s3 + $0x2e8] sm:$0xff] }
 0x165   : > { %v1283_v16 = vpop.f32.mrf.mxu1  ;;  %4045 = vtanh.f32 %v1991_v14  ;;  %3672 = vmatpush3.msra.mxu0 %v2265_v58  ;;  %v2263_v32 = vld [vmem:[%s6469_s3 + $0x268] sm:$0xff] }
 0x166   : > { %v1849_v48 = vmax.f32 %v5535_v28, %v1283_v16  ;;  %v4034_v53 = vpop.eup %4033  ;;  %4047 = vtanh.f32 %v1990_v11  ;;  %v1997_v6 = vadd.f32 %v5784_v33, %v1848_v61  ;;  %v5846_v2 = vpop.f32.mrf.mxu0  ;;  %3673 = vmatprep.subr.mxu0 %v2280_v20  ;;  %v2278_v11 = vld [vmem:[%s6469_s3 + $0x2e0] sm:$0xff] }
 0x167   : > { %v1287_v25 = vpop.f32.mrf.mxu1  ;;  %v4036_v14 = vpop.eup %4035  ;;  %2411 = vmatprep.mubr.f32.mxu0 %v4034_v53  ;;  %3674 = vmatpush3.msra.mxu0 %v2264_v24  ;;  %v2262_v20 = vld [vmem:[%s6469_s3 + $0x260] sm:$0xff]  ;;  %v2277_v24 = vld [vmem:[%s6469_s3 + $0x2d8] sm:$0xff] }
 0x168   : > { %v1998_v28 = vadd.f32 %v5788_v37, %v1849_v48  ;;  %v1855_v58 = vmax.f32 %v5542_v29, %v1287_v25  ;;  %v5856_v61 = vpop.f32.mrf.mxu0  ;;  %2412 = vmatmul.mubr.f32.gmra.mxu0 %v4036_v14  ;;  %3675 = vmatprep.subr.mxu0 %v2279_v21  ;;  %v1937_v29 = vsub.s32 2, %v5760_v36 }
 0x169   : > { %6529 = vst [vmem:[#allocation57_spill] sm:$0xff] %v5856_v61  ;;  %v1289_v16 = vpop.f32.mrf.mxu1  ;;  %3676 = vmatpush3.msra.mxu0 %v2263_v32  ;;  %v2260_v61 = vld [vmem:[%s6469_s3 + $0x250] sm:$0xff] }
 0x16a   : > { %4049 = vtanh.f32 %v1998_v28  ;;  %v1856_v48 = vmax.f32 %v5562_v39, %v1289_v16  ;;  %v4038_v53 = vpop.eup %4037  ;;  %v2004_v25 = vadd.f32 %v5784_v33, %v1855_v58  ;;  %v5867_v14 = vpop.f32.mrf.mxu0  ;;  %3677 = vmatprep.subr.mxu0 %v2278_v11  ;;  %v2261_v28 = vld [vmem:[%s6469_s3 + $0x258] sm:$0xff]  ;;  %v1941_v11 = vsub.s32 3, %v5760_v36 }
 0x16b   : > { %4051 = vtanh.f32 %v1997_v6  ;;  %6530 = vst [vmem:[#allocation58_spill] sm:$0xff] %v5867_v14  ;;  %v1293_v21 = vpop.f32.mrf.mxu1  ;;  %v4040_v39 = vpop.eup %4039  ;;  %2416 = vmatprep.mubr.f32.mxu0 %v4038_v53  ;;  %3678 = vmatpush3.msra.mxu0 %v2262_v20  ;;  %v2276_v6 = vld [vmem:[%s6469_s3 + $0x2d0] sm:$0xff]  ;;  %v5885_v20 = vrot.slane %v5776_v8, %v1937_v29 }
 0x16c   : > { %v2005_v32 = vadd.f32 %v5788_v37, %v1856_v48  ;;  %v1862_v16 = vmax.f32 %v5575_v42, %v1293_v21  ;;  %v5877_v58 = vpop.f32.mrf.mxu0  ;;  %2417 = vmatmul.mubr.f32.gmra.mxu0 %v4040_v39  ;;  %3679 = vmatprep.subr.mxu0 %v2277_v24  ;;  %v2275_v48 = vld [vmem:[%s6469_s3 + $0x2c8] sm:$0xff] }
 0x16d   : > { %6531 = vst [vmem:[#allocation59_spill] sm:$0xff] %v5877_v58  ;;  %v1295_v14 = vpop.f32.mrf.mxu1  ;;  %3680 = vmatpush3.msra.mxu0 %v2261_v28 }
 0x16e   : > { %4053 = vtanh.f32 %v2005_v32  ;;  %v1863_v42 = vmax.f32 %v5589_v44, %v1295_v14  ;;  %v4042_v53 = vpop.eup %4041  ;;  %v2011_v21 = vadd.f32 %v5784_v33, %v1862_v16  ;;  %v1412_v39 = vpop.f32.mrf.mxu0  ;;  %3681 = vmatprep.subr.mxu0 %v2276_v6  ;;  %v2259_v32 = vld [vmem:[%s6469_s3 + $0x248] sm:$0xff]  ;;  %v5901_v6 = vrot.slane %v5776_v8, %v1941_v11 }
 0x16f   : > { %4055 = vtanh.f32 %v2004_v25  ;;  %v1299_v24 = vpop.f32.mrf.mxu1  ;;  %v4044_v44 = vpop.eup %4043  ;;  %v1815_v28 = vmax.f32 %v5382_v46, %v1412_v39  ;;  %2421 = vmatprep.mubr.f32.mxu0 %v4042_v53  ;;  %3682 = vmatpush3.msra.mxu0 %v2260_v61  ;;  %v2274_v25 = vld [vmem:[%s6469_s3 + $0x2c0] sm:$0xff]  ;;  %v2273_v53 = vld [vmem:[%s6469_s3 + $0x2b8] sm:$0xff] }
 0x170   : > { %v2012_v29 = vadd.f32 %v5788_v37, %v1863_v42  ;;  %v1869_v14 = vmax.f32 %v5604_v54, %v1299_v24  ;;  %v1414_v58 = vpop.f32.mrf.mxu0  ;;  %2422 = vmatmul.mubr.f32.gmra.mxu0 %v4044_v44  ;;  %3683 = vmatprep.subr.mxu0 %v2275_v48  ;;  %v2258_v42 = vld [vmem:[%s6469_s3 + $0x240] sm:$0xff]  ;;  %v2257_v44 = vld [vmem:[%s6469_s3 + $0x238] sm:$0xff] }
 0x171   : > { %v1301_v16 = vpop.f32.mrf.mxu1  ;;  %v1964_v54 = vadd.f32 %v5885_v20, %v1815_v28  ;;  %3684 = vmatpush3.msra.mxu0 %v2259_v32  ;;  %v1816_v48 = vmax.f32 %v5399_v52, %v1414_v58  ;;  %v2272_v52 = vld [vmem:[%s6469_s3 + $0x2b0] sm:$0xff] }
 0x172   : > { %4057 = vtanh.f32 %v2012_v29  ;;  %v2018_v46 = vadd.f32 %v5784_v33, %v1869_v14  ;;  %v1870_v61 = vmax.f32 %v5615_v62, %v1301_v16  ;;  %v4046_v11 = vpop.eup %4045  ;;  %v1418_v39 = vpop.f32.mrf.mxu0  ;;  %3685 = vmatprep.subr.mxu0 %v2274_v25  ;;  %v2256_v25 = vld [vmem:[%s6469_s3 + $0x230] sm:$0xff] }
 0x173   : > { %4059 = vtanh.f32 %v2011_v21  ;;  %v1305_v24 = vpop.f32.mrf.mxu1  ;;  %v4048_v29 = vpop.eup %4047  ;;  %v1822_v14 = vmax.f32 %v5409_v55, %v1418_v39  ;;  %2426 = vmatprep.mubr.f32.mxu0 %v4046_v11  ;;  %3686 = vmatpush3.msra.mxu0 %v2258_v42  ;;  %v1965_v58 = vadd.f32 %v5901_v6, %v1816_v48  ;;  %v2271_v42 = vld [vmem:[%s6469_s3 + $0x2a8] sm:$0xff] }
 0x174   : > { %4061 = vtanh.f32 %v2018_v46  ;;  %v2019_v62 = vadd.f32 %v5788_v37, %v1870_v61  ;;  %v1876_v32 = vmax.f32 %v5625_v5, %v1305_v24  ;;  %v1420_v28 = vpop.f32.mrf.mxu0  ;;  %2427 = vmatmul.mubr.f32.gmra.mxu0 %v4048_v29  ;;  %3687 = vmatprep.subr.mxu0 %v2273_v53  ;;  %v2255_v11 = vld [vmem:[%s6469_s3 + $0x228] sm:$0xff] }
 0x175   : > { %4063 = vtanh.f32 %v1964_v54  ;;  %v1307_v21 = vpop.f32.mrf.mxu1  ;;  %v1971_v5 = vadd.f32 %v5885_v20, %v1822_v14  ;;  %3688 = vmatpush3.msra.mxu0 %v2257_v44  ;;  %v1823_v54 = vmax.f32 %v5426_v60, %v1420_v28  ;;  %v2270_v60 = vld [vmem:[%s6469_s3 + $0x2a0] sm:$0xff] }
 0x176   : > { %4065 = vtanh.f32 %v2019_v62  ;;  %v2025_v55 = vadd.f32 %v5784_v33, %v1876_v32  ;;  %v1877_v16 = vmax.f32 %v5635_v13, %v1307_v21  ;;  %v1424_v53 = vpop.f32.mrf.mxu0  ;;  %3689 = vmatprep.subr.mxu0 %v2272_v52  ;;  %v2254_v32 = vld [vmem:[%s6469_s3 + $0x220] sm:$0xff]  ;;  %v2269_v52 = vld [vmem:[%s6469_s3 + $0x298] sm:$0xff] }
 0x177   : > { %v4050_v46 = vpop.eup %4049  ;;  %4067 = vtanh.f32 %v1965_v58  ;;  %v1311_v61 = vpop.f32.mrf.mxu1  ;;  %v1829_v39 = vmax.f32 %v5436_v63, %v1424_v53  ;;  %3690 = vmatpush3.msra.mxu0 %v2256_v25  ;;  %v1972_v44 = vadd.f32 %v5901_v6, %v1823_v54  ;;  %v2252_v53 = vld [vmem:[%s6469_s3 + $0x210] sm:$0xff] }
 0x178   : > { %v4052_v48 = vpop.eup %4051  ;;  %4069 = vtanh.f32 %v2025_v55  ;;  %v2026_v13 = vadd.f32 %v5788_v37, %v1877_v16  ;;  %v1883_v24 = vmax.f32 %v5645_v19, %v1311_v61  ;;  %2431 = vmatprep.mubr.f32.mxu0 %v4050_v46  ;;  %v1426_v62 = vpop.f32.mrf.mxu0  ;;  %3691 = vmatprep.subr.mxu0 %v2271_v42  ;;  %v2253_v55 = vld [vmem:[%s6469_s3 + $0x218] sm:$0xff] }
 0x179   : > { %4071 = vtanh.f32 %v1971_v5  ;;  %v1313_v29 = vpop.f32.mrf.mxu1  ;;  %2432 = vmatmul.mubr.f32.gmra.mxu0 %v4052_v48  ;;  %v1978_v19 = vadd.f32 %v5885_v20, %v1829_v39  ;;  %v1830_v21 = vmax.f32 %v5453_v4, %v1426_v62  ;;  %v2268_v4 = vld [vmem:[%s6469_s3 + $0x290] sm:$0xff]  ;;  %v2267_v48 = vld [vmem:[%s6469_s3 + $0x288] sm:$0xff] }
 0x17a   : > { %4073 = vtanh.f32 %v2026_v13  ;;  %v2032_v63 = vadd.f32 %v5784_v33, %v1883_v24  ;;  %v1884_v14 = vmax.f32 %v5655_v27, %v1313_v29  ;;  %3692 = vmatpush3.msra.mxu0 %v2255_v11  ;;  %v1430_v25 = vpop.f32.mrf.mxu0 }
 0x17b   : > { %v4054_v58 = vpop.eup %4053  ;;  %4075 = vtanh.f32 %v1972_v44  ;;  %v1317_v28 = vpop.f32.mrf.mxu1  ;;  %3693 = vmatprep.subr.mxu0 %v2270_v60  ;;  %v1836_v42 = vmax.f32 %v5463_v7, %v1430_v25  ;;  %v1979_v46 = vadd.f32 %v5901_v6, %v1830_v21  ;;  %v2251_v44 = vld [vmem:[%s6469_s3 + $0x208] sm:$0xff] }
 0x17c   : > { %v4056_v5 = vpop.eup %4055  ;;  %4077 = vtanh.f32 %v2032_v63  ;;  %v2033_v27 = vadd.f32 %v5788_v37, %v1884_v14  ;;  %v1890_v16 = vmax.f32 %v5665_v35, %v1317_v28  ;;  %2436 = vmatprep.mubr.f32.mxu0 %v4054_v58  ;;  %3694 = vmatpush3.msra.mxu0 %v2254_v32  ;;  %v1432_v61 = vpop.f32.mrf.mxu0 }
 0x17d   : > { %4079 = vtanh.f32 %v1978_v19  ;;  %v1319_v54 = vpop.f32.mrf.mxu1  ;;  %2437 = vmatmul.mubr.f32.gmra.mxu0 %v4056_v5  ;;  %3695 = vmatprep.subr.mxu0 %v2269_v52  ;;  %v1985_v35 = vadd.f32 %v5885_v20, %v1836_v42  ;;  %v1837_v24 = vmax.f32 %v5480_v12, %v1432_v61  ;;  %v2266_v12 = vld [vmem:[%s6469_s3 + $0x280] sm:$0xff] }
 0x17e   : > { %4081 = vtanh.f32 %v2033_v27  ;;  %v2039_v7 = vadd.f32 %v5784_v33, %v1890_v16  ;;  %v1891_v11 = vmax.f32 %v5672_v49, %v1319_v54  ;;  %3696 = vmatpush3.msra.mxu0 %v2253_v55  ;;  %v1436_v60 = vpop.f32.mrf.mxu0 }
 0x17f   : > { %v4058_v13 = vpop.eup %4057  ;;  %4083 = vtanh.f32 %v1979_v46  ;;  %v1323_v39 = vpop.f32.mrf.mxu1  ;;  %3697 = vmatprep.subr.mxu0 %v2268_v4  ;;  %v1843_v32 = vmax.f32 %v5490_v15, %v1436_v60  ;;  %v1986_v19 = vadd.f32 %v5901_v6, %v1837_v24 }
 0x180   : > { %v4060_v29 = vpop.eup %4059  ;;  %4085 = vtanh.f32 %v2039_v7  ;;  %v2040_v49 = vadd.f32 %v5788_v37, %v1891_v11  ;;  %v1897_v62 = vmax.f32 %v5676_v50, %v1323_v39  ;;  %2441 = vmatprep.mubr.f32.mxu0 %v4058_v13  ;;  %3698 = vmatpush3.msra.mxu0 %v2252_v53  ;;  %v1438_v52 = vpop.f32.mrf.mxu0  ;;  %v2250_v50 = vld [vmem:[%s6469_s3 + $0x200] sm:$0xff]  ;;  %v2284_v53 = vld [vmem:[%s6469_s3 + $0x310] sm:$0xff] }
 0x181   : > { %v4062_v63 = vpop.eup %4061  ;;  %4087 = vtanh.f32 %v1985_v35  ;;  %v1325_v14 = vpop.f32.mrf.mxu1  ;;  %2442 = vmatmul.mubr.f32.gmra.mxu0 %v4060_v29  ;;  %3699 = vmatprep.subr.mxu0 %v2267_v48  ;;  %v1992_v21 = vadd.f32 %v5885_v20, %v1843_v32  ;;  %v1844_v55 = vmax.f32 %v5510_v22, %v1438_v52  ;;  %v2283_v32 = vld [vmem:[%s6469_s3 + $0x308] sm:$0xff] }
 0x182   : > { %v4064_v58 = vpop.eup %4063  ;;  %4089 = vtanh.f32 %v2040_v49  ;;  %v2046_v15 = vadd.f32 %v5784_v33, %v1897_v62  ;;  %v1898_v28 = vmax.f32 %v5680_v57, %v1325_v14  ;;  %3700 = vmatpush3.msra.mxu0 %v2251_v44  ;;  %v1442_v27 = vpop.f32.mrf.mxu0 }
 0x183   : > { %v4066_v25 = vpop.eup %4065  ;;  %4091 = vtanh.f32 %v1986_v19  ;;  %v1329_v5 = vpop.f32.mrf.mxu1  ;;  %3701 = vmatprep.subr.mxu0 %v2266_v12  ;;  %v1850_v46 = vmax.f32 %v5517_v23, %v1442_v27  ;;  %v1993_v57 = vadd.f32 %v5901_v6, %v1844_v55  ;;  %v1949_v27 = vsub.s32 5, %v5760_v36 }
 0x184   : > { %v4068_v16 = vpop.eup %4067  ;;  %4093 = vtanh.f32 %v2046_v15  ;;  %v2047_v42 = vadd.f32 %v5788_v37, %v1898_v28  ;;  %v1904_v4 = vmax.f32 %v5684_v1, %v1329_v5  ;;  %2446 = vmatprep.mubr.f32.mxu0 %v4066_v25  ;;  %3702 = vmatpush3.msra.mxu0 %v2250_v50  ;;  %v1444_v22 = vpop.f32.mrf.mxu0 }
 0x185   : > { %v4070_v54 = vpop.eup %4069  ;;  %4095 = vtanh.f32 %v1992_v21  ;;  %2551 = vmatprep.mubr.f32.mxu1 %v4068_v16  ;;  %v1331_v61 = vpop.f32.mrf.mxu1  ;;  %2447 = vmatmul.mubr.f32.gmra.mxu0 %v4062_v63  ;;  %v1999_v23 = vadd.f32 %v5885_v20, %v1850_v46  ;;  %v1851_v48 = vmax.f32 %v5537_v30, %v1444_v22 }
 0x186   : > { %v4072_v7 = vpop.eup %4071  ;;  %4097 = vtanh.f32 %v2047_v42  ;;  %v2053_v1 = vadd.f32 %v5784_v33, %v1904_v4  ;;  %v1905_v35 = vmax.f32 %v5688_v9, %v1331_v61  ;;  %2552 = vmatmul.mubr.f32.vlgmr.msra.gmra.mxu1 %v4064_v58  ;;  %v1448_v24 = vpop.f32.mrf.mxu0 }
 0x187   : > { %v4074_v11 = vpop.eup %4073  ;;  %4099 = vtanh.f32 %v1993_v57  ;;  %v1335_v13 = vpop.f32.mrf.mxu1  ;;  %3900 = vmatpush3.msra.mxu1 %v5602_v38  ;;  %v1857_v29 = vmax.f32 %v5544_v31, %v1448_v24  ;;  %v2000_v49 = vadd.f32 %v5901_v6, %v1851_v48  ;;  %v1945_v38 = vsub.s32 4, %v5760_v36 }
 0x188   : > { %v4076_v39 = vpop.eup %4075  ;;  %4101 = vtanh.f32 %v2053_v1  ;;  %v2054_v60 = vadd.f32 %v5788_v37, %v1905_v35  ;;  %v1911_v44 = vmax.f32 %v5692_v17, %v1335_v13  ;;  %2451 = vmatprep.mubr.f32.mxu0 %v4074_v11  ;;  %3901 = vmatprep.subr.mxu1 %v2284_v53  ;;  %v1450_v62 = vpop.f32.mrf.mxu0  ;;  %v6533_v1 = vld [vmem:[#allocation6_spill] sm:$0xff]  ;;  %v6034_v24 = vrot.slane %v5776_v8, %v1949_v27 }
 0x189   : > { %v4078_v9 = vpop.eup %4077  ;;  %4103 = vtanh.f32 %v1999_v23  ;;  %2556 = vmatprep.mubr.f32.mxu1 %v4076_v39  ;;  %v1337_v30 = vpop.f32.mrf.mxu1  ;;  %2452 = vmatmul.mubr.f32.gmra.mxu0 %v4070_v54  ;;  %v2006_v17 = vadd.f32 %v5885_v20, %v1857_v29  ;;  %v1858_v14 = vmax.f32 %v5564_v40, %v1450_v62  ;;  %v6019_v5 = vrot.slane %v5776_v8, %v1945_v38  ;;  %v6532_v54 = vld [vmem:[#allocation5_spill] sm:$0xff]  ;;  %v6534_v35 = vld [vmem:[#allocation22_spill] sm:$0xff] }
 0x18a   : > { %v4080_v12 = vpop.eup %4079  ;;  %4105 = vtanh.f32 %v2054_v60  ;;  %v2060_v31 = vadd.f32 %v5784_v33, %v1911_v44  ;;  %v1912_v63 = vmax.f32 %v5696_v26, %v1337_v30  ;;  %2557 = vmatmul.mubr.f32.gmra.mxu1 %v4072_v7  ;;  %v1454_v50 = vpop.f32.mrf.mxu0  ;;  %v6535_v44 = vld [vmem:[#allocation7_spill] sm:$0xff] }
 0x18b   : > { %v4082_v19 = vpop.eup %4081  ;;  %4107 = vtanh.f32 %v2000_v49  ;;  %v1341_v52 = vpop.f32.mrf.mxu1  ;;  %3902 = vmatpush3.msra.mxu1 %v2284_v53  ;;  %v1864_v28 = vmax.f32 %v5577_v43, %v1454_v50  ;;  %v2007_v26 = vadd.f32 %v5901_v6, %v1858_v14  ;;  %v6536_v49 = vld [vmem:[#allocation24_spill] sm:$0xff] }
 0x18c   : > { %v4084_v58 = vpop.eup %4083  ;;  %4109 = vtanh.f32 %v2060_v31  ;;  %v2061_v15 = vadd.f32 %v5788_v37, %v1912_v63  ;;  %v1918_v21 = vmax.f32 %v5700_v34, %v1341_v52  ;;  %2456 = vmatprep.mubr.f32.mxu0 %v4082_v19  ;;  %3903 = vmatprep.subr.mxu1 %v2283_v32  ;;  %v1456_v40 = vpop.f32.mrf.mxu0  ;;  %v2282_v34 = vld [vmem:[%s6469_s3 + $0x300] sm:$0xff] }
 0x18d   : > { %v4086_v25 = vpop.eup %4085  ;;  %4111 = vtanh.f32 %v2006_v17  ;;  %2561 = vmatprep.mubr.f32.mxu1 %v4084_v58  ;;  %v1343_v55 = vpop.f32.mrf.mxu1  ;;  %2457 = vmatmul.mubr.f32.gmra.mxu0 %v4078_v9  ;;  %v2013_v42 = vadd.f32 %v5885_v20, %v1864_v28  ;;  %v1865_v57 = vmax.f32 %v6532_v54, %v1456_v40  ;;  %v6538_v17 = vld [vmem:[#allocation26_spill] sm:$0xff]  ;;  %v6539_v28 = vld [vmem:[#allocation9_spill] sm:$0xff] }
 0x18e   : > { %v4088_v43 = vpop.eup %4087  ;;  %4113 = vtanh.f32 %v2061_v15  ;;  %v2067_v16 = vadd.f32 %v5784_v33, %v1918_v21  ;;  %v1919_v4 = vmax.f32 %v5704_v41, %v1343_v55  ;;  %2562 = vmatmul.mubr.f32.gmra.mxu1 %v4080_v12  ;;  %v1460_v61 = vpop.f32.mrf.mxu0  ;;  %v6537_v12 = vld [vmem:[#allocation8_spill] sm:$0xff] }
 0x18f   : > { %v4090_v46 = vpop.eup %4089  ;;  %4115 = vtanh.f32 %v2007_v26  ;;  %v1573_v22 = vpop.f32.mrf.mxu1  ;;  %3904 = vmatpush3.msra.mxu1 %v2283_v32  ;;  %v1871_v23 = vmax.f32 %v6533_v1, %v1460_v61  ;;  %v2014_v41 = vadd.f32 %v5901_v6, %v1865_v57  ;;  %v6540_v55 = vld [vmem:[#allocation28_spill] sm:$0xff] }
 0x190   : > { %v4092_v53 = vpop.eup %4091  ;;  %4117 = vtanh.f32 %v2067_v16  ;;  %v2068_v7 = vadd.f32 %v5788_v37, %v1919_v4  ;;  %v1817_v33 = vmax.f32 %v6534_v35, %v1573_v22  ;;  %2461 = vmatprep.mubr.f32.mxu0 %v4090_v46  ;;  %3905 = vmatprep.subr.mxu1 %v2282_v34  ;;  %v1462_v48 = vpop.f32.mrf.mxu0  ;;  %v6542_v46 = vld [vmem:[#allocation30_spill] sm:$0xff]  ;;  %v6543_v35 = vld [vmem:[#allocation11_spill] sm:$0xff] }
 0x191   : > { %v4094_v11 = vpop.eup %4093  ;;  %4119 = vtanh.f32 %v2013_v42  ;;  %2566 = vmatprep.mubr.f32.mxu1 %v4092_v53  ;;  %v1575_v13 = vpop.f32.mrf.mxu1  ;;  %2462 = vmatmul.mubr.f32.gmra.mxu0 %v4086_v25  ;;  %v2020_v37 = vadd.f32 %v5885_v20, %v1871_v23  ;;  %v1872_v29 = vmax.f32 %v6535_v44, %v1462_v48  ;;  %v6541_v42 = vld [vmem:[#allocation10_spill] sm:$0xff]  ;;  %v6545_v44 = vld [vmem:[#allocation12_spill] sm:$0xff] }
 0x192   : > { %v4096_v39 = vpop.eup %4095  ;;  %4121 = vtanh.f32 %v2068_v7  ;;  %v1966_v60 = vadd.f32 %v6019_v5, %v1817_v33  ;;  %2567 = vmatmul.mubr.f32.gmra.mxu1 %v4088_v43  ;;  %v1818_v30 = vmax.f32 %v6536_v49, %v1575_v13  ;;  %v1466_v62 = vpop.f32.mrf.mxu0 }
 0x193   : > { %v4098_v9 = vpop.eup %4097  ;;  %4123 = vtanh.f32 %v2014_v41  ;;  %v1579_v38 = vpop.f32.mrf.mxu1  ;;  %3906 = vmatpush3.msra.mxu1 %v2282_v34  ;;  %v2021_v8 = vadd.f32 %v5901_v6, %v1872_v29  ;;  %v1878_v31 = vmax.f32 %v6537_v12, %v1466_v62  ;;  %v6544_v41 = vld [vmem:[#allocation32_spill] sm:$0xff] }
 0x194   : > { %v4100_v32 = vpop.eup %4099  ;;  %4125 = vtanh.f32 %v2020_v37  ;;  %v1824_v63 = vmax.f32 %v6538_v17, %v1579_v38  ;;  %2466 = vmatprep.mubr.f32.mxu0 %v4098_v9  ;;  %v1967_v14 = vadd.f32 %v6034_v24, %v1818_v30  ;;  %v1468_v52 = vpop.f32.mrf.mxu0  ;;  %v6546_v9 = vld [vmem:[#allocation34_spill] sm:$0xff]  ;;  %v6547_v17 = vld [vmem:[#allocation13_spill] sm:$0xff] }
 0x195   : > { %v4102_v19 = vpop.eup %4101  ;;  %4127 = vtanh.f32 %v1966_v60  ;;  %2571 = vmatprep.mubr.f32.mxu1 %v4100_v32  ;;  %v1581_v50 = vpop.f32.mrf.mxu1  ;;  %2467 = vmatmul.mubr.f32.gmra.mxu0 %v4094_v11  ;;  %v2027_v15 = vadd.f32 %v5885_v20, %v1878_v31  ;;  %v1879_v25 = vmax.f32 %v6539_v28, %v1468_v52  ;;  %v6549_v28 = vld [vmem:[#allocation14_spill] sm:$0xff] }
 0x196   : > { %v4104_v58 = vpop.eup %4103  ;;  %4129 = vtanh.f32 %v2021_v8  ;;  %v1973_v21 = vadd.f32 %v6019_v5, %v1824_v63  ;;  %2572 = vmatmul.mubr.f32.gmra.mxu1 %v4096_v39  ;;  %v1825_v40 = vmax.f32 %v6540_v55, %v1581_v50  ;;  %v1472_v27 = vpop.f32.mrf.mxu0 }
 0x197   : > { %v4106_v26 = vpop.eup %4105  ;;  %4131 = vtanh.f32 %v1967_v14  ;;  %v1585_v34 = vpop.f32.mrf.mxu1  ;;  %v2028_v16 = vadd.f32 %v5901_v6, %v1879_v25  ;;  %v1885_v4 = vmax.f32 %v6541_v42, %v1472_v27  ;;  %v6548_v14 = vld [vmem:[#allocation36_spill] sm:$0xff] }
 0x198   : > { %v4108_v43 = vpop.eup %4107  ;;  %4133 = vtanh.f32 %v2027_v15  ;;  %v1831_v54 = vmax.f32 %v6542_v46, %v1585_v34  ;;  %2471 = vmatprep.mubr.f32.mxu0 %v4106_v26  ;;  %v1974_v61 = vadd.f32 %v6034_v24, %v1825_v40  ;;  %v1474_v22 = vpop.f32.mrf.mxu0  ;;  %v6550_v26 = vld [vmem:[#allocation38_spill] sm:$0xff]  ;;  %v6551_v46 = vld [vmem:[#allocation15_spill] sm:$0xff] }
 0x199   : > { %v4110_v57 = vpop.eup %4109  ;;  %4135 = vtanh.f32 %v1973_v21  ;;  %2576 = vmatprep.mubr.f32.mxu1 %v4108_v43  ;;  %v1587_v53 = vpop.f32.mrf.mxu1  ;;  %2472 = vmatmul.mubr.f32.gmra.mxu0 %v4102_v19  ;;  %v2034_v1 = vadd.f32 %v5885_v20, %v1885_v4  ;;  %v1886_v33 = vmax.f32 %v6543_v35, %v1474_v22  ;;  %v6553_v35 = vld [vmem:[#allocation16_spill] sm:$0xff] }
 0x19a   : > { %v4112_v7 = vpop.eup %4111  ;;  %4137 = vtanh.f32 %v2028_v16  ;;  %v1980_v23 = vadd.f32 %v6019_v5, %v1831_v54  ;;  %2577 = vmatmul.mubr.f32.gmra.mxu1 %v4104_v58  ;;  %v1832_v48 = vmax.f32 %v6544_v41, %v1587_v53  ;;  %v1478_v13 = vpop.f32.mrf.mxu0 }
 0x19b   : > { %v4114_v11 = vpop.eup %4113  ;;  %4139 = vtanh.f32 %v1974_v61  ;;  %v1591_v39 = vpop.f32.mrf.mxu1  ;;  %v2035_v60 = vadd.f32 %v5901_v6, %v1886_v33  ;;  %v1892_v29 = vmax.f32 %v6545_v44, %v1478_v13  ;;  %v6552_v61 = vld [vmem:[#allocation40_spill] sm:$0xff] }
 0x19c   : > { %v4116_v37 = vpop.eup %4115  ;;  %4141 = vtanh.f32 %v2034_v1  ;;  %v1838_v49 = vmax.f32 %v6546_v9, %v1591_v39  ;;  %2476 = vmatprep.mubr.f32.mxu0 %v4114_v11  ;;  %v1981_v62 = vadd.f32 %v6034_v24, %v1832_v48  ;;  %v1480_v38 = vpop.f32.mrf.mxu0  ;;  %v6554_v11 = vld [vmem:[#allocation42_spill] sm:$0xff]  ;;  %v6555_v9 = vld [vmem:[#allocation17_spill] sm:$0xff] }
 0x19d   : > { %v4118_v30 = vpop.eup %4117  ;;  %4143 = vtanh.f32 %v1980_v23  ;;  %2581 = vmatprep.mubr.f32.mxu1 %v4116_v37  ;;  %v1593_v32 = vpop.f32.mrf.mxu1  ;;  %2477 = vmatmul.mubr.f32.gmra.mxu0 %v4110_v57  ;;  %v2041_v12 = vadd.f32 %v5885_v20, %v1892_v29  ;;  %v1893_v63 = vmax.f32 %v6547_v17, %v1480_v38  ;;  %v6557_v17 = vld [vmem:[#allocation18_spill] sm:$0xff] }
 0x19e   : > { %v4120_v8 = vpop.eup %4119  ;;  %4145 = vtanh.f32 %v2035_v60  ;;  %v1987_v31 = vadd.f32 %v6019_v5, %v1838_v49  ;;  %2582 = vmatmul.mubr.f32.gmra.mxu1 %v4112_v7  ;;  %v1839_v52 = vmax.f32 %v6548_v14, %v1593_v32  ;;  %v1484_v50 = vpop.f32.mrf.mxu0 }
 0x19f   : > { %v4122_v19 = vpop.eup %4121  ;;  %4147 = vtanh.f32 %v1981_v62  ;;  %v1597_v58 = vpop.f32.mrf.mxu1  ;;  %v2042_v21 = vadd.f32 %v5901_v6, %v1893_v63  ;;  %v1899_v25 = vmax.f32 %v6549_v28, %v1484_v50  ;;  %v6556_v62 = vld [vmem:[#allocation44_spill] sm:$0xff] }
 0x1a0   : > { %v4124_v15 = vpop.eup %4123  ;;  %4149 = vtanh.f32 %v2041_v12  ;;  %v1845_v55 = vmax.f32 %v6550_v26, %v1597_v58  ;;  %2481 = vmatprep.mubr.f32.mxu0 %v4122_v19  ;;  %v1988_v27 = vadd.f32 %v6034_v24, %v1839_v52  ;;  %v1486_v34 = vpop.f32.mrf.mxu0  ;;  %v6558_v19 = vld [vmem:[#allocation46_spill] sm:$0xff] }
 0x1a1   : > { %v4126_v40 = vpop.eup %4125  ;;  %4151 = vtanh.f32 %v1987_v31  ;;  %2586 = vmatprep.mubr.f32.mxu1 %v4124_v15  ;;  %v1599_v43 = vpop.f32.mrf.mxu1  ;;  %2482 = vmatmul.mubr.f32.gmra.mxu0 %v4118_v30  ;;  %v2048_v42 = vadd.f32 %v5885_v20, %v1899_v25  ;;  %v1900_v54 = vmax.f32 %v6551_v46, %v1486_v34  ;;  %v6560_v34 = vld [vmem:[#allocation48_spill] sm:$0xff] }
 0x1a2   : > { %v4128_v16 = vpop.eup %4127  ;;  %4153 = vtanh.f32 %v2042_v21  ;;  %v1994_v4 = vadd.f32 %v6019_v5, %v1845_v55  ;;  %2587 = vmatmul.mubr.f32.gmra.mxu1 %v4120_v8  ;;  %v1846_v22 = vmax.f32 %v6552_v61, %v1599_v43  ;;  %v1490_v53 = vpop.f32.mrf.mxu0  ;;  %v1953_v21 = vsub.s32 6, %v5760_v36  ;;  %v6559_v55 = vld [vmem:[#allocation19_spill] sm:$0xff]  ;;  %v6561_v46 = vld [vmem:[#allocation20_spill] sm:$0xff] }
 0x1a3   : > { %v4130_v57 = vpop.eup %4129  ;;  %4155 = vtanh.f32 %v1988_v27  ;;  %v1603_v7 = vpop.f32.mrf.mxu1  ;;  %v2049_v23 = vadd.f32 %v5901_v6, %v1900_v54  ;;  %v1906_v33 = vmax.f32 %v6553_v35, %v1490_v53 }
 0x1a4   : > { %v4132_v1 = vpop.eup %4131  ;;  %4157 = vtanh.f32 %v2048_v42  ;;  %v1852_v41 = vmax.f32 %v6554_v11, %v1603_v7  ;;  %2591 = vmatprep.mubr.f32.mxu1 %v4130_v57  ;;  %v1995_v13 = vadd.f32 %v6034_v24, %v1846_v22  ;;  %v1492_v39 = vpop.f32.mrf.mxu0  ;;  %v6562_v57 = vld [vmem:[#allocation50_spill] sm:$0xff] }
 0x1a5   : > { %v4134_v48 = vpop.eup %4133  ;;  %4159 = vtanh.f32 %v1994_v4  ;;  %2696 = vmatprep.mubr.f32.mxu0 %v4132_v1  ;;  %v1605_v37 = vpop.f32.mrf.mxu1  ;;  %v2055_v44 = vadd.f32 %v5885_v20, %v1906_v33  ;;  %v1907_v49 = vmax.f32 %v6555_v9, %v1492_v39 }
 0x1a6   : > { %v4136_v60 = vpop.eup %4135  ;;  %4161 = vtanh.f32 %v2049_v23  ;;  %v2001_v29 = vadd.f32 %v6019_v5, %v1852_v41  ;;  %2592 = vmatmul.mubr.f32.gmra.mxu1 %v4126_v40  ;;  %2697 = vmatmul.mubr.f32.vlgmr.msra.gmra.mxu0 %v4128_v16  ;;  %v1853_v38 = vmax.f32 %v6556_v62, %v1605_v37  ;;  %v1496_v32 = vpop.f32.mrf.mxu0  ;;  %v4285_v23 = vld [vmem:[%s6468_s2] sm:$0x7f]  ;;  %v6564_v37 = vld [vmem:[#allocation52_spill] sm:$0xff] }
 0x1a7   : > { %v4138_v30 = vpop.eup %4137  ;;  %4163 = vtanh.f32 %v1995_v13  ;;  %v1609_v8 = vpop.f32.mrf.mxu1  ;;  %v2056_v31 = vadd.f32 %v5901_v6, %v1907_v49  ;;  %v1913_v63 = vmax.f32 %v6557_v17, %v1496_v32  ;;  %v6096_v35 = vrot.slane %v4285_v23, %v1953_v21 }
 0x1a8   : > { %v4140_v12 = vpop.eup %4139  ;;  %4165 = vtanh.f32 %v2055_v44  ;;  %v1859_v14 = vmax.f32 %v6558_v19, %v1609_v8  ;;  %2596 = vmatprep.mubr.f32.mxu1 %v4138_v30  ;;  %v2002_v50 = vadd.f32 %v6034_v24, %v1853_v38  ;;  %v1498_v58 = vpop.f32.mrf.mxu0  ;;  %v6565_v30 = vld [vmem:[#allocation54_spill] sm:$0xff]  ;;  %v6566_v38 = vld [vmem:[#allocation23_spill] sm:$0xff] }
 0x1a9   : > { %v4142_v52 = vpop.eup %4141  ;;  %4167 = vtanh.f32 %v2001_v29  ;;  %2701 = vmatprep.mubr.f32.mxu0 %v4140_v12  ;;  %v1611_v15 = vpop.f32.mrf.mxu1  ;;  %v2062_v25 = vadd.f32 %v5885_v20, %v1913_v63  ;;  %v1914_v40 = vmax.f32 %v6559_v55, %v1498_v58 }
 0x1aa   : > { %v4144_v28 = vpop.eup %4143  ;;  %4169 = vtanh.f32 %v2056_v31  ;;  %v2008_v26 = vadd.f32 %v6019_v5, %v1859_v14  ;;  %2597 = vmatmul.mubr.f32.gmra.mxu1 %v4134_v48  ;;  %2702 = vmatmul.mubr.f32.gmra.mxu0 %v4136_v60  ;;  %v1860_v43 = vmax.f32 %v6560_v34, %v1611_v15  ;;  %v1502_v16 = vpop.f32.mrf.mxu0  ;;  %v6563_v48 = vld [vmem:[#allocation21_spill] sm:$0xff]  ;;  %v6567_v14 = vld [vmem:[#allocation55_spill] sm:$0xff] }
 0x1ab   : > { %v4146_v27 = vpop.eup %4145  ;;  %4171 = vtanh.f32 %v2002_v50  ;;  %v1615_v42 = vpop.f32.mrf.mxu1  ;;  %v2063_v36 = vadd.f32 %v5901_v6, %v1914_v40  ;;  %v1920_v54 = vmax.f32 %v6561_v46, %v1502_v16  ;;  %v6568_v50 = vld [vmem:[#allocation25_spill] sm:$0xff]  ;;  %v6570_v40 = vld [vmem:[#allocation27_spill] sm:$0xff] }
 0x1ac   : > { %v4148_v4 = vpop.eup %4147  ;;  %4173 = vtanh.f32 %v2062_v25  ;;  %v1866_v61 = vmax.f32 %v6562_v57, %v1615_v42  ;;  %2601 = vmatprep.mubr.f32.mxu1 %v4146_v27  ;;  %v2009_v53 = vadd.f32 %v6034_v24, %v1860_v43  ;;  %v1504_v7 = vpop.f32.mrf.mxu0 }
 0x1ad   : > { %v4150_v22 = vpop.eup %4149  ;;  %4175 = vtanh.f32 %v2008_v26  ;;  %2706 = vmatprep.mubr.f32.mxu0 %v4148_v4  ;;  %v1617_v1 = vpop.f32.mrf.mxu1  ;;  %v2069_v11 = vadd.f32 %v5885_v20, %v1920_v54  ;;  %v1921_v13 = vmax.f32 %v6563_v48, %v1504_v7  ;;  %v6569_v26 = vld [vmem:[#allocation56_spill] sm:$0xff] }
 0x1ae   : > { %v4152_v33 = vpop.eup %4151  ;;  %4177 = vtanh.f32 %v2063_v36  ;;  %v2015_v41 = vadd.f32 %v6019_v5, %v1866_v61  ;;  %2602 = vmatmul.mubr.f32.gmra.mxu1 %v4142_v52  ;;  %2707 = vmatmul.mubr.f32.gmra.mxu0 %v4144_v28  ;;  %v1867_v60 = vmax.f32 %v6564_v37, %v1617_v1  ;;  %v3877_v29 = vpop.f32.mrf.mxu0  ;;  %v6571_v61 = vld [vmem:[#allocation29_spill] sm:$0xff] }
 0x1af   : > { %v4154_v39 = vpop.eup %4153  ;;  %4179 = vtanh.f32 %v2009_v53  ;;  %v1621_v44 = vpop.f32.mrf.mxu1  ;;  %v2070_v49 = vadd.f32 %v5901_v6, %v1921_v13  ;;  %v1826_v20 = vmax.f32 %v6566_v38, %v3877_v29 }
 0x1b0   : > { %v4156_v9 = vpop.eup %4155  ;;  %4181 = vtanh.f32 %v2069_v11  ;;  %v1873_v62 = vmax.f32 %v6565_v30, %v1621_v44  ;;  %2606 = vmatprep.mubr.f32.mxu1 %v4154_v39  ;;  %v2016_v8 = vadd.f32 %v6034_v24, %v1867_v60  ;;  %v1734_v31 = vpop.f32.mrf.mxu0  ;;  %v6572_v11 = vld [vmem:[#allocation31_spill] sm:$0xff] }
 0x1b1   : > { %v4158_v32 = vpop.eup %4157  ;;  %4183 = vtanh.f32 %v2015_v41  ;;  %2711 = vmatprep.mubr.f32.mxu0 %v4156_v9  ;;  %v1623_v12 = vpop.f32.mrf.mxu1  ;;  %v1975_v19 = vadd.f32 %v6096_v35, %v1826_v20  ;;  %v1819_v58 = vmax.f32 %v6568_v50, %v1734_v31  ;;  %v6573_v9 = vld [vmem:[#allocation33_spill] sm:$0xff] }
 0x1b2   : > { %v4160_v17 = vpop.eup %4159  ;;  %4185 = vtanh.f32 %v2070_v49  ;;  %v2022_v63 = vadd.f32 %v6019_v5, %v1873_v62  ;;  %v1874_v6 = vmax.f32 %v6567_v14, %v1623_v12  ;;  %2607 = vmatmul.mubr.f32.gmra.mxu1 %v4150_v22  ;;  %2712 = vmatmul.mubr.f32.gmra.mxu0 %v4152_v33  ;;  %v3880_v21 = vpop.f32.mrf.mxu0  ;;  %v6575_v50 = vld [vmem:[#allocation37_spill] sm:$0xff] }
 0x1b3   : > { %v4162_v52 = vpop.eup %4161  ;;  %4187 = vtanh.f32 %v2016_v8  ;;  %v1627_v15 = vpop.f32.mrf.mxu1  ;;  %v1840_v27 = vmax.f32 %v6570_v40, %v3880_v21  ;;  %v1968_v43 = vadd.f32 %v6096_v35, %v1819_v58  ;;  %v6574_v8 = vld [vmem:[#allocation35_spill] sm:$0xff] }
 0x1b4   : > { %v4164_v28 = vpop.eup %4163  ;;  %4189 = vtanh.f32 %v2022_v63  ;;  %v2023_v25 = vadd.f32 %v6034_v24, %v1874_v6  ;;  %v1880_v55 = vmax.f32 %v6569_v26, %v1627_v15  ;;  %2611 = vmatprep.mubr.f32.mxu1 %v4162_v52  ;;  %v1744_v42 = vpop.f32.mrf.mxu0 }
 0x1b5   : > { %v4166_v34 = vpop.eup %4165  ;;  %4191 = vtanh.f32 %v1975_v19  ;;  %2716 = vmatprep.mubr.f32.mxu0 %v4164_v28  ;;  %v1629_v16 = vpop.f32.mrf.mxu1  ;;  %v1989_v46 = vadd.f32 %v6096_v35, %v1840_v27  ;;  %v1833_v22 = vmax.f32 %v6571_v61, %v1744_v42 }
 0x1b6   : > { %v4168_v4 = vpop.eup %4167  ;;  %4193 = vtanh.f32 %v2023_v25  ;;  %v2029_v36 = vadd.f32 %v6019_v5, %v1880_v55  ;;  %v1881_v54 = vmax.f32 %v5798_v47, %v1629_v16  ;;  %2612 = vmatmul.mubr.f32.gmra.mxu1 %v4158_v32  ;;  %2717 = vmatmul.mubr.f32.gmra.mxu0 %v4160_v17  ;;  %v3883_v7 = vpop.f32.mrf.mxu0  ;;  %v6576_v55 = vld [vmem:[#allocation39_spill] sm:$0xff] }
 0x1b7   : > { %v4170_v57 = vpop.eup %4169  ;;  %4195 = vtanh.f32 %v1968_v43  ;;  %v1633_v53 = vpop.f32.mrf.mxu1  ;;  %v1854_v41 = vmax.f32 %v6572_v11, %v3883_v7  ;;  %v1982_v47 = vadd.f32 %v6096_v35, %v1833_v22 }
 0x1b8   : > { %v4172_v1 = vpop.eup %4171  ;;  %4197 = vtanh.f32 %v2029_v36  ;;  %v2030_v23 = vadd.f32 %v6034_v24, %v1881_v54  ;;  %v1887_v33 = vmax.f32 %v5802_v10, %v1633_v53  ;;  %2616 = vmatprep.mubr.f32.mxu1 %v4170_v57  ;;  %v1754_v39 = vpop.f32.mrf.mxu0 }
 0x1b9   : > { %v4174_v48 = vpop.eup %4173  ;;  %4199 = vtanh.f32 %v1989_v46  ;;  %2721 = vmatprep.mubr.f32.mxu0 %v4172_v1  ;;  %v1635_v13 = vpop.f32.mrf.mxu1  ;;  %v2003_v44 = vadd.f32 %v6096_v35, %v1854_v41  ;;  %v1847_v49 = vmax.f32 %v6573_v9, %v1754_v39  ;;  %v6577_v46 = vld [vmem:[#allocation41_spill] sm:$0xff]  ;;  %v6578_v1 = vld [vmem:[#allocation43_spill] sm:$0xff] }
 0x1ba   : > { %v4176_v37 = vpop.eup %4175  ;;  %4201 = vtanh.f32 %v2030_v23  ;;  %v2036_v60 = vadd.f32 %v6019_v5, %v1887_v33  ;;  %v1888_v29 = vmax.f32 %v5806_v56, %v1635_v13  ;;  %2617 = vmatmul.mubr.f32.gmra.mxu1 %v4166_v34  ;;  %2722 = vmatmul.mubr.f32.gmra.mxu0 %v4168_v4  ;;  %v3886_v62 = vpop.f32.mrf.mxu0 }
 0x1bb   : > { %v4178_v10 = vpop.eup %4177  ;;  %4203 = vtanh.f32 %v1982_v47  ;;  %v1639_v30 = vpop.f32.mrf.mxu1  ;;  %v1868_v12 = vmax.f32 %v6574_v8, %v3886_v62  ;;  %v1996_v56 = vadd.f32 %v6096_v35, %v1847_v49 }
 0x1bc   : > { %v4180_v38 = vpop.eup %4179  ;;  %4205 = vtanh.f32 %v2036_v60  ;;  %v2037_v20 = vadd.f32 %v6034_v24, %v1888_v29  ;;  %v1894_v32 = vmax.f32 %v5810_v59, %v1639_v30  ;;  %2621 = vmatprep.mubr.f32.mxu1 %v4178_v10  ;;  %v1764_v63 = vpop.f32.mrf.mxu0  ;;  %v6580_v30 = vld [vmem:[#allocation47_spill] sm:$0xff] }
 0x1bd   : > { %v4182_v31 = vpop.eup %4181  ;;  %4207 = vtanh.f32 %v2003_v44  ;;  %2726 = vmatprep.mubr.f32.mxu0 %v4180_v38  ;;  %v1641_v17 = vpop.f32.mrf.mxu1  ;;  %v2017_v6 = vadd.f32 %v6096_v35, %v1868_v12  ;;  %v1861_v58 = vmax.f32 %v6575_v50, %v1764_v63  ;;  %v6583_v50 = vld [vmem:[#allocation58_spill] sm:$0xff] }
 0x1be   : > { %v4184_v19 = vpop.eup %4183  ;;  %4209 = vtanh.f32 %v2037_v20  ;;  %v2043_v14 = vadd.f32 %v6019_v5, %v1894_v32  ;;  %v1895_v52 = vmax.f32 %v5814_v45, %v1641_v17  ;;  %2622 = vmatmul.mubr.f32.gmra.mxu1 %v4174_v48  ;;  %2727 = vmatmul.mubr.f32.gmra.mxu0 %v4176_v37  ;;  %v3889_v21 = vpop.f32.mrf.mxu0  ;;  %v6579_v37 = vld [vmem:[#allocation45_spill] sm:$0xff] }
 0x1bf   : > { %v4186_v59 = vpop.eup %4185  ;;  %4211 = vtanh.f32 %v1996_v56  ;;  %v1645_v15 = vpop.f32.mrf.mxu1  ;;  %v1882_v40 = vmax.f32 %v6576_v55, %v3889_v21  ;;  %v2010_v45 = vadd.f32 %v6096_v35, %v1861_v58  ;;  %v6582_v17 = vld [vmem:[#allocation49_spill] sm:$0xff] }
 0x1c0   : > { %v4188_v28 = vpop.eup %4187  ;;  %4213 = vtanh.f32 %v2043_v14  ;;  %v2044_v25 = vadd.f32 %v6034_v24, %v1895_v52  ;;  %v1901_v26 = vmax.f32 %v5818_v3, %v1645_v15  ;;  %2626 = vmatprep.mubr.f32.mxu1 %v4186_v59  ;;  %v1774_v43 = vpop.f32.mrf.mxu0  ;;  %v6584_v15 = vld [vmem:[#allocation51_spill] sm:$0xff] }
 0x1c1   : > { %v4190_v27 = vpop.eup %4189  ;;  %4215 = vtanh.f32 %v2017_v6  ;;  %2731 = vmatprep.mubr.f32.mxu0 %v4188_v28  ;;  %v1647_v34 = vpop.f32.mrf.mxu1  ;;  %v2031_v4 = vadd.f32 %v6096_v35, %v1882_v40  ;;  %v1875_v54 = vmax.f32 %v6577_v46, %v1774_v43 }
 0x1c2   : > { %v4192_v16 = vpop.eup %4191  ;;  %4217 = vtanh.f32 %v2044_v25  ;;  %v2050_v42 = vadd.f32 %v6019_v5, %v1901_v26  ;;  %v1902_v36 = vmax.f32 %v5822_v0, %v1647_v34  ;;  %2627 = vmatmul.mubr.f32.gmra.mxu1 %v4182_v31  ;;  %2732 = vmatmul.mubr.f32.gmra.mxu0 %v4184_v19  ;;  %v3892_v61 = vpop.f32.mrf.mxu0  ;;  %v6581_v31 = vld [vmem:[#allocation57_spill] sm:$0xff] }
 0x1c3   : > { %v4194_v3 = vpop.eup %4193  ;;  %4219 = vtanh.f32 %v2010_v45  ;;  %v1651_v57 = vpop.f32.mrf.mxu1  ;;  %v1896_v23 = vmax.f32 %v6578_v1, %v3892_v61  ;;  %v2024_v0 = vadd.f32 %v6096_v35, %v1875_v54  ;;  %v6585_v45 = vld [vmem:[#allocation59_spill] sm:$0xff] }
 0x1c4   : > { %v4196_v22 = vpop.eup %4195  ;;  %4221 = vtanh.f32 %v2050_v42  ;;  %v2051_v53 = vadd.f32 %v6034_v24, %v1902_v36  ;;  %v1908_v7 = vmax.f32 %v5826_v18, %v1651_v57  ;;  %2736 = vmatprep.mubr.f32.mxu0 %v4194_v3  ;;  %v1784_v41 = vpop.f32.mrf.mxu0 }
 0x1c5   : > { %v4198_v33 = vpop.eup %4197  ;;  %4223 = vtanh.f32 %v2031_v4  ;;  %3907 = vmatprep.mubr.msk.f32.mxu1 %vm2293_vm2, %v4196_v22  ;;  %v1653_v11 = vpop.f32.mrf.mxu1  ;;  %v2045_v13 = vadd.f32 %v6096_v35, %v1896_v23  ;;  %v1889_v60 = vmax.f32 %v6579_v37, %v1784_v41  ;;  %v2949_v37 = vld [vmem:[%s6471_s5 + $0x58] sm:$0xff] }
 0x1c6   : > { %v4200_v48 = vpop.eup %4199  ;;  %4225 = vtanh.f32 %v2051_v53  ;;  %v2057_v47 = vadd.f32 %v6019_v5, %v1908_v7  ;;  %v1909_v39 = vmax.f32 %v5836_v51, %v1653_v11  ;;  %2737 = vmatmul.mubr.f32.gmra.mxu0 %v4190_v27  ;;  %3908 = vmatmul.mubr.msk.f32.vlgmr.msra.gmra.mxu1 %vm2293_vm2, %v4192_v16  ;;  %v3895_v29 = vpop.f32.mrf.mxu0  ;;  %v6586_v16 = vld [vmem:[#allocation53_spill] sm:$0xff] }
 0x1c7   : > { %v4202_v18 = vpop.eup %4201  ;;  %4227 = vtanh.f32 %v2024_v0  ;;  %v1657_v44 = vpop.f32.mrf.mxu1  ;;  %v1910_v62 = vmax.f32 %v6580_v30, %v3895_v29  ;;  %v2038_v51 = vadd.f32 %v6096_v35, %v1889_v60  ;;  %v2948_v60 = vld [vmem:[%s6471_s5 + $0x50] sm:$0xff]  ;;  %v2946_v29 = vld [vmem:[%s6471_s5 + $0x40] sm:$0xff] }
 0x1c8   : > { %v4204_v10 = vpop.eup %4203  ;;  %4229 = vtanh.f32 %v2057_v47  ;;  %v2058_v9 = vadd.f32 %v6034_v24, %v1909_v39  ;;  %v1915_v49 = vmax.f32 %v5846_v2, %v1657_v44  ;;  %2741 = vmatprep.mubr.f32.mxu0 %v4202_v18  ;;  %v1794_v32 = vpop.f32.mrf.mxu0  ;;  %v2953_v47 = vld [vmem:[%s6471_s5 + $0x78] sm:$0xff]  ;;  %v2951_v39 = vld [vmem:[%s6471_s5 + $0x68] sm:$0xff]  ;;  %v2950_v18 = vld [vmem:[%s6471_s5 + $0x60] sm:$0xff] }
 0x1c9   : > { %v4206_v38 = vpop.eup %4205  ;;  %4231 = vtanh.f32 %v2045_v13  ;;  %3910 = vmatprep.mubr.msk.f32.mxu1 %vm2293_vm2, %v4204_v10  ;;  %v1659_v20 = vpop.f32.mrf.mxu1  ;;  %v1903_v63 = vmax.f32 %v6582_v17, %v1794_v32  ;;  %v2059_v52 = vadd.f32 %v6096_v35, %v1910_v62  ;;  %3931 = vmatprep.subr.mxu1 %v2953_v47  ;;  %v2952_v13 = vld [vmem:[%s6471_s5 + $0x70] sm:$0xff]  ;;  %v2947_v44 = vld [vmem:[%s6471_s5 + $0x48] sm:$0xff]  ;;  %v2945_v10 = vld [vmem:[%s6471_s5 + $0x38] sm:$0xff] }
 0x1ca   : > { %v4208_v8 = vpop.eup %4207  ;;  %4233 = vtanh.f32 %v2058_v9  ;;  %v2064_v12 = vadd.f32 %v6019_v5, %v1915_v49  ;;  %v1916_v56 = vmax.f32 %v6581_v31, %v1659_v20  ;;  %2742 = vmatmul.mubr.f32.gmra.mxu0 %v4198_v33  ;;  %3911 = vmatmul.mubr.msk.f32.gmra.mxu1 %vm2293_vm2, %v4200_v48  ;;  %v3898_v14 = vpop.f32.mrf.mxu0  ;;  %v2944_v9 = vld [vmem:[%s6471_s5 + $0x30] sm:$0xff]  ;;  %v2943_v49 = vld [vmem:[%s6471_s5 + $0x28] sm:$0xff]  ;;  %v2942_v30 = vld [vmem:[%s6471_s5 + $0x20] sm:$0xff] }
 0x1cb   : > { %v4210_v2 = vpop.eup %4209  ;;  %4235 = vtanh.f32 %v2038_v51  ;;  %v1663_v19 = vpop.f32.mrf.mxu1  ;;  %v1924_v21 = vmax.f32 %v6584_v15, %v3898_v14  ;;  %v2052_v25 = vadd.f32 %v6096_v35, %v1903_v63  ;;  %3932 = vmatpush3.msra.mxu1 %v2953_v47  ;;  %v2941_v62 = vld [vmem:[%s6471_s5 + $0x18] sm:$0xff]  ;;  %v2939_v51 = vld [vmem:[%s6471_s5 + $0x8] sm:$0xff]  ;;  %v2938_v20 = vld [vmem:[%s6471_s5] sm:$0xff] }
 0x1cc   : > { %v4212_v6 = vpop.eup %4211  ;;  %v2065_v59 = vadd.f32 %v6034_v24, %v1916_v56  ;;  %v1922_v58 = vmax.f32 %v6583_v50, %v1663_v19  ;;  %2746 = vmatprep.mubr.f32.mxu0 %v4210_v2  ;;  %4237 = vtanh.f32 %v2064_v12  ;;  %v1804_v55 = vpop.f32.mrf.mxu0  ;;  %3933 = vmatprep.subr.mxu1 %v2952_v13 }
 0x1cd   : > { %v4214_v28 = vpop.eup %4213  ;;  %3913 = vmatprep.mubr.msk.f32.mxu1 %vm2293_vm2, %v4212_v6  ;;  %v1665_v26 = vpop.f32.mrf.mxu1  ;;  %v1917_v42 = vmax.f32 %v6586_v16, %v1804_v55  ;;  %v2073_v36 = vadd.f32 %v6096_v35, %v1924_v21  ;;  %3934 = vmatpush3.msra.mxu1 %v2952_v13 }
 0x1ce   : > { %v4216_v40 = vpop.eup %4215  ;;  %4239 = vtanh.f32 %v2065_v59  ;;  %v2071_v27 = vadd.f32 %v6019_v5, %v1922_v58  ;;  %v1923_v34 = vmax.f32 %v6585_v45, %v1665_v26  ;;  %2747 = vmatmul.mubr.f32.gmra.mxu0 %v4206_v38  ;;  %3914 = vmatmul.mubr.msk.f32.gmra.mxu1 %vm2293_vm2, %v4208_v8  ;;  %v2940_v38 = vld [vmem:[%s6471_s5 + $0x10] sm:$0xff] }
 0x1cf   : > { %v4218_v43 = vpop.eup %4217  ;;  %4241 = vtanh.f32 %v2052_v25  ;;  %v2066_v5 = vadd.f32 %v6096_v35, %v1917_v42  ;;  %3935 = vmatprep.subr.mxu1 %v2951_v39 }
 0x1d0   : > { %v4220_v4 = vpop.eup %4219  ;;  %4243 = vtanh.f32 %v2059_v52  ;;  %v2072_v3 = vadd.f32 %v6034_v24, %v1923_v34  ;;  %2751 = vmatprep.mubr.f32.mxu0 %v4218_v43  ;;  %3936 = vmatpush3.msra.mxu1 %v2951_v39 }
 0x1d1   : > { %v4222_v46 = vpop.eup %4221  ;;  %4245 = vtanh.f32 %v2071_v27  ;;  %3916 = vmatprep.mubr.msk.f32.mxu1 %vm2293_vm2, %v4220_v4  ;;  %3937 = vmatprep.subr.mxu1 %v2950_v18 }
 0x1d2   : > { %v4224_v54 = vpop.eup %4223  ;;  %4247 = vtanh.f32 %v2072_v3  ;;  %2752 = vmatmul.mubr.f32.gmra.mxu0 %v4214_v28  ;;  %3917 = vmatmul.mubr.msk.f32.gmra.mxu1 %vm2293_vm2, %v4216_v40 }
 0x1d3   : > { %v4226_v57 = vpop.eup %4225  ;;  %4249 = vtanh.f32 %v2066_v5  ;;  %3938 = vmatpush3.msra.mxu1 %v2950_v18 }
 0x1d4   : > { %v4228_v61 = vpop.eup %4227  ;;  %4251 = vtanh.f32 %v2073_v36  ;;  %2756 = vmatprep.mubr.f32.mxu0 %v4226_v57  ;;  %3939 = vmatprep.subr.mxu1 %v2949_v37 }
 0x1d5   : > { %v4230_v22 = vpop.eup %4229  ;;  %3919 = vmatprep.mubr.msk.f32.mxu1 %vm2293_vm2, %v4228_v61  ;;  %3940 = vmatpush3.msra.mxu1 %v2949_v37 }
 0x1d6   : > { %v4232_v24 = vpop.eup %4231  ;;  %2757 = vmatmul.mubr.f32.gmra.mxu0 %v4222_v46  ;;  %3920 = vmatmul.mubr.msk.f32.gmra.mxu1 %vm2293_vm2, %v4224_v54 }
 0x1d7   : > { %v4234_v35 = vpop.eup %4233  ;;  %3941 = vmatprep.subr.mxu1 %v2948_v60 }
 0x1d8   : > { %v4236_v53 = vpop.eup %4235  ;;  %2761 = vmatprep.mubr.f32.mxu0 %v4234_v35  ;;  %3942 = vmatpush3.msra.mxu1 %v2948_v60 }
 0x1d9   : > { %3922 = vmatprep.mubr.msk.f32.mxu1 %vm2293_vm2, %v4236_v53  ;;  %v4238_v7 = vpop.eup %4237  ;;  %3943 = vmatprep.subr.mxu1 %v2947_v44 }
 0x1da   : > { %2762 = vmatmul.mubr.f32.gmra.mxu0 %v4230_v22  ;;  %3923 = vmatmul.mubr.msk.f32.gmra.mxu1 %vm2293_vm2, %v4232_v24 }
 0x1db   : > { %v4240_v1 = vpop.eup %4239  ;;  %3944 = vmatpush3.msra.mxu1 %v2947_v44 }
 0x1dc   : > { %v4242_v23 = vpop.eup %4241  ;;  %2766 = vmatprep.mubr.f32.mxu0 %v4240_v1  ;;  %3945 = vmatprep.subr.mxu1 %v2946_v29 }
 0x1dd   : > { %v4244_v33 = vpop.eup %4243  ;;  %3925 = vmatprep.mubr.msk.f32.mxu1 %vm2293_vm2, %v4242_v23  ;;  %3946 = vmatpush3.msra.mxu1 %v2946_v29 }
 0x1de   : > { %v4246_v0 = vpop.eup %4245  ;;  %2767 = vmatmul.mubr.f32.gmra.mxu0 %v4238_v7  ;;  %3926 = vmatmul.mubr.msk.f32.gmra.mxu1 %vm2293_vm2, %v4244_v33 }
 0x1df   : > { %v4248_v11 = vpop.eup %4247  ;;  %3947 = vmatprep.subr.mxu1 %v2945_v10 }
 0x1e0   : > { %v4250_v41 = vpop.eup %4249  ;;  %2771 = vmatprep.mubr.f32.mxu0 %v4248_v11  ;;  %3948 = vmatpush3.msra.mxu1 %v2945_v10 }
 0x1e1   : > { %v4252_v48 = vpop.eup %4251  ;;  %3928 = vmatprep.mubr.msk.f32.mxu1 %vm2293_vm2, %v4250_v41  ;;  %3949 = vmatprep.subr.mxu1 %v2944_v9 }
 0x1e2   : > { %2772 = vmatmul.mubr.f32.gmra.mxu0 %v4246_v0  ;;  %3929 = vmatmul.mubr.msk.f32.gmra.mxu1 %vm2293_vm2, %v4252_v48 }
 0x1e3   : > { %3950 = vmatpush3.msra.mxu1 %v2944_v9 }
 0x1e4   : > { %3951 = vmatprep.subr.mxu1 %v2943_v49 }
 0x1e5   : > { %3952 = vmatpush3.msra.mxu1 %v2943_v49 }
 0x1e6   : > { %3953 = vmatprep.subr.mxu1 %v2942_v30 }
 0x1e7   : > { %3954 = vmatpush3.msra.mxu1 %v2942_v30 }
 0x1e8   : > { %3955 = vmatprep.subr.mxu1 %v2941_v62 }
 0x1e9   : > { %3956 = vmatpush3.msra.mxu1 %v2941_v62 }
 0x1ea   : > { %3957 = vmatprep.subr.mxu1 %v2940_v38 }
 0x1eb   : > { %3958 = vmatpush3.msra.mxu1 %v2940_v38 }
 0x1ec   : > { %3959 = vmatprep.subr.mxu1 %v2939_v51 }
 0x1ed   : > { %3960 = vmatpush3.msra.mxu1 %v2939_v51 }
 0x1ee   : > { %3961 = vmatprep.subr.mxu1 %v2938_v20 }
 0x1ef   : > { %3962 = vmatpush3.msra.mxu1 %v2938_v20 }
 0x224   : > { %v3543_v32 = vpop.f32.mrf.mxu0 }
 0x226   : > { %v3544_v8 = vpop.f32.mrf.mxu0 }
 0x227   : > { %v6232_v12 = vadd.f32 %v3544_v8, %v3543_v32 }
 0x228   : > { %v3546_v31 = vpop.f32.mrf.mxu0 }
 0x22a   : > { %v3547_v56 = vpop.f32.mrf.mxu0 }
 0x22b   : > { %v6234_v2 = vadd.f32 %v3547_v56, %v3546_v31 }
 0x22c   : > { %v3549_v17 = vpop.f32.mrf.mxu0 }
 0x22e   : > { %v3550_v63 = vpop.f32.mrf.mxu0 }
 0x22f   : > { %v6236_v19 = vadd.f32 %v3550_v63, %v3549_v17 }
 0x230   : > { %v3552_v14 = vpop.f32.mrf.mxu0 }
 0x232   : > { %v3553_v6 = vpop.f32.mrf.mxu0 }
 0x233   : > { %v6238_v52 = vadd.f32 %v3553_v6, %v3552_v14 }
 0x234   : > { %v3555_v59 = vpop.f32.mrf.mxu0 }
 0x236   : > { %v3556_v50 = vpop.f32.mrf.mxu0 }
 0x237   : > { %v6240_v58 = vadd.f32 %v3556_v50, %v3555_v59 }
 0x239   : > { %v3558_v15 = vpop.f32.mrf.mxu0 }
 0x23b   : > { %v3559_v21 = vpop.f32.mrf.mxu0 }
 0x23c   : > { %v6242_v28 = vadd.f32 %v3559_v21, %v3558_v15 }
 0x23d   : > { %v3561_v25 = vpop.f32.mrf.mxu0 }
 0x23f   : > { %v3562_v26 = vpop.f32.mrf.mxu0 }
 0x240   : > { %v6244_v55 = vadd.f32 %v3562_v26, %v3561_v25 }
 0x241   : > { %v3564_v40 = vpop.f32.mrf.mxu0 }
 0x243   : > { %v3565_v27 = vpop.f32.mrf.mxu0 }
 0x244   : > { %v6246_v45 = vadd.f32 %v3565_v27, %v3564_v40 }
 0x245   : > { %v3567_v34 = vpop.f32.mrf.mxu0 }
 0x246   : > { %v6248_v43 = vpop.f32.mrf.mxu1 }
 0x247   : > { %v3568_v16 = vpop.f32.mrf.mxu0 }
 0x248   : > { %v6250_v42 = vadd.f32 %v3568_v16, %v3567_v34  ;;  %v6252_v4 = vpop.f32.mrf.mxu1 }
 0x249   : > { %v3570_v36 = vpop.f32.mrf.mxu0 }
 0x24a   : > { %v3626_v3 = vpop.f32.mrf.mxu1 }
 0x24b   : > { %v3571_v46 = vpop.f32.mrf.mxu0 }
 0x24c   : > { %v6254_v5 = vadd.f32 %v3571_v46, %v3570_v36  ;;  %v3627_v54 = vpop.f32.mrf.mxu1 }
 0x24d   : > { %v3573_v57 = vpop.f32.mrf.mxu0 }
 0x24e   : > { %v6256_v61 = vpop.f32.mrf.mxu1 }
 0x24f   : > { %v3574_v22 = vpop.f32.mrf.mxu0 }
 0x250   : > { %v6258_v24 = vadd.f32 %v3574_v22, %v3573_v57  ;;  %v6260_v35 = vpop.f32.mrf.mxu1 }
 0x251   : > { %v3576_v53 = vpop.f32.mrf.mxu0 }
 0x252   : > { %v3632_v7 = vpop.f32.mrf.mxu1 }
 0x253   : > { %v3577_v1 = vpop.f32.mrf.mxu0 }
 0x254   : > { %v6262_v23 = vadd.f32 %v3577_v1, %v3576_v53  ;;  %v3633_v33 = vpop.f32.mrf.mxu1  ;;  %v6321_v1 = vld [vmem:[%s6470_s4] ss:$0 sm:$0xff] }
 0x255   : > { %v3579_v0 = vpop.f32.mrf.mxu0 }
 0x256   : > { %v6264_v11 = vpop.f32.mrf.mxu1 }
 0x257   : > { %v3580_v41 = vpop.f32.mrf.mxu0 }
 0x258   : > { %v6266_v48 = vadd.f32 %v3580_v41, %v3579_v0  ;;  %v6268_v47 = vpop.f32.mrf.mxu1  ;;  %v3628_v0 = vadd.f32 %v3627_v54, %v3626_v3 }
 0x259   : > { %v6270_v13 = vpop.f32.mrf.mxu0 }
 0x25a   : > { %6587 = vst [vmem:[#allocation5_spill] sm:$0xff] %v6266_v48  ;;  %v6272_v39 = vpop.f32.mrf.mxu1 }
 0x25b   : > { %v6274_v18 = vpop.f32.mrf.mxu0 }
 0x25c   : > { %v3639_v37 = vpop.f32.mrf.mxu1 }
 0x25d   : > { %v6276_v60 = vpop.f32.mrf.mxu0 }
 0x25e   : > { %6588 = vst [vmem:[#allocation6_spill] sm:$0xff] %v6276_v60  ;;  %v6278_v44 = vpop.f32.mrf.mxu1 }
 0x25f   : > { %v6280_v29 = vpop.f32.mrf.mxu0 }
 0x260   : > { %6589 = vst [vmem:[#allocation22_spill] sm:$0xff] %v6280_v29  ;;  %v6282_v10 = vpop.f32.mrf.mxu1  ;;  %v2414_v29 = vadd.f32 %v6234_v2, %v6321_v1  ;;  %v2424_v2 = vadd.f32 %v6238_v52, %v6321_v1 }
 0x261   : > { %v6284_v9 = vpop.f32.mrf.mxu0 }
 0x262   : > { %6590 = vst [vmem:[#allocation7_spill] sm:$0xff] %v6284_v9  ;;  %v6286_v49 = vpop.f32.mrf.mxu1  ;;  %v3625_v9 = vadd.f32 %v6252_v4, %v6248_v43  ;;  %v3631_v43 = vadd.f32 %v6260_v35, %v6256_v61  ;;  %v3637_v61 = vadd.f32 %v6268_v47, %v6264_v11  ;;  %v2434_v35 = vadd.f32 %v6242_v28, %v6321_v1 }
 0x263   : > { %v6288_v30 = vpop.f32.mrf.mxu0  ;;  %v3643_v28 = vadd.f32 %v6282_v10, %v6278_v44 }
 0x264   : > { %6591 = vst [vmem:[#allocation24_spill] sm:$0xff] %v6288_v30  ;;  %v6290_v62 = vpop.f32.mrf.mxu1 }
 0x266   : > { %v6292_v38 = vpop.f32.mrf.mxu1  ;;  %v3703_v51 = vpop.f32.mrf.mxu0 }
 0x268   : > { %v6294_v20 = vpop.f32.mrf.mxu1  ;;  %v3704_v32 = vpop.f32.mrf.mxu0 }
 0x26a   : > { %v6296_v8 = vpop.f32.mrf.mxu1  ;;  %v3706_v31 = vpop.f32.mrf.mxu0 }
 0x26c   : > { %v6298_v56 = vpop.f32.mrf.mxu1  ;;  %v3707_v17 = vpop.f32.mrf.mxu0 }
 0x26d   : > { %v3708_v60 = vadd.f32 %v3707_v17, %v3706_v31 }
 0x26e   : > { %v6300_v63 = vpop.f32.mrf.mxu1  ;;  %v3709_v14 = vpop.f32.mrf.mxu0 }
 0x270   : > { %v6302_v6 = vpop.f32.mrf.mxu1  ;;  %v3710_v59 = vpop.f32.mrf.mxu0 }
 0x272   : > { %v6304_v50 = vpop.f32.mrf.mxu1  ;;  %v3712_v15 = vpop.f32.mrf.mxu0 }
 0x274   : > { %v6306_v21 = vpop.f32.mrf.mxu1  ;;  %v3713_v25 = vpop.f32.mrf.mxu0 }
 0x275   : > { %v3714_v4 = vadd.f32 %v3713_v25, %v3712_v15 }
 0x276   : > { %v6308_v26 = vpop.f32.mrf.mxu1  ;;  %v3715_v40 = vpop.f32.mrf.mxu0 }
 0x277   : > { %6592 = vst [vmem:[#allocation8_spill] sm:$0xff] %v6308_v26  ;;  %v3634_v26 = vadd.f32 %v3633_v33, %v3632_v7  ;;  %v3640_v33 = vadd.f32 %v3639_v37, %v6272_v39  ;;  %v3646_v37 = vadd.f32 %v6290_v62, %v6286_v49 }
 0x278   : > { %v6310_v27 = vpop.f32.mrf.mxu1  ;;  %v3716_v34 = vpop.f32.mrf.mxu0 }
 0x279   : > { %6593 = vst [vmem:[#allocation26_spill] sm:$0xff] %v6310_v27  ;;  %v2559_v27 = vadd.f32 %v3628_v0, %v2414_v29  ;;  %v2569_v7 = vadd.f32 %v3634_v26, %v2424_v2  ;;  %v2579_v39 = vadd.f32 %v3640_v33, %v2434_v35  ;;  %v3652_v2 = vadd.f32 %v6298_v56, %v6296_v8 }
 0x27a   : > { %v6312_v16 = vpop.f32.mrf.mxu1  ;;  %v3718_v36 = vpop.f32.mrf.mxu0 }
 0x27b   : > { %6594 = vst [vmem:[#allocation9_spill] sm:$0xff] %v6312_v16  ;;  %v3705_v16 = vadd.f32 %v3704_v32, %v3703_v51  ;;  %v2704_v17 = vadd.f32 %v3708_v60, %v2559_v27  ;;  %v3711_v51 = vadd.f32 %v3710_v59, %v3709_v14  ;;  %v2714_v25 = vadd.f32 %v3714_v4, %v2569_v7 }
 0x27c   : > { %v6314_v46 = vpop.f32.mrf.mxu1  ;;  %v3719_v57 = vpop.f32.mrf.mxu0  ;;  %v2429_v14 = vadd.f32 %v6240_v58, %v6321_v1  ;;  %v3717_v59 = vadd.f32 %v3716_v34, %v3715_v40  ;;  %v3658_v7 = vadd.f32 %v6306_v21, %v6304_v50  ;;  %v3584_v50 = vadd.f32 %v6274_v18, %v6270_v13  ;;  %v6603_v13 = vld [vmem:[#allocation5_spill] sm:$0xff] }
 0x27d   : > { %6595 = vst [vmem:[#allocation28_spill] sm:$0xff] %v6314_v46  ;;  %v2409_v46 = vadd.f32 %v6232_v12, %v6321_v1  ;;  %v2419_v12 = vadd.f32 %v6236_v19, %v6321_v1  ;;  %v3720_v60 = vadd.f32 %v3719_v57, %v3718_v36  ;;  %v2444_v36 = vadd.f32 %v6246_v45, %v6321_v1 }
 0x27e   : > { %v6316_v22 = vpop.f32.mrf.mxu1  ;;  %v3721_v53 = vpop.f32.mrf.mxu0  ;;  %v2574_v27 = vadd.f32 %v3637_v61, %v2429_v14  ;;  %v3649_v45 = vadd.f32 %v6294_v20, %v6292_v38  ;;  %v6599_v14 = vld [vmem:[#allocation8_spill] sm:$0xff]  ;;  %v2469_v18 = vadd.f32 %v6603_v13, %v6321_v1 }
 0x27f   : > { %6596 = vst [vmem:[#allocation10_spill] sm:$0xff] %v6316_v22  ;;  %v2564_v0 = vadd.f32 %v3631_v43, %v2419_v12  ;;  %v2724_v34 = vadd.f32 %v3720_v60, %v2579_v39  ;;  %v2589_v43 = vadd.f32 %v3646_v37, %v2444_v36 }
 0x280   : > { %v6323_v41 = vpop.f32.mrf.mxu1  ;;  %v3722_v30 = vpop.f32.mrf.mxu0  ;;  %v2719_v62 = vadd.f32 %v3717_v59, %v2574_v27 }
 0x281   : > { %6597 = vst [vmem:[#allocation30_spill] sm:$0xff] %v6323_v41  ;;  %v2554_v41 = vadd.f32 %v3625_v9, %v2409_v46  ;;  %v3723_v49 = vadd.f32 %v3722_v30, %v3721_v53 }
 0x282   : > { %v6329_v48 = vpop.f32.mrf.mxu1  ;;  %v3724_v22 = vpop.f32.mrf.mxu0 }
 0x283   : > { %6598 = vst [vmem:[#allocation11_spill] sm:$0xff] %v6329_v48  ;;  %v2699_v29 = vadd.f32 %v3705_v16, %v2554_v41  ;;  %v2439_v41 = vadd.f32 %v6244_v55, %v6321_v1 }
 0x284   : > { %v6333_v3 = vpop.f32.mrf.mxu1  ;;  %v3725_v54 = vpop.f32.mrf.mxu0  ;;  %v6602_v39 = vld [vmem:[#allocation28_spill] sm:$0xff] }
 0x285   : > { %v3726_v58 = vadd.f32 %v3725_v54, %v3724_v22  ;;  %v2454_v54 = vadd.f32 %v6254_v5, %v6321_v1  ;;  %v3655_v5 = vadd.f32 %v6302_v6, %v6300_v63 }
 0x286   : > { %v3727_v31 = vpop.f32.mrf.mxu0  ;;  %v3909_v48 = vpop.f32.mrf.mxu1 }
 0x287   : > { %v2849_v32 = vadd.f32 %v3909_v48, %v2704_v17  ;;  %v2709_v48 = vadd.f32 %v3711_v51, %v2564_v0  ;;  %v2584_v17 = vadd.f32 %v3643_v28, %v2439_v41  ;;  %v2734_v53 = vadd.f32 %v3726_v58, %v2589_v43  ;;  %v6606_v41 = vld [vmem:[#allocation10_spill] sm:$0xff] }
 0x288   : > { %v3728_v9 = vpop.f32.mrf.mxu0  ;;  %v2843_v46 = vpop.f32.mrf.mxu1  ;;  %v2449_v51 = vadd.f32 %v6250_v42, %v6321_v1  ;;  %v2459_v0 = vadd.f32 %v6258_v24, %v6321_v1  ;;  %v2464_v42 = vadd.f32 %v6262_v23, %v6321_v1  ;;  %v6600_v23 = vld [vmem:[#allocation26_spill] sm:$0xff]  ;;  %v2474_v58 = vadd.f32 %v3584_v50, %v6321_v1 }
 0x289   : > { %v2844_v52 = vadd.f32 %v2843_v46, %v2699_v29  ;;  %v3729_v8 = vadd.f32 %v3728_v9, %v3727_v31  ;;  %v2729_v56 = vadd.f32 %v3723_v49, %v2584_v17  ;;  %v2599_v29 = vadd.f32 %v3652_v2, %v2454_v54  ;;  %v6607_v49 = vld [vmem:[#allocation30_spill] sm:$0xff] }
 0x28a   : > { %v3730_v15 = vpop.f32.mrf.mxu0  ;;  %v3912_v19 = vpop.f32.mrf.mxu1  ;;  %v3661_v59 = vadd.f32 %v6600_v23, %v6599_v14 }
 0x28b   : > { %4253 = vtanh.f32 %v2844_v52  ;;  %v2859_v11 = vadd.f32 %v3912_v19, %v2714_v25  ;;  %v2604_v19 = vadd.f32 %v3655_v5, %v2459_v0 }
 0x28c   : > { %4255 = vtanh.f32 %v2849_v32  ;;  %v3731_v47 = vpop.f32.mrf.mxu0  ;;  %v2853_v26 = vpop.f32.mrf.mxu1  ;;  %v2594_v32 = vadd.f32 %v3649_v45, %v2449_v51 }
 0x28d   : > { %v2854_v16 = vadd.f32 %v2853_v26, %v2709_v48  ;;  %v3732_v55 = vadd.f32 %v3731_v47, %v3730_v15  ;;  %v2609_v15 = vadd.f32 %v3658_v7, %v2464_v42  ;;  %v6601_v48 = vld [vmem:[#allocation9_spill] sm:$0xff]  ;;  %v6604_v47 = vld [vmem:[#allocation6_spill] sm:$0xff] }
 0x28e   : > { %v3733_v40 = vpop.f32.mrf.mxu0  ;;  %v3915_v57 = vpop.f32.mrf.mxu1  ;;  %v2739_v35 = vadd.f32 %v3729_v8, %v2594_v32  ;;  %v3664_v37 = vadd.f32 %v6602_v39, %v6601_v48  ;;  %v6605_v26 = vld [vmem:[#allocation22_spill] sm:$0xff]  ;;  %v6610_v32 = vld [vmem:[#allocation11_spill] sm:$0xff] }
 0x28f   : > { %4257 = vtanh.f32 %v2854_v16  ;;  %v2869_v44 = vadd.f32 %v3915_v57, %v2724_v34  ;;  %v2744_v61 = vadd.f32 %v3732_v55, %v2599_v29  ;;  %v3587_v27 = vadd.f32 %v6605_v26, %v6604_v47 }
 0x290   : > { %4259 = vtanh.f32 %v2859_v11  ;;  %v3734_v10 = vpop.f32.mrf.mxu0  ;;  %v2863_v4 = vpop.f32.mrf.mxu1  ;;  %v2619_v17 = vadd.f32 %v3664_v37, %v2474_v58  ;;  %v3670_v5 = vadd.f32 %v6333_v3, %v6610_v32  ;;  %v3448_v37 = vld [vmem:[%s6472_s6] ss:$0 sm:$0xff] }
 0x291   : > { %v2864_v22 = vadd.f32 %v2863_v4, %v2719_v62  ;;  %v3735_v21 = vadd.f32 %v3734_v10, %v3733_v40  ;;  %v3667_v62 = vadd.f32 %v6607_v49, %v6606_v41  ;;  %v2614_v4 = vadd.f32 %v3661_v59, %v2469_v18 }
 0x292   : > { %v3736_v30 = vpop.f32.mrf.mxu0  ;;  %v3918_v12 = vpop.f32.mrf.mxu1  ;;  %v2479_v54 = vadd.f32 %v3587_v27, %v6321_v1 }
 0x293   : > { %4261 = vtanh.f32 %v2864_v22  ;;  %v2879_v38 = vadd.f32 %v3918_v12, %v2734_v53  ;;  %v2749_v34 = vadd.f32 %v3735_v21, %v2604_v19  ;;  %v6608_v53 = vld [vmem:[#allocation7_spill] sm:$0xff]  ;;  %v6609_v12 = vld [vmem:[#allocation24_spill] sm:$0xff] }
 0x294   : > { %4263 = vtanh.f32 %v2869_v44  ;;  %v3737_v20 = vpop.f32.mrf.mxu0  ;;  %v2873_v33 = vpop.f32.mrf.mxu1  ;;  %v3590_v51 = vadd.f32 %v6609_v12, %v6608_v53  ;;  %v2624_v7 = vadd.f32 %v3667_v62, %v2479_v54 }
 0x295   : > { %v2874_v46 = vadd.f32 %v2873_v33, %v2729_v56  ;;  %v3738_v31 = vadd.f32 %v3737_v20, %v3736_v30 }
 0x296   : > { %v3739_v9 = vpop.f32.mrf.mxu0  ;;  %v3921_v52 = vpop.f32.mrf.mxu1 }
 0x297   : > { %4265 = vtanh.f32 %v2874_v46  ;;  %v2889_v63 = vadd.f32 %v3921_v52, %v2744_v61  ;;  %v2754_v16 = vadd.f32 %v3738_v31, %v2609_v15  ;;  %v2484_v61 = vadd.f32 %v3590_v51, %v6321_v1 }
 0x298   : > { %v4254_v60 = vpop.eup %4253  ;;  %4267 = vtanh.f32 %v2879_v38  ;;  %v3740_v6 = vpop.f32.mrf.mxu0 }
 0x299   : > { %v2883_v25 = vpop.f32.mrf.mxu1  ;;  %v4256_v24 = vpop.eup %4255  ;;  %3963 = vmatprep.mubr.f32.mxu1 %v4254_v60  ;;  %v3741_v40 = vadd.f32 %v3740_v6, %v3739_v9  ;;  %v2629_v15 = vadd.f32 %v3670_v5, %v2484_v61 }
 0x29a   : > { %v2884_v11 = vadd.f32 %v2883_v25, %v2739_v35  ;;  %v3742_v28 = vpop.f32.mrf.mxu0  ;;  %3964 = vmatmul.mubr.f32.vlgmr.msra.gmra.mxu1 %v4256_v24 }
 0x29b   : > { %v3924_v36 = vpop.f32.mrf.mxu1  ;;  %v2759_v56 = vadd.f32 %v3741_v40, %v2614_v4 }
 0x29c   : > { %4269 = vtanh.f32 %v2884_v11  ;;  %v4258_v57 = vpop.eup %4257  ;;  %v2899_v43 = vadd.f32 %v3924_v36, %v2754_v16  ;;  %v3743_v2 = vpop.f32.mrf.mxu0 }
 0x29d   : > { %4271 = vtanh.f32 %v2889_v63  ;;  %v2893_v44 = vpop.f32.mrf.mxu1  ;;  %v4260_v10 = vpop.eup %4259  ;;  %v3744_v45 = vadd.f32 %v3743_v2, %v3742_v28  ;;  %3966 = vmatprep.mubr.f32.mxu1 %v4258_v57 }
 0x29e   : > { %v2894_v22 = vadd.f32 %v2893_v44, %v2749_v34  ;;  %v3745_v55 = vpop.f32.mrf.mxu0  ;;  %3967 = vmatmul.mubr.f32.gmra.mxu1 %v4260_v10 }
 0x29f   : > { %v3927_v30 = vpop.f32.mrf.mxu1  ;;  %v2764_v8 = vadd.f32 %v3744_v45, %v2619_v17 }
 0x2a0   : > { %4273 = vtanh.f32 %v2894_v22  ;;  %v4262_v29 = vpop.eup %4261  ;;  %v3746_v38 = vpop.f32.mrf.mxu0 }
 0x2a1   : > { %4275 = vtanh.f32 %v2899_v43  ;;  %v2903_v20 = vpop.f32.mrf.mxu1  ;;  %v4264_v33 = vpop.eup %4263  ;;  %v2909_v46 = vadd.f32 %v3927_v30, %v2764_v8  ;;  %v3747_v0 = vadd.f32 %v3746_v38, %v3745_v55  ;;  %3969 = vmatprep.mubr.f32.mxu1 %v4262_v29 }
 0x2a2   : > { %v2904_v42 = vadd.f32 %v2903_v20, %v2759_v56  ;;  %v3748_v31 = vpop.f32.mrf.mxu0  ;;  %3970 = vmatmul.mubr.f32.gmra.mxu1 %v4264_v33 }
 0x2a3   : > { %v3930_v9 = vpop.f32.mrf.mxu1  ;;  %4277 = vtanh.f32 %v2909_v46  ;;  %v2769_v52 = vadd.f32 %v3747_v0, %v2624_v7 }
 0x2a4   : > { %v4266_v50 = vpop.eup %4265  ;;  %4279 = vtanh.f32 %v2904_v42  ;;  %v3749_v21 = vpop.f32.mrf.mxu0 }
 0x2a5   : > { %v2913_v35 = vpop.f32.mrf.mxu1  ;;  %v4268_v60 = vpop.eup %4267  ;;  %v3750_v63 = vadd.f32 %v3749_v21, %v3748_v31  ;;  %3972 = vmatprep.mubr.f32.mxu1 %v4266_v50 }
 0x2a6   : > { %v2914_v6 = vadd.f32 %v2913_v35, %v2769_v52  ;;  %3973 = vmatmul.mubr.f32.gmra.mxu1 %v4268_v60 }
 0x2a7   : > { %v2774_v3 = vadd.f32 %v3750_v63, %v2629_v15 }
 0x2a8   : > { %4281 = vtanh.f32 %v2914_v6 }
 0x2a9   : > { %v4270_v25 = vpop.eup %4269  ;;  %v2919_v19 = vadd.f32 %v3930_v9, %v2774_v3 }
 0x2aa   : > { %v4272_v24 = vpop.eup %4271  ;;  %3975 = vmatprep.mubr.f32.mxu1 %v4270_v25 }
 0x2ab   : > { %3976 = vmatmul.mubr.f32.gmra.mxu1 %v4272_v24  ;;  %4283 = vtanh.f32 %v2919_v19 }
 0x2ad   : > { %v4274_v1 = vpop.eup %4273 }
 0x2ae   : > { %v4276_v14 = vpop.eup %4275  ;;  %3978 = vmatprep.mubr.f32.mxu1 %v4274_v1 }
 0x2af   : > { %3979 = vmatmul.mubr.f32.gmra.mxu1 %v4276_v14 }
 0x2b0   : > { %v4278_v23 = vpop.eup %4277 }
 0x2b1   : > { %v4280_v59 = vpop.eup %4279 }
 0x2b2   : > { %3981 = vmatprep.mubr.f32.mxu1 %v4280_v59 }
 0x2b3   : > { %3982 = vmatmul.mubr.f32.gmra.mxu1 %v4278_v23 }
 0x2b5   : > { %v4282_v48 = vpop.eup %4281 }
 0x2b6   : > { %3984 = vmatprep.mubr.f32.mxu1 %v4282_v48 }
 0x2b8   : > { %v4284_v39 = vpop.eup %4283 }
 0x2b9   : > { %3985 = vmatmul.mubr.f32.gmra.mxu1 %v4284_v39 }
 0x35a   : > { %v3965_v11 = vpop.f32.mrf.mxu1 }
 0x35b   : > { %v3033_v13 = vadd.f32 %v3965_v11, %v3448_v37 }
 0x35c   : > { %v3027_v18 = vpop.f32.mrf.mxu1 }
 0x35d   : > { %3107 = vst [vmem:[%s6397_s19 + $0x8] sm:$0xff] %v3033_v13  ;;  %v3028_v47 = vadd.f32 %v3448_v37, %v3027_v18 }
 0x35e   : > { %v3968_v26 = vpop.f32.mrf.mxu1 }
 0x35f   : > { %3106 = vst [vmem:[%s6397_s19] sm:$0xff] %v3028_v47  ;;  %v3043_v27 = vadd.f32 %v3968_v26, %v3448_v37 }
 0x360   : > { %v3037_v28 = vpop.f32.mrf.mxu1 }
 0x361   : > { %3109 = vst [vmem:[%s6397_s19 + $0x18] sm:$0xff] %v3043_v27  ;;  %v3038_v16 = vadd.f32 %v3448_v37, %v3037_v28 }
 0x362   : > { %v3971_v36 = vpop.f32.mrf.mxu1 }
 0x363   : > { %3108 = vst [vmem:[%s6397_s19 + $0x10] sm:$0xff] %v3038_v16  ;;  %v3053_v58 = vadd.f32 %v3971_v36, %v3448_v37 }
 0x364   : > { %v3047_v40 = vpop.f32.mrf.mxu1 }
 0x365   : > { %3111 = vst [vmem:[%s6397_s19 + $0x28] sm:$0xff] %v3053_v58  ;;  %v3048_v34 = vadd.f32 %v3448_v37, %v3047_v40 }
 0x366   : > { %v3974_v57 = vpop.f32.mrf.mxu1 }
 0x367   : > { %3110 = vst [vmem:[%s6397_s19 + $0x20] sm:$0xff] %v3048_v34  ;;  %v3063_v41 = vadd.f32 %v3974_v57, %v3448_v37 }
 0x368   : > { %v3057_v49 = vpop.f32.mrf.mxu1 }
 0x369   : > { %3113 = vst [vmem:[%s6397_s19 + $0x38] sm:$0xff] %v3063_v41  ;;  %v3058_v62 = vadd.f32 %v3448_v37, %v3057_v49 }
 0x36b   : > { %v3977_v43 = vpop.f32.mrf.mxu1  ;;  %3112 = vst [vmem:[%s6397_s19 + $0x30] sm:$0xff] %v3058_v62 }
 0x36c   : > { %v3073_v2 = vadd.f32 %v3977_v43, %v3448_v37 }
 0x36d   : > { %v3067_v44 = vpop.f32.mrf.mxu1 }
 0x36e   : > { %3115 = vst [vmem:[%s6397_s19 + $0x48] sm:$0xff] %v3073_v2  ;;  %v3068_v10 = vadd.f32 %v3448_v37, %v3067_v44 }
 0x36f   : > { %v3980_v4 = vpop.f32.mrf.mxu1 }
 0x370   : > { %3114 = vst [vmem:[%s6397_s19 + $0x40] sm:$0xff] %v3068_v10  ;;  %v3083_v17 = vadd.f32 %v3980_v4, %v3448_v37 }
 0x371   : > { %v3077_v45 = vpop.f32.mrf.mxu1 }
 0x372   : > { %3117 = vst [vmem:[%s6397_s19 + $0x58] sm:$0xff] %v3083_v17  ;;  %v3078_v22 = vadd.f32 %v3448_v37, %v3077_v45 }
 0x373   : > { %v3983_v54 = vpop.f32.mrf.mxu1 }
 0x374   : > { %3116 = vst [vmem:[%s6397_s19 + $0x50] sm:$0xff] %v3078_v22  ;;  %v3093_v55 = vadd.f32 %v3983_v54, %v3448_v37 }
 0x375   : > { %v3087_v30 = vpop.f32.mrf.mxu1 }
 0x376   : > { %3119 = vst [vmem:[%s6397_s19 + $0x68] sm:$0xff] %v3093_v55  ;;  %v3088_v53 = vadd.f32 %v3448_v37, %v3087_v30 }
 0x378   : > { %3118 = vst [vmem:[%s6397_s19 + $0x60] sm:$0xff] %v3088_v53 }
 0x379   : > { %v3986_v12 = vpop.f32.mrf.mxu1 }
 0x37a   : > { %v3103_v51 = vadd.f32 %v3986_v12, %v3448_v37 }
 0x37b   : > { %v3097_v8 = vpop.f32.mrf.mxu1 }
 0x37c   : > { %3121 = vst [vmem:[%s6397_s19 + $0x78] sm:$0xff] %v3103_v51  ;;  %v3098_v56 = vadd.f32 %v3448_v37, %v3097_v8 }
 0x37e   : > { %3120 = vst [vmem:[%s6397_s19 + $0x70] sm:$0xff] %v3098_v56 }
 0x37f   : > { %4299 = shalt.err (!%p4296_p3)
}
 0x380   : > { %s4300_s14 = scalar_lea.hbm %s6418_s29, 2048  ;;  %s4304_s18 = scalar_lea.hbm %s6473_s7, 4096 }
 0x381   : > { %p4301_p4 = scmp.ne.s32.totalorder %s6418_s29, %s4300_s14  ;;  %p4305_p9 = scmp.lt.s32.totalorder %s6418_s29, %s6473_s7 }
 0x382   : > { %p4306_p10 = scmp.lt.s32.totalorder %s4304_s18, %s4300_s14 }
 0x383   : > { %p4302_p7 = pnand %p4301_p4, %p4430_p5 }
 0x384   : > { %p4307_p11 = por %p4306_p10, %p4305_p9 }
 0x385   : > { %p4303_p8 = pneg %p4302_p7 }
 0x387   : > { %p4308_p12 = pnand %p4307_p11, %p4303_p8 }
 0x389   : > { %4311 = shalt.err (!%p4308_p12)
}
 0x38a   : > { %s4350_s23 = smov 128   ;;  %s4351_s17 = smov 8  }
 0x38b   : > { %3987 = dma.vmem_to_hbm [thread:$0]  (%p4430_p5), %s6420_s15, 2048, %s6418_s29, %s6426_s21, %s4350_s23, %s4350_s23, %s4351_s17  }
 0x38c PF: > { %p3993_p13 = scmp.ge.s32.totalorder %s4346_s27, 2  ;;  %s3151_s28 = sand.u32 1, %s4334_s24  }
 0x38d   : > { %s3152_s8 = scalar_lea.sflag [#allocation3], %s3151_s28 }
 0x38e   : > { %p3990_p0 = pnand %p3993_p13, %p4434_p6 }
 0x390   : > { %p3991_p1 = pneg %p3990_p0 }
 0x392   : > { %4329 = dma.done.wait (%p3991_p1), %s3152_s8, 2048  }
 0x393   : > { %4331 = vsyncadd (%p3991_p1), %s3152_s8, 4294965248  ;;  %p17_p2 = scmp.ge.s32.totalorder %s4417_s30, 4   ;;  %s6611_s24 = smov %s4338_s25 }
 0x394   : > { %s6612_s25 = smov %s4342_s26  ;;  %s6613_s26 = smov %s4428_s10 }
 0x395   : > { %s6614_s27 = smov %s4417_s30  ;;  %19 = sbr.rel (!%p17_p2) target bundleno = 3 (0x3), region = 84 }
 0x39a   :  { %3157 = vsyncpa [#allocation3], 1 }
 0x39b   :  { %3159 = vsyncpa [#allocation3 + $0x1], 1 }

</bundles_post_ra>
